<compile_context>
chip_gen: v7x
topology: tpu7x:2x2x1
jax: 0.10.0
libtpu: 0.0.40
codegen_flags: <defaults>
</compile_context>

<pallas_src>
import functools

import jax
import jax.numpy as jnp
from jax import lax
from jax.experimental import pallas as pl
from jax.experimental.pallas import tpu as pltpu


# ----------------------------- kernel helpers -------------------------------

def _conv1d3_packed(x, w_packed, axis, dilation):
    """Fused 3-tap 1-D conv (full channel mixing) along `axis` of x:(H,W,C).

    w_packed: (3*Cin, Cout); rows [k*Cin:(k+1)*Cin] hold W_k^T for tap k.
    Matches Conv2d(kernel=3 along `axis`, padding=dilation, dilation=dilation)
    with zero ('same') padding.  Returns a (H*W, Cout) float32 result (MXU
    accumulation in f32).
    """
    d = dilation
    h, w, c = x.shape
    n = x.shape[axis]
    pad_shape = list(x.shape)
    pad_shape[axis] = d
    zeros = jnp.zeros(pad_shape, x.dtype)
    # Pad once per conv (2 concats/conv instead of 3 zero-concats/conv).
    xp = jnp.concatenate([zeros, x, zeros], axis=axis)
    # Tap k reads x[i + (k-1)*d] == xp[i + k*d]  (PyTorch kernel-index order).
    taps = [lax.slice_in_dim(xp, k * d, k * d + n, axis=axis) for k in range(3)]
    xc = jnp.concatenate(taps, axis=-1)                       # (H, W, 3*Cin)
    y = jnp.dot(xc.reshape(h * w, 3 * c), w_packed,
                preferred_element_type=jnp.float32)           # single MXU matmul
    return y                                                  # (H*W, Cout)


# --------------------------------- kernel ------------------------------------

def nb1d_kernel(x_ref,
                w1_ref, b1_ref,          # conv3x1_1 packed weight + bias
                w2_ref,                  # conv1x3_1 packed weight (bias folded in t1)
                s1_ref, t1_ref,          # bn1 folded scale / shift (+ conv1x3_1 bias)
                w3_ref, b3_ref,          # conv3x1_2 packed weight + bias (dilated over H)
                w4_ref,                  # conv1x3_2 packed weight (bias folded in t2)
                s2_ref, t2_ref,          # bn2 folded scale / shift (+ conv1x3_2 bias)
                out_ref,
                *, dilated, compute_dtype):
    h, w, c = x_ref.shape
    x = x_ref[...]                                            # (H, W, C) float32
    x2d = x.reshape(h * w, c)                                 # flat view for residual

    # conv3x1_1 + bias + relu
    y = _conv1d3_packed(x.astype(compute_dtype), w1_ref[...], axis=0, dilation=1)
    y = jnp.maximum(y + b1_ref[...], 0.0)                     # (H*W, C), (1,C) row-bcast

    # conv1x3_1 + bn1 (conv bias folded into shift) + relu
    y = _conv1d3_packed(y.reshape(h, w, c).astype(compute_dtype),
                        w2_ref[...], axis=1, dilation=1)
    y = jnp.maximum(y * s1_ref[...] + t1_ref[...], 0.0)

    # conv3x1_2 (dilated over H) + bias + relu
    y = _conv1d3_packed(y.reshape(h, w, c).astype(compute_dtype),
                        w3_ref[...], axis=0, dilation=dilated)
    y = jnp.maximum(y + b3_ref[...], 0.0)

    # conv1x3_2 (dilated over W) + bn2 (conv bias folded into shift)
    y = _conv1d3_packed(y.reshape(h, w, c).astype(compute_dtype),
                        w4_ref[...], axis=1, dilation=dilated)
    y = y * s2_ref[...] + t2_ref[...]

    # TODO(synk): Dropout2d skipped (dropprob==0 path; train-mode dropout is stochastic).
    out_ref[...] = jnp.maximum(y + x2d, 0.0).reshape(h, w, c).astype(out_ref.dtype)


# -------------------------------- wrappers ------------------------------------

def _bn_fold(p, extra_bias=None, eps=1e-3):
    scale = p["gamma"] / jnp.sqrt(p["var"] + eps)
    shift = p["beta"] - p["mean"] * scale
    if extra_bias is not None:              # fold the preceding conv bias into BN
        shift = shift + scale * extra_bias
    return scale, shift


def _pack_taps(w, axis):
    """PyTorch (Cout, Cin, kh, kw) 3-tap weight -> packed (3*Cin, Cout)."""
    if axis == 0:   # (3,1) kernel: taps along H
        taps = [w[:, :, k, 0] for k in range(3)]
    else:           # (1,3) kernel: taps along W
        taps = [w[:, :, 0, k] for k in range(3)]
    return jnp.concatenate([jnp.transpose(t) for t in taps], axis=0)


def non_bottleneck_1d_nhwc(x, params, dilated, *, use_bf16=False, interpret=False):
    """x: (N, H, W, C) float32 (channels-last). Returns (N, H, W, C)."""
    n, h, w, c = x.shape
    compute_dtype = jnp.bfloat16 if use_bf16 else jnp.float32

    # Host-side weight packing / BN folding (zero kernel-side transposes).
    w1 = _pack_taps(params["conv3x1_1"]["w"], 0).astype(compute_dtype)
    w2 = _pack_taps(params["conv1x3_1"]["w"], 1).astype(compute_dtype)
    w3 = _pack_taps(params["conv3x1_2"]["w"], 0).astype(compute_dtype)
    w4 = _pack_taps(params["conv1x3_2"]["w"], 1).astype(compute_dtype)
    b1 = params["conv3x1_1"]["b"].reshape(1, c).astype(jnp.float32)
    b3 = params["conv3x1_2"]["b"].reshape(1, c).astype(jnp.float32)
    s1, t1 = _bn_fold(params["bn1"], extra_bias=params["conv1x3_1"]["b"])
    s2, t2 = _bn_fold(params["bn2"], extra_bias=params["conv1x3_2"]["b"])
    s1, t1 = s1.reshape(1, c).astype(jnp.float32), t1.reshape(1, c).astype(jnp.float32)
    s2, t2 = s2.reshape(1, c).astype(jnp.float32), t2.reshape(1, c).astype(jnp.float32)

    # Specs: x/out tiled over the batch; params resident (constant index_map).
    x_spec = pl.BlockSpec((None, h, w, c), lambda b: (b, 0, 0, 0))
    out_spec = pl.BlockSpec((None, h, w, c), lambda b: (b, 0, 0, 0))

    def resident(a):
        return pl.BlockSpec(a.shape, lambda b: (0, 0))

    flops = int(4 * 2 * 3 * c * c * n * h * w)                 # 4 convs, K=3C
    bytes_accessed = int(2 * n * h * w * c * 4                 # x in + out
                         + 4 * 3 * c * c * w1.dtype.itemsize   # packed weights
                         + 6 * c * 4)                          # biases / BN params

    out = pl.pallas_call(
        functools.partial(nb1d_kernel, dilated=dilated, compute_dtype=compute_dtype),
        grid=(n,),
        in_specs=[x_spec,
                  resident(w1), resident(b1),
                  resident(w2), resident(s1), resident(t1),
                  resident(w3), resident(b3),
                  resident(w4), resident(s2), resident(t2)],
        out_specs=out_spec,
        out_shape=jax.ShapeDtypeStruct((n, h, w, c), x.dtype),
        compiler_params=pltpu.CompilerParams(
            dimension_semantics=("parallel",),          # megacore-shard the batch
            vmem_limit_bytes=64 * 1024 * 1024),
        cost_estimate=pl.CostEstimate(flops=flops, transcendentals=0,
                                      bytes_accessed=bytes_accessed),
        interpret=interpret,
    )(x, w1, b1, w2, s1, t1, w3, b3, w4, s2, t2)
    return out


def non_bottleneck_1d_nchw(x_nchw, params, dilated, **kw):
    """Drop-in NCHW shim matching the PyTorch module's layout."""
    x = jnp.transpose(x_nchw, (0, 2, 3, 1))
    y = non_bottleneck_1d_nhwc(x, params, dilated, **kw)
    return jnp.transpose(y, (0, 3, 1, 2))


# ----------------------- pure-JAX reference (NHWC) ---------------------------

def _ref_conv_nhwc(x, wgt, bias, padding, dilation):
    w_hwio = jnp.transpose(wgt, (2, 3, 1, 0))
    y = lax.conv_general_dilated(
        x, w_hwio, window_strides=(1, 1), padding=padding,
        rhs_dilation=dilation, dimension_numbers=("NHWC", "HWIO", "NHWC"))
    return y + bias.reshape(1, 1, 1, -1)


def _ref_bn_nhwc(x, p, eps=1e-3):
    scale = p["gamma"] / jnp.sqrt(p["var"] + eps)
    shift = p["beta"] - p["mean"] * scale
    return x * scale.reshape(1, 1, 1, -1) + shift.reshape(1, 1, 1, -1)


def non_bottleneck_1d_ref_nhwc(x, params, d):
    y = _ref_conv_nhwc(x, params["conv3x1_1"]["w"], params["conv3x1_1"]["b"],
                       ((1, 1), (0, 0)), (1, 1))
    y = jnp.maximum(y, 0.0)
    y = _ref_conv_nhwc(y, params["conv1x3_1"]["w"], params["conv1x3_1"]["b"],
                       ((0, 0), (1, 1)), (1, 1))
    y = _ref_bn_nhwc(y, params["bn1"])
    y = jnp.maximum(y, 0.0)
    y = _ref_conv_nhwc(y, params["conv3x1_2"]["w"], params["conv3x1_2"]["b"],
                       ((d, d), (0, 0)), (d, 1))
    y = jnp.maximum(y, 0.0)
    y = _ref_conv_nhwc(y, params["conv1x3_2"]["w"], params["conv1x3_2"]["b"],
                       ((0, 0), (d, d)), (1, d))
    y = _ref_bn_nhwc(y, params["bn2"])
    return jnp.maximum(y + x, 0.0)


# --------------------------------- main ---------------------------------------

def make_params(key, c):
    ks = jax.random.split(key, 16)
    i = iter(range(16))

    def conv(kh, kw):
        return {
            "w": 0.1 * jax.random.normal(ks[next(i)], (c, c, kh, kw), jnp.float32),
            "b": 0.1 * jax.random.normal(ks[next(i)], (c,), jnp.float32),
        }

    def bn():
        return {
            "gamma": 1.0 + 0.1 * jax.random.normal(ks[next(i)], (c,), jnp.float32),
            "beta": 0.1 * jax.random.normal(ks[next(i)], (c,), jnp.float32),
            "mean": 0.1 * jax.random.normal(ks[next(i)], (c,), jnp.float32),
            "var": 0.5 + jnp.abs(jax.random.normal(ks[next(i)], (c,), jnp.float32)) * 0.5,
        }

    return {
        "conv3x1_1": conv(3, 1),
        "conv1x3_1": conv(1, 3),
        "bn1": bn(),
        "conv3x1_2": conv(3, 1),
        "conv1x3_2": conv(1, 3),
        "bn2": bn(),
    }


if __name__ == "__main__":
    N, C, H, W = 2, 8, 16, 16
    DILATED = 2
    # dropprob = 0.0 -> dropout branch skipped (matches `if self.dropout.p != 0`).

    key = jax.random.PRNGKey(0)
    kx, kp = jax.random.split(key)
    x = jax.random.normal(kx, (N, H, W, C), jnp.float32)        # NHWC (channels-last)
    params = make_params(kp, C)

    # f32 path (tight check vs pure-JAX reference)
    out = jax.block_until_ready(non_bottleneck_1d_nhwc(x, params, DILATED))
    ref = jax.block_until_ready(non_bottleneck_1d_ref_nhwc(x, params, DILATED))
    err = float(jnp.max(jnp.abs(out - ref)))
    assert out.shape == (N, H, W, C)
    assert err < 1e-2, f"f32 mismatch vs reference: {err}"

    # bf16 MXU-input fast path (v6e/v7x); f32 accumulation, looser tolerance.
    out_bf16 = jax.block_until_ready(
        non_bottleneck_1d_nhwc(x, params, DILATED, use_bf16=True))
    err_bf16 = float(jnp.max(jnp.abs(out_bf16 - ref)))
    assert err_bf16 < 1e-1, f"bf16 mismatch vs reference: {err_bf16}"

    # NCHW drop-in shim (PyTorch module layout parity).
    x_nchw = jnp.transpose(x, (0, 3, 1, 2))
    out_nchw = jax.block_until_ready(non_bottleneck_1d_nchw(x_nchw, params, DILATED))
    err_nchw = float(jnp.max(jnp.abs(out_nchw - jnp.transpose(ref, (0, 3, 1, 2)))))
    assert err_nchw < 1e-2, f"NCHW shim mismatch: {err_nchw}"

    print("KERNEL_OK")
</pallas_src>

<mosaic_0001>
module attributes {stable_mosaic.version = 11 : i64} {
  func.func @nb1d_kernel(%arg0: i32, %arg1: memref<1x16x16x8xf32, #tpu.memory_space<vmem>>, %arg2: memref<24x8xf32, #tpu.memory_space<vmem>>, %arg3: memref<1x8xf32, #tpu.memory_space<vmem>>, %arg4: memref<24x8xf32, #tpu.memory_space<vmem>>, %arg5: memref<1x8xf32, #tpu.memory_space<vmem>>, %arg6: memref<1x8xf32, #tpu.memory_space<vmem>>, %arg7: memref<24x8xf32, #tpu.memory_space<vmem>>, %arg8: memref<1x8xf32, #tpu.memory_space<vmem>>, %arg9: memref<24x8xf32, #tpu.memory_space<vmem>>, %arg10: memref<1x8xf32, #tpu.memory_space<vmem>>, %arg11: memref<1x8xf32, #tpu.memory_space<vmem>>, %arg12: memref<1x16x16x8xf32, #tpu.memory_space<vmem>>) attributes {dimension_semantics = [#tpu.dimension_semantics<parallel>], iteration_bounds = array<i64: 2>, scalar_prefetch = 0 : i64, scratch_operands = 0 : i64, tpu.core_type = #tpu.core_type<tc>, window_params = [{transform_indices = @transform_0, window_bounds = array<i64: 1, 16, 16, 8>}, {pipeline_mode = #tpu.pipeline_mode<synchronous>, transform_indices = @transform_1, window_bounds = array<i64: 24, 8>}, {pipeline_mode = #tpu.pipeline_mode<synchronous>, transform_indices = @transform_2, window_bounds = array<i64: 1, 8>}, {pipeline_mode = #tpu.pipeline_mode<synchronous>, transform_indices = @transform_3, window_bounds = array<i64: 24, 8>}, {pipeline_mode = #tpu.pipeline_mode<synchronous>, transform_indices = @transform_4, window_bounds = array<i64: 1, 8>}, {pipeline_mode = #tpu.pipeline_mode<synchronous>, transform_indices = @transform_5, window_bounds = array<i64: 1, 8>}, {pipeline_mode = #tpu.pipeline_mode<synchronous>, transform_indices = @transform_6, window_bounds = array<i64: 24, 8>}, {pipeline_mode = #tpu.pipeline_mode<synchronous>, transform_indices = @transform_7, window_bounds = array<i64: 1, 8>}, {pipeline_mode = #tpu.pipeline_mode<synchronous>, transform_indices = @transform_8, window_bounds = array<i64: 24, 8>}, {pipeline_mode = #tpu.pipeline_mode<synchronous>, transform_indices = @transform_9, window_bounds = array<i64: 1, 8>}, {pipeline_mode = #tpu.pipeline_mode<synchronous>, transform_indices = @transform_10, window_bounds = array<i64: 1, 8>}, {transform_indices = @transform_11, window_bounds = array<i64: 1, 16, 16, 8>}]} {
    %c0 = arith.constant 0 : index
    %c0_0 = arith.constant 0 : index
    %c0_1 = arith.constant 0 : index
    %c0_2 = arith.constant 0 : index
    %0 = vector.load %arg1[%c0, %c0_0, %c0_1, %c0_2] : memref<1x16x16x8xf32, #tpu.memory_space<vmem>>, vector<1x16x16x8xf32>
    %1 = vector.shape_cast %0 : vector<1x16x16x8xf32> to vector<16x16x8xf32>
    %2 = vector.shape_cast %1 : vector<16x16x8xf32> to vector<256x8xf32>
    %c0_3 = arith.constant 0 : index
    %c0_4 = arith.constant 0 : index
    %3 = vector.load %arg2[%c0_3, %c0_4] : memref<24x8xf32, #tpu.memory_space<vmem>>, vector<24x8xf32>
    %cst = arith.constant 0.000000e+00 : f32
    %4 = vector.broadcast %cst : f32 to vector<1x16x8xf32>
    %5 = tpu.concatenate %4, %1, %4 in 0 : vector<1x16x8xf32>, vector<16x16x8xf32>, vector<1x16x8xf32> -> vector<18x16x8xf32>
    %6 = vector.extract_strided_slice %5 {offsets = [0, 0, 0], sizes = [16, 16, 8], strides = [1, 1, 1]} : vector<18x16x8xf32> to vector<16x16x8xf32>
    %7 = vector.extract_strided_slice %5 {offsets = [1, 0, 0], sizes = [16, 16, 8], strides = [1, 1, 1]} : vector<18x16x8xf32> to vector<16x16x8xf32>
    %8 = vector.extract_strided_slice %5 {offsets = [2, 0, 0], sizes = [16, 16, 8], strides = [1, 1, 1]} : vector<18x16x8xf32> to vector<16x16x8xf32>
    %9 = tpu.concatenate %6, %7, %8 in 2 : vector<16x16x8xf32>, vector<16x16x8xf32>, vector<16x16x8xf32> -> vector<16x16x24xf32>
    %10 = vector.shape_cast %9 : vector<16x16x24xf32> to vector<256x24xf32>
    %cst_5 = arith.constant dense<0.000000e+00> : vector<256x8xf32>
    %11 = tpu.matmul %10, %3, %cst_5 {dimension_numbers = #tpu.dot_dimension_numbers<[1], [0], [0], [1], [0, 0, 1, 1], [], []>} : vector<256x24xf32>, vector<24x8xf32>, vector<256x8xf32> -> vector<256x8xf32>
    %c0_6 = arith.constant 0 : index
    %c0_7 = arith.constant 0 : index
    %12 = vector.load %arg3[%c0_6, %c0_7] : memref<1x8xf32, #tpu.memory_space<vmem>>, vector<1x8xf32>
    %13 = vector.broadcast %12 : vector<1x8xf32> to vector<256x8xf32>
    %14 = arith.addf %11, %13 : vector<256x8xf32>
    %cst_8 = arith.constant 0.000000e+00 : f32
    %15 = vector.broadcast %cst_8 : f32 to vector<256x8xf32>
    %16 = arith.maximumf %14, %15 : vector<256x8xf32>
    %17 = vector.shape_cast %16 : vector<256x8xf32> to vector<16x16x8xf32>
    %c0_9 = arith.constant 0 : index
    %c0_10 = arith.constant 0 : index
    %18 = vector.load %arg4[%c0_9, %c0_10] : memref<24x8xf32, #tpu.memory_space<vmem>>, vector<24x8xf32>
    %cst_11 = arith.constant 0.000000e+00 : f32
    %19 = vector.broadcast %cst_11 : f32 to vector<16x1x8xf32>
    %20 = tpu.concatenate %19, %17, %19 in 1 : vector<16x1x8xf32>, vector<16x16x8xf32>, vector<16x1x8xf32> -> vector<16x18x8xf32>
    %21 = vector.extract_strided_slice %20 {offsets = [0, 0, 0], sizes = [16, 16, 8], strides = [1, 1, 1]} : vector<16x18x8xf32> to vector<16x16x8xf32>
    %22 = vector.extract_strided_slice %20 {offsets = [0, 1, 0], sizes = [16, 16, 8], strides = [1, 1, 1]} : vector<16x18x8xf32> to vector<16x16x8xf32>
    %23 = vector.extract_strided_slice %20 {offsets = [0, 2, 0], sizes = [16, 16, 8], strides = [1, 1, 1]} : vector<16x18x8xf32> to vector<16x16x8xf32>
    %24 = tpu.concatenate %21, %22, %23 in 2 : vector<16x16x8xf32>, vector<16x16x8xf32>, vector<16x16x8xf32> -> vector<16x16x24xf32>
    %25 = vector.shape_cast %24 : vector<16x16x24xf32> to vector<256x24xf32>
    %cst_12 = arith.constant dense<0.000000e+00> : vector<256x8xf32>
    %26 = tpu.matmul %25, %18, %cst_12 {dimension_numbers = #tpu.dot_dimension_numbers<[1], [0], [0], [1], [0, 0, 1, 1], [], []>} : vector<256x24xf32>, vector<24x8xf32>, vector<256x8xf32> -> vector<256x8xf32>
    %c0_13 = arith.constant 0 : index
    %c0_14 = arith.constant 0 : index
    %27 = vector.load %arg5[%c0_13, %c0_14] : memref<1x8xf32, #tpu.memory_space<vmem>>, vector<1x8xf32>
    %28 = vector.broadcast %27 : vector<1x8xf32> to vector<256x8xf32>
    %29 = arith.mulf %26, %28 : vector<256x8xf32>
    %c0_15 = arith.constant 0 : index
    %c0_16 = arith.constant 0 : index
    %30 = vector.load %arg6[%c0_15, %c0_16] : memref<1x8xf32, #tpu.memory_space<vmem>>, vector<1x8xf32>
    %31 = vector.broadcast %30 : vector<1x8xf32> to vector<256x8xf32>
    %32 = arith.addf %29, %31 : vector<256x8xf32>
    %cst_17 = arith.constant 0.000000e+00 : f32
    %33 = vector.broadcast %cst_17 : f32 to vector<256x8xf32>
    %34 = arith.maximumf %32, %33 : vector<256x8xf32>
    %35 = vector.shape_cast %34 : vector<256x8xf32> to vector<16x16x8xf32>
    %c0_18 = arith.constant 0 : index
    %c0_19 = arith.constant 0 : index
    %36 = vector.load %arg7[%c0_18, %c0_19] : memref<24x8xf32, #tpu.memory_space<vmem>>, vector<24x8xf32>
    %cst_20 = arith.constant 0.000000e+00 : f32
    %37 = vector.broadcast %cst_20 : f32 to vector<2x16x8xf32>
    %38 = tpu.concatenate %37, %35, %37 in 0 : vector<2x16x8xf32>, vector<16x16x8xf32>, vector<2x16x8xf32> -> vector<20x16x8xf32>
    %39 = vector.extract_strided_slice %38 {offsets = [0, 0, 0], sizes = [16, 16, 8], strides = [1, 1, 1]} : vector<20x16x8xf32> to vector<16x16x8xf32>
    %40 = vector.extract_strided_slice %38 {offsets = [2, 0, 0], sizes = [16, 16, 8], strides = [1, 1, 1]} : vector<20x16x8xf32> to vector<16x16x8xf32>
    %41 = vector.extract_strided_slice %38 {offsets = [4, 0, 0], sizes = [16, 16, 8], strides = [1, 1, 1]} : vector<20x16x8xf32> to vector<16x16x8xf32>
    %42 = tpu.concatenate %39, %40, %41 in 2 : vector<16x16x8xf32>, vector<16x16x8xf32>, vector<16x16x8xf32> -> vector<16x16x24xf32>
    %43 = vector.shape_cast %42 : vector<16x16x24xf32> to vector<256x24xf32>
    %cst_21 = arith.constant dense<0.000000e+00> : vector<256x8xf32>
    %44 = tpu.matmul %43, %36, %cst_21 {dimension_numbers = #tpu.dot_dimension_numbers<[1], [0], [0], [1], [0, 0, 1, 1], [], []>} : vector<256x24xf32>, vector<24x8xf32>, vector<256x8xf32> -> vector<256x8xf32>
    %c0_22 = arith.constant 0 : index
    %c0_23 = arith.constant 0 : index
    %45 = vector.load %arg8[%c0_22, %c0_23] : memref<1x8xf32, #tpu.memory_space<vmem>>, vector<1x8xf32>
    %46 = vector.broadcast %45 : vector<1x8xf32> to vector<256x8xf32>
    %47 = arith.addf %44, %46 : vector<256x8xf32>
    %cst_24 = arith.constant 0.000000e+00 : f32
    %48 = vector.broadcast %cst_24 : f32 to vector<256x8xf32>
    %49 = arith.maximumf %47, %48 : vector<256x8xf32>
    %50 = vector.shape_cast %49 : vector<256x8xf32> to vector<16x16x8xf32>
    %c0_25 = arith.constant 0 : index
    %c0_26 = arith.constant 0 : index
    %51 = vector.load %arg9[%c0_25, %c0_26] : memref<24x8xf32, #tpu.memory_space<vmem>>, vector<24x8xf32>
    %cst_27 = arith.constant 0.000000e+00 : f32
    %52 = vector.broadcast %cst_27 : f32 to vector<16x2x8xf32>
    %53 = tpu.concatenate %52, %50, %52 in 1 : vector<16x2x8xf32>, vector<16x16x8xf32>, vector<16x2x8xf32> -> vector<16x20x8xf32>
    %54 = vector.extract_strided_slice %53 {offsets = [0, 0, 0], sizes = [16, 16, 8], strides = [1, 1, 1]} : vector<16x20x8xf32> to vector<16x16x8xf32>
    %55 = vector.extract_strided_slice %53 {offsets = [0, 2, 0], sizes = [16, 16, 8], strides = [1, 1, 1]} : vector<16x20x8xf32> to vector<16x16x8xf32>
    %56 = vector.extract_strided_slice %53 {offsets = [0, 4, 0], sizes = [16, 16, 8], strides = [1, 1, 1]} : vector<16x20x8xf32> to vector<16x16x8xf32>
    %57 = tpu.concatenate %54, %55, %56 in 2 : vector<16x16x8xf32>, vector<16x16x8xf32>, vector<16x16x8xf32> -> vector<16x16x24xf32>
    %58 = vector.shape_cast %57 : vector<16x16x24xf32> to vector<256x24xf32>
    %cst_28 = arith.constant dense<0.000000e+00> : vector<256x8xf32>
    %59 = tpu.matmul %58, %51, %cst_28 {dimension_numbers = #tpu.dot_dimension_numbers<[1], [0], [0], [1], [0, 0, 1, 1], [], []>} : vector<256x24xf32>, vector<24x8xf32>, vector<256x8xf32> -> vector<256x8xf32>
    %c0_29 = arith.constant 0 : index
    %c0_30 = arith.constant 0 : index
    %60 = vector.load %arg10[%c0_29, %c0_30] : memref<1x8xf32, #tpu.memory_space<vmem>>, vector<1x8xf32>
    %61 = vector.broadcast %60 : vector<1x8xf32> to vector<256x8xf32>
    %62 = arith.mulf %59, %61 : vector<256x8xf32>
    %c0_31 = arith.constant 0 : index
    %c0_32 = arith.constant 0 : index
    %63 = vector.load %arg11[%c0_31, %c0_32] : memref<1x8xf32, #tpu.memory_space<vmem>>, vector<1x8xf32>
    %64 = vector.broadcast %63 : vector<1x8xf32> to vector<256x8xf32>
    %65 = arith.addf %62, %64 : vector<256x8xf32>
    %66 = arith.addf %65, %2 : vector<256x8xf32>
    %cst_33 = arith.constant 0.000000e+00 : f32
    %67 = vector.broadcast %cst_33 : f32 to vector<256x8xf32>
    %68 = arith.maximumf %66, %67 : vector<256x8xf32>
    %69 = vector.shape_cast %68 : vector<256x8xf32> to vector<16x16x8xf32>
    %c0_34 = arith.constant 0 : index
    %c0_35 = arith.constant 0 : index
    %c0_36 = arith.constant 0 : index
    %c0_37 = arith.constant 0 : index
    %70 = vector.load %arg12[%c0_34, %c0_35, %c0_36, %c0_37] : memref<1x16x16x8xf32, #tpu.memory_space<vmem>>, vector<1x16x16x8xf32>
    %71 = vector.shape_cast %70 : vector<1x16x16x8xf32> to vector<16x16x8xf32>
    %72 = vector.shape_cast %69 : vector<16x16x8xf32> to vector<1x16x16x8xf32>
    tpu.vector_store %arg12[%c0_34, %c0_35, %c0_36, %c0_37], %72 {strides = array<i32>} : memref<1x16x16x8xf32, #tpu.memory_space<vmem>>, vector<1x16x16x8xf32>,
    return
  }
  func.func @transform_0(%arg0: i32) -> (i32, i32, i32, i32) {
    %c0_i32 = arith.constant 0 : i32
    %c0_i32_0 = arith.constant 0 : i32
    %c0_i32_1 = arith.constant 0 : i32
    %c0_i32_2 = arith.constant 0 : i32
    return %arg0, %c0_i32, %c0_i32_0, %c0_i32_1 : i32, i32, i32, i32
  }
  func.func @transform_1(%arg0: i32) -> (i32, i32) {
    %c0_i32 = arith.constant 0 : i32
    %c0_i32_0 = arith.constant 0 : i32
    %c0_i32_1 = arith.constant 0 : i32
    return %c0_i32, %c0_i32_0 : i32, i32
  }
  func.func @transform_2(%arg0: i32) -> (i32, i32) {
    %c0_i32 = arith.constant 0 : i32
    %c0_i32_0 = arith.constant 0 : i32
    %c0_i32_1 = arith.constant 0 : i32
    return %c0_i32, %c0_i32_0 : i32, i32
  }
  func.func @transform_3(%arg0: i32) -> (i32, i32) {
    %c0_i32 = arith.constant 0 : i32
    %c0_i32_0 = arith.constant 0 : i32
    %c0_i32_1 = arith.constant 0 : i32
    return %c0_i32, %c0_i32_0 : i32, i32
  }
  func.func @transform_4(%arg0: i32) -> (i32, i32) {
    %c0_i32 = arith.constant 0 : i32
    %c0_i32_0 = arith.constant 0 : i32
    %c0_i32_1 = arith.constant 0 : i32
    return %c0_i32, %c0_i32_0 : i32, i32
  }
  func.func @transform_5(%arg0: i32) -> (i32, i32) {
    %c0_i32 = arith.constant 0 : i32
    %c0_i32_0 = arith.constant 0 : i32
    %c0_i32_1 = arith.constant 0 : i32
    return %c0_i32, %c0_i32_0 : i32, i32
  }
  func.func @transform_6(%arg0: i32) -> (i32, i32) {
    %c0_i32 = arith.constant 0 : i32
    %c0_i32_0 = arith.constant 0 : i32
    %c0_i32_1 = arith.constant 0 : i32
    return %c0_i32, %c0_i32_0 : i32, i32
  }
  func.func @transform_7(%arg0: i32) -> (i32, i32) {
    %c0_i32 = arith.constant 0 : i32
    %c0_i32_0 = arith.constant 0 : i32
    %c0_i32_1 = arith.constant 0 : i32
    return %c0_i32, %c0_i32_0 : i32, i32
  }
  func.func @transform_8(%arg0: i32) -> (i32, i32) {
    %c0_i32 = arith.constant 0 : i32
    %c0_i32_0 = arith.constant 0 : i32
    %c0_i32_1 = arith.constant 0 : i32
    return %c0_i32, %c0_i32_0 : i32, i32
  }
  func.func @transform_9(%arg0: i32) -> (i32, i32) {
    %c0_i32 = arith.constant 0 : i32
    %c0_i32_0 = arith.constant 0 : i32
    %c0_i32_1 = arith.constant 0 : i32
    return %c0_i32, %c0_i32_0 : i32, i32
  }
  func.func @transform_10(%arg0: i32) -> (i32, i32) {
    %c0_i32 = arith.constant 0 : i32
    %c0_i32_0 = arith.constant 0 : i32
    %c0_i32_1 = arith.constant 0 : i32
    return %c0_i32, %c0_i32_0 : i32, i32
  }
  func.func @transform_11(%arg0: i32) -> (i32, i32, i32, i32) {
    %c0_i32 = arith.constant 0 : i32
    %c0_i32_0 = arith.constant 0 : i32
    %c0_i32_1 = arith.constant 0 : i32
    %c0_i32_2 = arith.constant 0 : i32
    return %arg0, %c0_i32, %c0_i32_0, %c0_i32_1 : i32, i32, i32, i32
  }
}

</mosaic_0001>

<bundles_post_ra>
// kernel: tpu_custom_call.1
= control target key start
LH: loop header
LB: loop body
LE: loop exit
PB: predicated region body
PF: predicated region fallthrough
CT: control target
= control target key end

     0   :  { %s7645_s0 = inlined_call_operand.hbm [shape: f32[2,16,16,8], index: 0, kind: input, shape index: {}]   ;;  %s7646_s1 = inlined_call_operand.hbm [shape: f32[24,8], index: 1, kind: input, shape index: {}]   ;;  %s7647_s2 = inlined_call_operand.hbm [shape: f32[1,8], index: 2, kind: input, shape index: {}]   ;;  %s7648_s3 = inlined_call_operand.hbm [shape: f32[24,8], index: 3, kind: input, shape index: {}]   ;;  %s7649_s4 = inlined_call_operand.hbm [shape: f32[1,8], index: 4, kind: input, shape index: {}]   ;;  %s7650_s5 = inlined_call_operand.hbm [shape: f32[1,8], index: 5, kind: input, shape index: {}]   ;;  %s7651_s6 = inlined_call_operand.hbm [shape: f32[24,8], index: 6, kind: input, shape index: {}]   ;;  %s7652_s7 = inlined_call_operand.hbm [shape: f32[1,8], index: 7, kind: input, shape index: {}]   ;;  %s7653_s8 = inlined_call_operand.hbm [shape: f32[24,8], index: 8, kind: input, shape index: {}]   ;;  %s7654_s9 = inlined_call_operand.hbm [shape: f32[1,8], index: 9, kind: input, shape index: {}]   ;;  %s7655_s10 = inlined_call_operand.hbm [shape: f32[1,8], index: 10, kind: input, shape index: {}]   ;;  %s7656_s11 = inlined_call_operand.hbm [shape: f32[2,16,16,8], index: 11, kind: output, shape index: {}]  }
   0x1   :  { %7666 = sst [smem:[#allocation29_spill]] %s7645_s0 }
   0x2   :  { %7667 = sst [smem:[#allocation30_spill]] %s7646_s1 }
   0x3   :  { %7668 = sst [smem:[#allocation31_spill]] %s7647_s2 }
   0x4   :  { %7669 = sst [smem:[#allocation32_spill]] %s7656_s11 }
   0x5   :  { %16 = vsyncpa [#allocation3], 0 }
   0x6   :  { %18 = vsyncpa [#allocation3 + $0x1], 0 }
   0x7   :  { %19 = vsyncpa [#allocation6], 0 }
   0x8   :  { %20 = vsyncpa [#allocation9], 0 }
   0x9   :  { %21 = vsyncpa [#allocation12], 0 }
   0xa   :  { %22 = vsyncpa [#allocation15], 0 }
   0xb   :  { %23 = vsyncpa [#allocation18], 0 }
   0xc   :  { %24 = vsyncpa [#allocation4], 0 }
   0xd   :  { %26 = vsyncpa [#allocation4 + $0x1], 0  ;;  %s5399_s17 = smov 0   ;;  %s5401_s18 = smov 0  }
   0xe   :  { %s5403_s19 = smov 0   ;;  %s5405_s20 = smov 0  }
   0xf LB: > { %s5321_s21 = smov [#allocation5]   ;;  %s5420_s23 = sadd.s32 4294967295, %s5319_s20   ;;  %s5319_s20 = sphi %s5405_s20, %s7704_s20   ;;  %s5315_s19 = sphi %s5403_s19, %s7703_s19   ;;  %s5311_s18 = sphi %s5401_s18, %s7702_s18   ;;  %s5307_s17 = sphi %s5399_s17, %s7701_s17  }
  0x10   : > { %s311_s22 = sshll.u32 %s5321_s21, 4  ;;  %p4197_p0 = scmp.ge.s32.totalorder %s5319_s20, 1  ;;  %s5425_s22 = int_to_ptr.vmem [resolvable:$true] %s311_s22 }
  0x11   : > { %p7662_p1 = scmp.eq.s32.totalorder %s5420_s23, 0  ;;  %p299_p2 = scmp.lt.s32.totalorder %s5319_s20, 3 }
  0x12   : > { %s5322_s25 = smov [#allocation8]   ;;  %s5323_s28 = smov [#allocation11]  }
  0x13   : > { %p5427_p3 = pnand %p4197_p0, %p299_p2  ;;  %s335_s26 = sshll.u32 %s5322_s25, 4  ;;  %s5440_s26 = int_to_ptr.vmem [resolvable:$true] %s335_s26 }
  0x14   : > { %s360_s29 = sshll.u32 %s5323_s28, 4  ;;  %s7673_s1 = sld [smem:[#allocation30_spill]]  ;;  %s5442_s29 = int_to_ptr.vmem [resolvable:$true] %s360_s29 }
  0x15   : > { %s7670_s24 = scalar_select %p5427_p3, 1, 0 }
  0x16   : > { %p4782_p5 = pneg %p5427_p3 }
  0x17   : > { %7671 = sst [smem:[#allocation28_spill]] %s7670_s24 }
  0x18   : > { %p5436_p6 = pnand %p4782_p5, %p7662_p1 }
  0x1a   : > { %s4923_s13 = scalar_lea.hbm %s7673_s1, 384  ;;  %p5452_p8 = pneg %p5436_p6 }
  0x1b   : > { %p4924_p7 = scmp.ne.s32.totalorder %s7673_s1, %s4923_s13  ;;  %p4930_p11 = scmp.lt.u32.totalorder %s4923_s13, %s7673_s1 }
  0x1d   : > { %p4926_p9 = pnand %p5452_p8, %p4924_p7 }
  0x1f   : > { %p4927_p10 = pneg %p4926_p9 }
  0x21   : > { %p4932_p12 = pnand %p4930_p11, %p4927_p10 }
  0x23   : > { %4935 = shalt.err (!%p4932_p12)
}
  0x24   : > { %s4936_s28 = scalar_lea.vmem %s5425_s22, 384  ;;  %p4944_p5 = scmp.lt.s32.totalorder %s5425_s22, %s5425_s22 }
  0x25   : > { %p4937_p13 = scmp.ne.s32.totalorder %s5425_s22, %s4936_s28  ;;  %p4945_p4 = scmp.lt.s32.totalorder %s4936_s28, %s4936_s28 }
  0x27   : > { %p4939_p0 = pnand %p4937_p13, %p5452_p8  ;;  %p4946_p7 = por %p4945_p4, %p4944_p5 }
  0x29   : > { %p4940_p2 = pneg %p4939_p0 }
  0x2b   : > { %p4947_p9 = pnand %p4946_p7, %p4940_p2 }
  0x2d   : > { %4950 = shalt.err (!%p4947_p9)
}
  0x2e   : > { %s7660_s30 = smov 128   ;;  %s7664_s12 = smov 8  }
  0x2f   : > { %4785 = dma.hbm_to_vmem [thread:$0]  (!%p5436_p6), %s7673_s1, 384, %s5425_s22, [#allocation6], %s7660_s30, %s7660_s30, %s7664_s12  }
  0x30   : > { %s4951_s25 = scalar_lea.hbm %s7648_s3, 384 }
  0x31   : > { %p4952_p4 = scmp.ne.s32.totalorder %s7648_s3, %s4951_s25  ;;  %p4958_p12 = scmp.lt.u32.totalorder %s4951_s25, %s7648_s3 }
  0x33   : > { %p4954_p10 = pnand %p4952_p4, %p5452_p8 }
  0x35   : > { %p4955_p11 = pneg %p4954_p10 }
  0x37   : > { %p4960_p13 = pnand %p4958_p12, %p4955_p11 }
  0x39   : > { %4963 = shalt.err (!%p4960_p13)
}
  0x3a   : > { %s4964_s22 = scalar_lea.vmem %s5440_s26, 384  ;;  %p4972_p7 = scmp.lt.s32.totalorder %s5440_s26, %s5440_s26 }
  0x3b   : > { %p4965_p0 = scmp.ne.s32.totalorder %s5440_s26, %s4964_s22  ;;  %p4973_p9 = scmp.lt.s32.totalorder %s4964_s22, %s4964_s22 }
  0x3d   : > { %p4967_p2 = pnand %p4965_p0, %p5452_p8  ;;  %p4974_p4 = por %p4973_p9, %p4972_p7 }
  0x3f   : > { %p4968_p5 = pneg %p4967_p2 }
  0x41   : > { %p4975_p10 = pnand %p4974_p4, %p4968_p5 }
  0x43   : > { %4978 = shalt.err (!%p4975_p10)
}
  0x44   : > { %4791 = dma.hbm_to_vmem [thread:$0]  (!%p5436_p6), %s7648_s3, 384, %s5440_s26, [#allocation9], %s7660_s30, %s7660_s30, %s7664_s12  }
  0x45   : > { %s4979_s14 = scalar_lea.hbm %s7650_s5, 16 }
  0x46   : > { %p4980_p11 = scmp.ne.s32.totalorder %s7650_s5, %s4979_s14  ;;  %p4986_p0 = scmp.lt.u32.totalorder %s4979_s14, %s7650_s5 }
  0x48   : > { %p4982_p12 = pnand %p4980_p11, %p5452_p8 }
  0x4a   : > { %p4983_p13 = pneg %p4982_p12 }
  0x4c   : > { %p4988_p2 = pnand %p4986_p0, %p4983_p13 }
  0x4e   : > { %4991 = shalt.err (!%p4988_p2)
}
  0x4f   : > { %s4992_s26 = scalar_lea.vmem %s5442_s29, 16  ;;  %s4999_s22 = scalar_lea.vmem %s5442_s29, 32 }
  0x50   : > { %p4993_p5 = scmp.ne.s32.totalorder %s5442_s29, %s4992_s26  ;;  %p5000_p4 = scmp.lt.s32.totalorder %s5442_s29, %s5442_s29 }
  0x51   : > { %p5001_p10 = scmp.lt.s32.totalorder %s4999_s22, %s4992_s26 }
  0x52   : > { %p4995_p7 = pnand %p4993_p5, %p5452_p8 }
  0x53   : > { %p5002_p11 = por %p5001_p10, %p5000_p4 }
  0x54   : > { %p4996_p9 = pneg %p4995_p7 }
  0x56   : > { %p5003_p12 = pnand %p5002_p11, %p4996_p9 }
  0x58   : > { %5006 = shalt.err (!%p5003_p12)
}
  0x59   : > { %4797 = dma.hbm_to_vmem [thread:$0]  (!%p5436_p6), %s7650_s5, 16, %s5442_s29, [#allocation12]  }
  0x5a   : > { %s5326_s24 = smov [#allocation14]   ;;  %s5327_s14 = smov [#allocation17]  }
  0x5b   : > { %s384_s13 = sshll.u32 %s5326_s24, 4  ;;  %s408_s15 = sshll.u32 %s5327_s14, 4  ;;  %s385_s13 = int_to_ptr.vmem [resolvable:$true] %s384_s13  ;;  %s409_s15 = int_to_ptr.vmem [resolvable:$true] %s408_s15 }
  0x5c   : > { %s5007_s28 = scalar_lea.hbm %s7652_s7, 16 }
  0x5d   : > { %p5008_p13 = scmp.ne.s32.totalorder %s7652_s7, %s5007_s28  ;;  %p5014_p5 = scmp.lt.u32.totalorder %s5007_s28, %s7652_s7 }
  0x5f   : > { %p5010_p0 = pnand %p5008_p13, %p5452_p8 }
  0x61   : > { %p5011_p2 = pneg %p5010_p0 }
  0x63   : > { %p5016_p7 = pnand %p5014_p5, %p5011_p2 }
  0x65   : > { %5019 = shalt.err (!%p5016_p7)
}
  0x66   : > { %s5020_s29 = scalar_lea.vmem %s385_s13, 16  ;;  %s5027_s11 = scalar_lea.vmem %s385_s13, 32 }
  0x67   : > { %p5021_p9 = scmp.ne.s32.totalorder %s385_s13, %s5020_s29  ;;  %p5028_p11 = scmp.lt.s32.totalorder %s385_s13, %s385_s13 }
  0x68   : > { %p5029_p12 = scmp.lt.s32.totalorder %s5027_s11, %s5020_s29 }
  0x69   : > { %p5023_p4 = pnand %p5021_p9, %p5452_p8 }
  0x6a   : > { %p5030_p1 = por %p5029_p12, %p5028_p11 }
  0x6b   : > { %p5024_p10 = pneg %p5023_p4 }
  0x6d   : > { %p5031_p3 = pnand %p5030_p1, %p5024_p10 }
  0x6f   : > { %5034 = shalt.err (!%p5031_p3)
}
  0x70   : > { %4803 = dma.hbm_to_vmem [thread:$0]  (!%p5436_p6), %s7652_s7, 16, %s385_s13, [#allocation15]  }
  0x71   : > { %s5035_s25 = scalar_lea.hbm %s7654_s9, 16 }
  0x72   : > { %p5036_p13 = scmp.ne.s32.totalorder %s7654_s9, %s5035_s25  ;;  %p5042_p3 = scmp.lt.u32.totalorder %s5035_s25, %s7654_s9 }
  0x74   : > { %p5038_p0 = pnand %p5036_p13, %p5452_p8 }
  0x76   : > { %p5039_p1 = pneg %p5038_p0 }
  0x78   : > { %p5044_p2 = pnand %p5042_p3, %p5039_p1 }
  0x7a   : > { %5047 = shalt.err (!%p5044_p2)
}
  0x7b   : > { %s5048_s29 = scalar_lea.vmem %s409_s15, 16  ;;  %s5055_s13 = scalar_lea.vmem %s409_s15, 32 }
  0x7c   : > { %p5049_p5 = scmp.ne.s32.totalorder %s409_s15, %s5048_s29  ;;  %p5056_p4 = scmp.lt.s32.totalorder %s409_s15, %s409_s15 }
  0x7d   : > { %p5057_p10 = scmp.lt.s32.totalorder %s5055_s13, %s5048_s29 }
  0x7e   : > { %p5051_p7 = pnand %p5049_p5, %p5452_p8 }
  0x7f   : > { %p5058_p11 = por %p5057_p10, %p5056_p4 }
  0x80   : > { %p5052_p9 = pneg %p5051_p7 }
  0x82   : > { %p5059_p12 = pnand %p5058_p11, %p5052_p9 }
  0x84   : > { %5062 = shalt.err (!%p5059_p12)
}
  0x85   : > { %4809 = dma.hbm_to_vmem [thread:$0]  (!%p5436_p6), %s7654_s9, 16, %s409_s15, [#allocation18]  }
  0x86   : > { %s5328_s14 = smov [#allocation7]   ;;  %s5329_s21 = smov [#allocation10]  }
  0x87   : > { %s325_s30 = sshll.u32 %s5328_s14, 4  ;;  %s349_s25 = sshll.u32 %s5329_s21, 4  ;;  %s326_s30 = int_to_ptr.vmem [resolvable:$true] %s325_s30  ;;  %s350_s25 = int_to_ptr.vmem [resolvable:$true] %s349_s25 }
  0x88   : > { %s7675_s2 = sld [smem:[#allocation31_spill]] }
  0x8e   : > { %s5063_s22 = scalar_lea.hbm %s7675_s2, 16 }
  0x8f   : > { %p5064_p13 = scmp.ne.s32.totalorder %s7675_s2, %s5063_s22  ;;  %p5070_p3 = scmp.lt.u32.totalorder %s5063_s22, %s7675_s2 }
  0x91   : > { %p5066_p0 = pnand %p5064_p13, %p5452_p8 }
  0x93   : > { %p5067_p1 = pneg %p5066_p0 }
  0x95   : > { %p5072_p2 = pnand %p5070_p3, %p5067_p1 }
  0x97   : > { %5075 = shalt.err (!%p5072_p2)
}
  0x98   : > { %s5076_s15 = scalar_lea.vmem %s326_s30, 16  ;;  %s5083_s24 = scalar_lea.vmem %s326_s30, 32 }
  0x99   : > { %p5077_p5 = scmp.ne.s32.totalorder %s326_s30, %s5076_s15  ;;  %p5084_p4 = scmp.lt.s32.totalorder %s326_s30, %s326_s30 }
  0x9a   : > { %p5085_p10 = scmp.lt.s32.totalorder %s5083_s24, %s5076_s15 }
  0x9b   : > { %p5079_p7 = pnand %p5077_p5, %p5452_p8 }
  0x9c   : > { %p5086_p11 = por %p5085_p10, %p5084_p4 }
  0x9d   : > { %p5080_p9 = pneg %p5079_p7 }
  0x9f   : > { %p5087_p12 = pnand %p5086_p11, %p5080_p9 }
  0xa1   : > { %5090 = shalt.err (!%p5087_p12)
}
  0xa2   : > { %4788 = dma.hbm_to_vmem [thread:$0]  (!%p5436_p6), %s7675_s2, 16, %s326_s30, [#allocation6]  }
  0xa3   : > { %s5091_s22 = scalar_lea.hbm %s7649_s4, 16 }
  0xa4   : > { %p5092_p13 = scmp.ne.s32.totalorder %s7649_s4, %s5091_s22  ;;  %p5098_p3 = scmp.lt.u32.totalorder %s5091_s22, %s7649_s4 }
  0xa6   : > { %p5094_p0 = pnand %p5092_p13, %p5452_p8 }
  0xa8   : > { %p5095_p1 = pneg %p5094_p0 }
  0xaa   : > { %p5100_p2 = pnand %p5098_p3, %p5095_p1 }
  0xac   : > { %5103 = shalt.err (!%p5100_p2)
}
  0xad   : > { %s5104_s15 = scalar_lea.vmem %s350_s25, 16  ;;  %s5111_s30 = scalar_lea.vmem %s350_s25, 32 }
  0xae   : > { %p5105_p5 = scmp.ne.s32.totalorder %s350_s25, %s5104_s15  ;;  %p5112_p4 = scmp.lt.s32.totalorder %s350_s25, %s350_s25 }
  0xaf   : > { %p5113_p10 = scmp.lt.s32.totalorder %s5111_s30, %s5104_s15 }
  0xb0   : > { %p5107_p7 = pnand %p5105_p5, %p5452_p8 }
  0xb1   : > { %p5114_p11 = por %p5113_p10, %p5112_p4 }
  0xb2   : > { %p5108_p9 = pneg %p5107_p7 }
  0xb4   : > { %p5115_p12 = pnand %p5114_p11, %p5108_p9 }
  0xb6   : > { %5118 = shalt.err (!%p5115_p12)
}
  0xb7   : > { %4794 = dma.hbm_to_vmem [thread:$0]  (!%p5436_p6), %s7649_s4, 16, %s350_s25, [#allocation9]  }
  0xb8   : > { %s5330_s21 = smov [#allocation13]   ;;  %s5331_s26 = smov [#allocation16]  }
  0xb9   : > { %s370_s28 = sshll.u32 %s5330_s21, 4  ;;  %s394_s22 = sshll.u32 %s5331_s26, 4  ;;  %s371_s28 = int_to_ptr.vmem [resolvable:$true] %s370_s28  ;;  %s395_s22 = int_to_ptr.vmem [resolvable:$true] %s394_s22 }
  0xba   : > { %s5119_s13 = scalar_lea.hbm %s7651_s6, 384 }
  0xbb   : > { %p5120_p13 = scmp.ne.s32.totalorder %s7651_s6, %s5119_s13  ;;  %p5126_p3 = scmp.lt.u32.totalorder %s5119_s13, %s7651_s6 }
  0xbd   : > { %p5122_p0 = pnand %p5120_p13, %p5452_p8 }
  0xbf   : > { %p5123_p1 = pneg %p5122_p0 }
  0xc1   : > { %p5128_p2 = pnand %p5126_p3, %p5123_p1 }
  0xc3   : > { %5131 = shalt.err (!%p5128_p2)
}
  0xc4   : > { %s5132_s25 = scalar_lea.vmem %s371_s28, 384  ;;  %p5140_p4 = scmp.lt.s32.totalorder %s371_s28, %s371_s28 }
  0xc5   : > { %p5133_p5 = scmp.ne.s32.totalorder %s371_s28, %s5132_s25  ;;  %p5141_p10 = scmp.lt.s32.totalorder %s5132_s25, %s5132_s25 }
  0xc7   : > { %p5135_p7 = pnand %p5133_p5, %p5452_p8  ;;  %p5142_p11 = por %p5141_p10, %p5140_p4 }
  0xc9   : > { %p5136_p9 = pneg %p5135_p7 }
  0xcb   : > { %p5143_p12 = pnand %p5142_p11, %p5136_p9 }
  0xcd   : > { %5146 = shalt.err (!%p5143_p12)
}
  0xce   : > { %s7676_s14 = smov 128   ;;  %s5147_s13 = scalar_lea.hbm %s7653_s8, 384 }
  0xcf   : > { %4800 = dma.hbm_to_vmem [thread:$0]  (!%p5436_p6), %s7651_s6, 384, %s371_s28, [#allocation12], %s7676_s14, %s7676_s14, %s7664_s12  }
  0xd0   : > { %p5148_p13 = scmp.ne.s32.totalorder %s7653_s8, %s5147_s13  ;;  %p5154_p3 = scmp.lt.u32.totalorder %s5147_s13, %s7653_s8 }
  0xd2   : > { %p5150_p0 = pnand %p5148_p13, %p5452_p8 }
  0xd4   : > { %p5151_p1 = pneg %p5150_p0 }
  0xd6   : > { %p5156_p2 = pnand %p5154_p3, %p5151_p1 }
  0xd8   : > { %5159 = shalt.err (!%p5156_p2)
}
  0xd9   : > { %s5160_s25 = scalar_lea.vmem %s395_s22, 384  ;;  %p5168_p4 = scmp.lt.s32.totalorder %s395_s22, %s395_s22 }
  0xda   : > { %p5161_p5 = scmp.ne.s32.totalorder %s395_s22, %s5160_s25  ;;  %p5169_p10 = scmp.lt.s32.totalorder %s5160_s25, %s5160_s25 }
  0xdc   : > { %p5163_p7 = pnand %p5161_p5, %p5452_p8  ;;  %p5170_p11 = por %p5169_p10, %p5168_p4 }
  0xde   : > { %p5164_p9 = pneg %p5163_p7 }
  0xe0   : > { %p5171_p12 = pnand %p5170_p11, %p5164_p9 }
  0xe2   : > { %5174 = shalt.err (!%p5171_p12)
}
  0xe3   : > { %4806 = dma.hbm_to_vmem [thread:$0]  (!%p5436_p6), %s7653_s8, 384, %s395_s22, [#allocation15], %s7676_s14, %s7676_s14, %s7664_s12  }
  0xe4   : > { %s5332_s26 = smov [#allocation19]   ;;  %s5175_s11 = scalar_lea.hbm %s7655_s10, 16 }
  0xe5   : > { %s419_s0 = sshll.u32 %s5332_s26, 4  ;;  %p5176_p13 = scmp.ne.s32.totalorder %s7655_s10, %s5175_s11  ;;  %s420_s0 = int_to_ptr.vmem [resolvable:$true] %s419_s0 }
  0xe6   : > { %p5182_p3 = scmp.lt.u32.totalorder %s5175_s11, %s7655_s10 }
  0xe7   : > { %p5178_p0 = pnand %p5176_p13, %p5452_p8 }
  0xe9   : > { %p5179_p1 = pneg %p5178_p0 }
  0xeb   : > { %p5184_p2 = pnand %p5182_p3, %p5179_p1 }
  0xed   : > { %5187 = shalt.err (!%p5184_p2)
}
  0xee   : > { %s5188_s22 = scalar_lea.vmem %s420_s0, 16  ;;  %s5195_s28 = scalar_lea.vmem %s420_s0, 32 }
  0xef   : > { %p5189_p5 = scmp.ne.s32.totalorder %s420_s0, %s5188_s22  ;;  %p5196_p4 = scmp.lt.s32.totalorder %s420_s0, %s420_s0 }
  0xf0   : > { %p5197_p10 = scmp.lt.s32.totalorder %s5195_s28, %s5188_s22 }
  0xf1   : > { %p5191_p7 = pnand %p5189_p5, %p5452_p8 }
  0xf2   : > { %p5198_p11 = por %p5197_p10, %p5196_p4 }
  0xf3   : > { %p5192_p9 = pneg %p5191_p7 }
  0xf5   : > { %p5199_p12 = pnand %p5198_p11, %p5192_p9 }
  0xf7   : > { %5202 = shalt.err (!%p5199_p12)
}
  0xf8   : > { %4812 = dma.hbm_to_vmem [thread:$0]  (!%p5436_p6), %s7655_s10, 16, %s420_s0, [#allocation18]  }
  0xf9   : > { %s4196_s16 = sadd.s32 4294967294, %s5319_s20   ;;  %s5660_s27 = sadd.s32 1, %s5319_s20  }
  0xfa   : > { %s36_s29 = ssub.s32 %s5319_s20, %s5660_s27  ;;  %s39_s13 = sadd.s32 1, %s5315_s19 }
  0xfb   : > { %p37_p8 = scmp.eq.s32.totalorder %s36_s29, 0  ;;  %p46_p13 = scmp.ne.s32.totalorder %s5315_s19, %s5311_s18 }
  0xfc   : > { %p47_p0 = scmp.eq.s32.totalorder %s5319_s20, 0  ;;  %p52_p1 = scmp.ne.s32.totalorder %s5311_s18, %s5307_s17 }
  0xfd   : > { %s5671_s11 = scalar_select %p37_p8, %s5315_s19, %s39_s13  }
  0xfe   : > { %p5673_p3 = por %p47_p0, %p46_p13  ;;  %p7678_p2 = scmp.eq.s32.totalorder %s5420_s23, 0 }
  0xff   : > { %p286_p5 = scmp.eq.s32.totalorder %s5420_s23, 1  ;;  %p292_p7 = scmp.eq.s32.totalorder %s4196_s16, 1 }
 0x100   : > { %p5679_p6 = por %p7678_p2, %p52_p1  ;;  %p4831_p9 = scmp.lt.s32.totalorder %s5319_s20, 2 }
 0x101   : > { %s430_s30 = sand.u32 1, %s5315_s19   ;;  %p5686_p4 = por %p286_p5, %p46_p13 }
 0x102   : > { %p5690_p10 = por %p292_p7, %p52_p1  ;;  %s4209_s22 = sshll.u32 %s430_s30, 8 }
 0x103   : > { %s7680_s24 = scalar_select %p5686_p4, 1, 0 }
 0x104   : > { %s7681_s25 = scalar_select %p5690_p10, 1, 0 }
 0x105   : > { %s4364_s28 = sshll.u32 %s5319_s20, 12  ;;  %s7682_s29 = sld [smem:[#allocation29_spill]] }
 0x106   : > { %s434_s16 = scalar_lea.vmem [#allocation2], %s4209_s22  ;;  %p5704_p11 = pnand %p4831_p9, %p5673_p3 }
 0x107   : > { %s441_s12 = sshll.u32 %s434_s16, 4  ;;  %s5708_s2 = scalar_lea.sflag [#allocation3], %s430_s30  ;;  %s5700_s12 = int_to_ptr.vmem [resolvable:$true] %s441_s12 }
 0x108   : > { %p5205_p8 = pneg %p5704_p11 }
 0x10b   : > { %s5698_s13 = scalar_lea.hbm %s7682_s29, %s4364_s28  ;;  %s5208_s15 = scalar_lea.hbm %s7682_s29, 8192 }
 0x10c   : > { %s5203_s21 = scalar_lea.hbm %s5698_s13, 4096  ;;  %p5209_p1 = scmp.lt.u32.totalorder %s5698_s13, %s7682_s29 }
 0x10d   : > { %p5204_p12 = scmp.ne.s32.totalorder %s5698_s13, %s5203_s21  ;;  %p5210_p3 = scmp.lt.u32.totalorder %s5208_s15, %s5203_s21 }
 0x10e   : > { %p5212_p5 = scmp.lt.u32.totalorder %s5203_s21, %s5698_s13 }
 0x10f   : > { %p5206_p13 = pnand %p5205_p8, %p5204_p12  ;;  %p5211_p2 = por %p5210_p3, %p5209_p1 }
 0x111   : > { %p5207_p0 = pneg %p5206_p13  ;;  %p5213_p7 = por %p5212_p5, %p5211_p2 }
 0x113   : > { %p5214_p9 = pnand %p5213_p7, %p5207_p0 }
 0x115   : > { %5217 = shalt.err (!%p5214_p9)
}
 0x116   : > { %s5218_s30 = scalar_lea.vmem %s5700_s12, 4096  ;;  %s5333_s22 = smov [#allocation2]  }
 0x117   : > { %p5219_p12 = scmp.ne.s32.totalorder %s5700_s12, %s5218_s30  ;;  %s5223_s28 = sshll.u32 %s5333_s22, 4  ;;  %s5224_s28 = int_to_ptr.vmem [resolvable:$false] %s5223_s28 }
 0x118   : > { %s5225_s26 = scalar_lea.vmem %s5224_s28, 8192  ;;  %p5226_p4 = scmp.lt.s32.totalorder %s5700_s12, %s5224_s28 }
 0x119   : > { %p5221_p13 = pnand %p5219_p12, %p5205_p8  ;;  %p5227_p1 = scmp.lt.s32.totalorder %s5225_s26, %s5218_s30 }
 0x11b   : > { %p5222_p10 = pneg %p5221_p13  ;;  %p5228_p3 = por %p5227_p1, %p5226_p4 }
 0x11d   : > { %p5229_p2 = pnand %p5228_p3, %p5222_p10 }
 0x11f   : > { %5232 = shalt.err (!%p5229_p2)
}
 0x120   : > { %s7684_s21 = smov 8   ;;  %s7685_s15 = sld [smem:[#allocation28_spill]] }
 0x121   : > { %4816 = dma.hbm_to_vmem [thread:$0]  (!%p5704_p11), %s5698_s13, 4096, %s5700_s12, %s5708_s2, %s7676_s14, %s7676_s14, %s7684_s21  }
 0x126   : > { %p7686_p8 = scmp.ne.s32.totalorder %s7685_s15, 0 }
 0x127   : > { %s5742_s16 = sand.u32 (!%p7686_p8), 1, %s5311_s18  }
 0x128   : > { %453 = sbr.rel (%p7686_p8) target bundleno = 1840 (0x730), region = 64  ;;  %s4213_s30 = sshll.u32 (!%p7686_p8), %s5742_s16, 8 }
 0x129   : > { %s456_s22 = scalar_lea.sflag (!%p7686_p8), [#allocation3], %s5742_s16  ;;  %s5748_s1 = scalar_lea.vmem (!%p7686_p8), [#allocation2], %s4213_s30 }
 0x12f   : > { %5278 = dma.done.wait (%p5679_p6), %s456_s22, 4096  }
 0x130   : > { %5280 = vsyncadd (%p5679_p6), %s456_s22, 4294963200  ;;  %p7687_p4 = scmp.eq.s32.totalorder %s5420_s23, 0 }
 0x132   : > { %5282 = dma.done.wait (%p7687_p4), [#allocation6], 400   ;;  %p7688_p10 = pmov %p7687_p4 }
 0x133   : > { %p7689_p11 = pmov %p7687_p4 }
 0x134   : > { %5284 = vsyncadd (%p7688_p10), [#allocation6], 4294966896 }
 0x135   : > { %5286 = dma.done.wait (%p7689_p11), [#allocation9], 400   ;;  %p7690_p0 = pmov %p7687_p4 }
 0x137   : > { %5288 = vsyncadd (%p7690_p0), [#allocation9], 4294966896  ;;  %p7691_p5 = pmov %p7690_p0 }
 0x138   : > { %p7692_p7 = pmov %p7690_p0 }
 0x139   : > { %5290 = dma.done.wait (%p7691_p5), [#allocation12], 400  }
 0x13a   : > { %5292 = vsyncadd (%p7692_p7), [#allocation12], 4294966896  ;;  %p7693_p6 = pmov %p7690_p0 }
 0x13b   : > { %p7694_p9 = pmov %p7690_p0 }
 0x13c   : > { %5294 = dma.done.wait (%p7693_p6), [#allocation15], 400  }
 0x13d   : > { %5296 = vsyncadd (%p7694_p9), [#allocation15], 4294966896  ;;  %p7695_p12 = pmov %p7690_p0 }
 0x13e   : > { %p7696_p13 = pmov %p7690_p0 }
 0x13f   : > { %5298 = dma.done.wait (%p7695_p12), [#allocation18], 32  }
 0x140   : > { %5300 = vsyncadd (%p7696_p13), [#allocation18], 4294967264  ;;  %v5775_v0 = vld [vmem:[%s5748_s1 + $0x10] sm:$0xff]  ;;  %v5778_v1 = vld [vmem:[%s5748_s1] sm:$0xff]  ;;  %s5334_s2 = smov 16   ;;  %s5335_s12 = smov 8  }
 0x141   : > { %702 = vrot.lane.b32.xlu1 %v5775_v0, %s5334_s2  ;;  %605 = vrot.lane.b32.xlu0 %v5778_v1, %s5335_s12  ;;  %v5785_v2 = vld [vmem:[%s5748_s1 + $0x18] sm:$0xff]  ;;  %v5788_v3 = vld [vmem:[%s5748_s1 + $0x8] sm:$0xff]  ;;  %v570_v4 = vld [vmem:[#allocation5] sm:$0xff]  ;;  %vm795_vm0 = vcmask 64512   ;;  %vm828_vm1 = vcmask 130048   ;;  %vm868_vm2 = vcmask 195584  }
 0x142   : > { %v571_v5 = vld [vmem:[#allocation5 + $0x8] sm:$0xff]  ;;  %v572_v7 = vld [vmem:[#allocation5 + $0x10] sm:$0xff]  ;;  %v5802_v9 = vld [vmem:[%s5748_s1 + $0x20] sm:$0xff]  ;;  %v5336_v46 = vmov 0.0   ;;  %vm1257_vm3 = vcmask 1040384   ;;  %vm1418_vm4 = vcmask 1046528  }
 0x143   : > { %v4722_v6 = vpack.c.bf16 %v571_v5, %v570_v4  ;;  %v5799_v8 = vld [vmem:[%s5748_s1 + $0x28] sm:$0xff]  ;;  %v5813_v10 = vld [vmem:[%s5748_s1 + $0x38] sm:$0xff]  ;;  %v5816_v11 = vld [vmem:[%s5748_s1 + $0x30] sm:$0xff]  ;;  %vm1595_vm5 = vcmask 1045504   ;;  %vm2941_vm6 = vcmask 1041408   ;;  %vm3278_vm7 = vcmask 1043456  }
 0x144   : > { %v5827_v12 = vld [vmem:[%s5748_s1 + $0x48] sm:$0xff]  ;;  %v5830_v13 = vld [vmem:[%s5748_s1 + $0x40] sm:$0xff]  ;;  %v5841_v14 = vld [vmem:[%s5748_s1 + $0x58] sm:$0xff]  ;;  %s7437_s14 = scalar_lea.vmem [#allocation20], %s4213_s30  ;;  %s4365_s0 = sshll.u32 %s5420_s23, 12 }
 0x145   : > { %704 = vrot.lane.b32.xlu1 %v5785_v2, %s5334_s2  ;;  %607 = vrot.lane.b32.xlu0 %v5788_v3, %s5335_s12  ;;  %v5844_v15 = vld [vmem:[%s5748_s1 + $0x50] sm:$0xff]  ;;  %v5855_v16 = vld [vmem:[%s5748_s1 + $0x68] sm:$0xff]  ;;  %s4028_s13 = sshll.u32 %s7437_s14, 4  ;;  %s7697_s21 = sld [smem:[#allocation32_spill]]  ;;  %s7596_s13 = int_to_ptr.vmem [resolvable:$true] %s4028_s13 }
 0x146   : > { %4723 = vmatprep.subr.bf16.mxu0 %v4722_v6  ;;  %v5858_v17 = vld [vmem:[%s5748_s1 + $0x60] sm:$0xff]  ;;  %v5869_v18 = vld [vmem:[%s5748_s1 + $0x78] sm:$0xff]  ;;  %v5872_v19 = vld [vmem:[%s5748_s1 + $0x70] sm:$0xff]  ;;  %s4015_s23 = scalar_lea.sflag [#allocation4], %s5742_s16  ;;  %s5233_s30 = scalar_lea.vmem %s7596_s13, 4096 }
 0x147   : > { %4725 = vmatpush3.bf16.msra.mxu0 %v4722_v6  ;;  %v5883_v20 = vld [vmem:[%s5748_s1 + $0x88] sm:$0xff]  ;;  %v5886_v21 = vld [vmem:[%s5748_s1 + $0x80] sm:$0xff]  ;;  %v5897_v22 = vld [vmem:[%s5748_s1 + $0x98] sm:$0xff]  ;;  %p5234_p1 = scmp.ne.s32.totalorder %s7596_s13, %s5233_s30  ;;  %p7698_p3 = scmp.ne.s32.totalorder %s7680_s24, 0 }
 0x148   : > { %4510 = vmatprep.subr.mxu0 %v572_v7  ;;  %v5900_v23 = vld [vmem:[%s5748_s1 + $0x90] sm:$0xff]  ;;  %v5911_v24 = vld [vmem:[%s5748_s1 + $0xa8] sm:$0xff]  ;;  %v5914_v25 = vld [vmem:[%s5748_s1 + $0xa0] sm:$0xff]  ;;  %s5337_s22 = smov [#allocation20]  }
 0x149   : > { %611 = vrot.lane.b32.xlu1 %v5785_v2, %s5335_s12  ;;  %609 = vrot.lane.b32.xlu0 %v5775_v0, %s5335_s12  ;;  %v5925_v26 = vld [vmem:[%s5748_s1 + $0xb8] sm:$0xff]  ;;  %v5928_v27 = vld [vmem:[%s5748_s1 + $0xb0] sm:$0xff]  ;;  %p5235_p2 = pnand %p5234_p1, %p7698_p3 }
 0x14a   : > { %v5939_v28 = vld [vmem:[%s5748_s1 + $0xc8] sm:$0xff]  ;;  %v5942_v29 = vld [vmem:[%s5748_s1 + $0xc0] sm:$0xff]  ;;  %v5953_v30 = vld [vmem:[%s5748_s1 + $0xd8] sm:$0xff] }
 0x14b   : > { %4511 = vmatpush3.msra.mxu0 %v572_v7  ;;  %v5956_v31 = vld [vmem:[%s5748_s1 + $0xd0] sm:$0xff]  ;;  %v5967_v32 = vld [vmem:[%s5748_s1 + $0xe8] sm:$0xff]  ;;  %v5970_v33 = vld [vmem:[%s5748_s1 + $0xe0] sm:$0xff]  ;;  %s7594_s15 = scalar_lea.hbm %s7697_s21, %s4365_s0  ;;  %p5236_p8 = pneg %p5235_p2 }
 0x14c   : > { %v569_v34 = vld [vmem:[%s5748_s1 + $0xf8] sm:$0xff]  ;;  %v568_v35 = vld [vmem:[%s5748_s1 + $0xf0] sm:$0xff] }
 0x14d   : > { %708 = vrot.lane.b32.xlu1 %v5799_v8, %s5334_s2  ;;  %706 = vrot.lane.b32.xlu0 %v5802_v9, %s5334_s2 }
 0x151   : > { %615 = vrot.lane.b32.xlu1 %v5799_v8, %s5335_s12  ;;  %613 = vrot.lane.b32.xlu0 %v5802_v9, %s5335_s12 }
 0x155   : > { %712 = vrot.lane.b32.xlu1 %v5813_v10, %s5334_s2  ;;  %710 = vrot.lane.b32.xlu0 %v5816_v11, %s5334_s2 }
 0x159   : > { %619 = vrot.lane.b32.xlu1 %v5813_v10, %s5335_s12  ;;  %617 = vrot.lane.b32.xlu0 %v5816_v11, %s5335_s12 }
 0x15d   : > { %716 = vrot.lane.b32.xlu1 %v5827_v12, %s5334_s2  ;;  %714 = vrot.lane.b32.xlu0 %v5830_v13, %s5334_s2 }
 0x161   : > { %623 = vrot.lane.b32.xlu1 %v5827_v12, %s5335_s12  ;;  %621 = vrot.lane.b32.xlu0 %v5830_v13, %s5335_s12 }
 0x165   : > { %720 = vrot.lane.b32.xlu1 %v5841_v14, %s5334_s2  ;;  %718 = vrot.lane.b32.xlu0 %v5844_v15, %s5334_s2 }
 0x169   : > { %627 = vrot.lane.b32.xlu1 %v5841_v14, %s5335_s12  ;;  %625 = vrot.lane.b32.xlu0 %v5844_v15, %s5335_s12 }
 0x16d   : > { %724 = vrot.lane.b32.xlu1 %v5855_v16, %s5334_s2  ;;  %722 = vrot.lane.b32.xlu0 %v5858_v17, %s5334_s2 }
 0x171   : > { %631 = vrot.lane.b32.xlu1 %v5855_v16, %s5335_s12  ;;  %629 = vrot.lane.b32.xlu0 %v5858_v17, %s5335_s12 }
 0x175   : > { %728 = vrot.lane.b32.xlu1 %v5869_v18, %s5334_s2  ;;  %726 = vrot.lane.b32.xlu0 %v5872_v19, %s5334_s2 }
 0x179   : > { %635 = vrot.lane.b32.xlu1 %v5869_v18, %s5335_s12  ;;  %633 = vrot.lane.b32.xlu0 %v5872_v19, %s5335_s12 }
 0x17d   : > { %732 = vrot.lane.b32.xlu1 %v5883_v20, %s5334_s2  ;;  %730 = vrot.lane.b32.xlu0 %v5886_v21, %s5334_s2 }
 0x181   : > { %639 = vrot.lane.b32.xlu1 %v5883_v20, %s5335_s12  ;;  %637 = vrot.lane.b32.xlu0 %v5886_v21, %s5335_s12 }
 0x185   : > { %736 = vrot.lane.b32.xlu1 %v5897_v22, %s5334_s2  ;;  %734 = vrot.lane.b32.xlu0 %v5900_v23, %s5334_s2 }
 0x189   : > { %643 = vrot.lane.b32.xlu1 %v5897_v22, %s5335_s12  ;;  %641 = vrot.lane.b32.xlu0 %v5900_v23, %s5335_s12 }
 0x18d   : > { %740 = vrot.lane.b32.xlu1 %v5911_v24, %s5334_s2  ;;  %738 = vrot.lane.b32.xlu0 %v5914_v25, %s5334_s2 }
 0x191   : > { %647 = vrot.lane.b32.xlu1 %v5911_v24, %s5335_s12  ;;  %645 = vrot.lane.b32.xlu0 %v5914_v25, %s5335_s12 }
 0x195   : > { %744 = vrot.lane.b32.xlu1 %v5925_v26, %s5334_s2  ;;  %742 = vrot.lane.b32.xlu0 %v5928_v27, %s5334_s2 }
 0x199   : > { %651 = vrot.lane.b32.xlu1 %v5925_v26, %s5335_s12  ;;  %649 = vrot.lane.b32.xlu0 %v5928_v27, %s5335_s12 }
 0x19d   : > { %748 = vrot.lane.b32.xlu1 %v5939_v28, %s5334_s2  ;;  %746 = vrot.lane.b32.xlu0 %v5942_v29, %s5334_s2 }
 0x1a1   : > { %655 = vrot.lane.b32.xlu1 %v5939_v28, %s5335_s12  ;;  %653 = vrot.lane.b32.xlu0 %v5942_v29, %s5335_s12 }
 0x1a5   : > { %752 = vrot.lane.b32.xlu1 %v5953_v30, %s5334_s2  ;;  %750 = vrot.lane.b32.xlu0 %v5956_v31, %s5334_s2 }
 0x1a9   : > { %659 = vrot.lane.b32.xlu1 %v5953_v30, %s5335_s12  ;;  %657 = vrot.lane.b32.xlu0 %v5956_v31, %s5335_s12 }
 0x1ad   : > { %756 = vrot.lane.b32.xlu1 %v5967_v32, %s5334_s2  ;;  %754 = vrot.lane.b32.xlu0 %v5970_v33, %s5334_s2 }
 0x1b1   : > { %663 = vrot.lane.b32.xlu1 %v5967_v32, %s5335_s12  ;;  %661 = vrot.lane.b32.xlu0 %v5970_v33, %s5335_s12 }
 0x1b3   : > { %v703_v36 = vpop.permute.xlu1 %702  ;;  %v606_v37 = vpop.permute.xlu0 %605 }
 0x1b4   : > { %v796_v38 = vsel %vm795_vm0, 0.0, %v606_v37 }
 0x1b5   : > { %760 = vrot.lane.b32.xlu1 %v569_v34, %s5334_s2  ;;  %758 = vrot.lane.b32.xlu0 %v568_v35, %s5334_s2  ;;  %v829_v39 = vsel %vm828_vm1, %v796_v38, %v703_v36 }
 0x1b6   : > { %4512 = vmatprep.mubr.msk.f32.mxu0 %vm868_vm2, %v829_v39 }
 0x1b7   : > { %v705_v40 = vpop.permute.xlu1 %704  ;;  %v608_v41 = vpop.permute.xlu0 %607 }
 0x1b8   : > { %v797_v42 = vsel %vm795_vm0, 0.0, %v608_v41 }
 0x1b9   : > { %665 = vrot.lane.b32.xlu0 %v568_v35, %s5335_s12  ;;  %v830_v43 = vsel %vm828_vm1, %v797_v42, %v705_v40  ;;  %667 = vrot.lane.b32.xlu1 %v569_v34, %s5335_s12 }
 0x1ba   : > { %4513 = vmatmul.mubr.msk.f32.vlgmr.msra.gmra.mrb[0].mxu0 %vm868_vm2, %v830_v43 }
 0x1bb   : > { %v612_v44 = vpop.permute.xlu1 %611  ;;  %v610_v45 = vpop.permute.xlu0 %609 }
 0x1bc   : > { %v799_v47 = vsel %vm795_vm0, %v5788_v3, %v612_v44  ;;  %v798_v48 = vsel %vm795_vm0, %v5778_v1, %v610_v45 }
 0x1bd   : > { %762 = vrot.lane.b32.xlu0 %v5336_v46, %s5334_s2 }
 0x1bf   : > { %v709_v49 = vpop.permute.xlu1 %708  ;;  %v707_v50 = vpop.permute.xlu0 %706 }
 0x1c0   : > { %v832_v51 = vsel %vm828_vm1, %v799_v47, %v709_v49  ;;  %v831_v52 = vsel %vm828_vm1, %v798_v48, %v707_v50 }
 0x1c1   : > { %4515 = vmatprep.mubr.msk.f32.mxu0 %vm868_vm2, %v831_v52 }
 0x1c2   : > { %4516 = vmatmul.mubr.msk.f32.gmra.mrb[2].mxu0 %vm868_vm2, %v832_v51 }
 0x1c3   : > { %v616_v53 = vpop.permute.xlu1 %615  ;;  %v614_v54 = vpop.permute.xlu0 %613 }
 0x1c4   : > { %v801_v55 = vsel %vm795_vm0, %v5785_v2, %v616_v53  ;;  %v800_v56 = vsel %vm795_vm0, %v5775_v0, %v614_v54 }
 0x1c7   : > { %v713_v57 = vpop.permute.xlu1 %712  ;;  %v711_v58 = vpop.permute.xlu0 %710 }
 0x1c8   : > { %v834_v59 = vsel %vm828_vm1, %v801_v55, %v713_v57  ;;  %v833_v60 = vsel %vm828_vm1, %v800_v56, %v711_v58 }
 0x1c9   : > { %4518 = vmatprep.mubr.msk.f32.mxu0 %vm868_vm2, %v833_v60 }
 0x1ca   : > { %4519 = vmatmul.mubr.msk.f32.gmra.mrb[4].mxu0 %vm868_vm2, %v834_v59 }
 0x1cb   : > { %v620_v61 = vpop.permute.xlu1 %619  ;;  %v618_v62 = vpop.permute.xlu0 %617 }
 0x1cc   : > { %v803_v63 = vsel %vm795_vm0, %v5799_v8, %v620_v61  ;;  %v802_v1 = vsel %vm795_vm0, %v5802_v9, %v618_v62 }
 0x1cf   : > { %v717_v2 = vpop.permute.xlu1 %716  ;;  %v715_v0 = vpop.permute.xlu0 %714 }
 0x1d0   : > { %v836_v3 = vsel %vm828_vm1, %v803_v63, %v717_v2  ;;  %v835_v4 = vsel %vm828_vm1, %v802_v1, %v715_v0 }
 0x1d1   : > { %4521 = vmatprep.mubr.msk.f32.mxu0 %vm868_vm2, %v835_v4 }
 0x1d2   : > { %4522 = vmatmul.mubr.msk.f32.gmra.mrb[6].mxu0 %vm868_vm2, %v836_v3 }
 0x1d3   : > { %v624_v5 = vpop.permute.xlu1 %623  ;;  %v622_v6 = vpop.permute.xlu0 %621 }
 0x1d4   : > { %v805_v7 = vsel %vm795_vm0, %v5813_v10, %v624_v5  ;;  %v804_v8 = vsel %vm795_vm0, %v5816_v11, %v622_v6 }
 0x1d7   : > { %v721_v34 = vpop.permute.xlu1 %720  ;;  %v719_v9 = vpop.permute.xlu0 %718 }
 0x1d8   : > { %v838_v35 = vsel %vm828_vm1, %v805_v7, %v721_v34  ;;  %v837_v36 = vsel %vm828_vm1, %v804_v8, %v719_v9 }
 0x1d9   : > { %4524 = vmatprep.mubr.msk.f32.mxu0 %vm868_vm2, %v837_v36 }
 0x1da   : > { %4525 = vmatmul.mubr.msk.f32.gmra.mrb[8].mxu0 %vm868_vm2, %v838_v35 }
 0x1db   : > { %v628_v37 = vpop.permute.xlu1 %627  ;;  %v626_v38 = vpop.permute.xlu0 %625 }
 0x1dc   : > { %v807_v39 = vsel %vm795_vm0, %v5827_v12, %v628_v37  ;;  %v806_v10 = vsel %vm795_vm0, %v5830_v13, %v626_v38 }
 0x1df   : > { %v725_v40 = vpop.permute.xlu1 %724  ;;  %v723_v11 = vpop.permute.xlu0 %722 }
 0x1e0   : > { %v840_v41 = vsel %vm828_vm1, %v807_v39, %v725_v40  ;;  %v839_v42 = vsel %vm828_vm1, %v806_v10, %v723_v11 }
 0x1e1   : > { %4527 = vmatprep.mubr.msk.f32.mxu0 %vm868_vm2, %v839_v42 }
 0x1e2   : > { %4528 = vmatmul.mubr.msk.f32.gmra.mrb[10].mxu0 %vm868_vm2, %v840_v41 }
 0x1e3   : > { %v632_v43 = vpop.permute.xlu1 %631  ;;  %v630_v44 = vpop.permute.xlu0 %629 }
 0x1e4   : > { %v809_v45 = vsel %vm795_vm0, %v5841_v14, %v632_v43  ;;  %v808_v12 = vsel %vm795_vm0, %v5844_v15, %v630_v44 }
 0x1e7   : > { %v729_v46 = vpop.permute.xlu1 %728  ;;  %v727_v13 = vpop.permute.xlu0 %726 }
 0x1e8   : > { %v842_v47 = vsel %vm828_vm1, %v809_v45, %v729_v46  ;;  %v841_v48 = vsel %vm828_vm1, %v808_v12, %v727_v13 }
 0x1e9   : > { %4530 = vmatprep.mubr.msk.f32.mxu0 %vm868_vm2, %v841_v48 }
 0x1ea   : > { %4531 = vmatmul.mubr.msk.f32.gmra.mrb[12].mxu0 %vm868_vm2, %v842_v47 }
 0x1eb   : > { %v636_v49 = vpop.permute.xlu1 %635  ;;  %v634_v50 = vpop.permute.xlu0 %633 }
 0x1ec   : > { %v811_v51 = vsel %vm795_vm0, %v5855_v16, %v636_v49  ;;  %v810_v14 = vsel %vm795_vm0, %v5858_v17, %v634_v50 }
 0x1ef   : > { %v733_v52 = vpop.permute.xlu1 %732  ;;  %v731_v15 = vpop.permute.xlu0 %730 }
 0x1f0   : > { %v844_v53 = vsel %vm828_vm1, %v811_v51, %v733_v52  ;;  %v843_v54 = vsel %vm828_vm1, %v810_v14, %v731_v15 }
 0x1f1   : > { %4533 = vmatprep.mubr.msk.f32.mxu0 %vm868_vm2, %v843_v54 }
 0x1f2   : > { %4534 = vmatmul.mubr.msk.f32.gmra.mrb[14].mxu0 %vm868_vm2, %v844_v53 }
 0x1f3   : > { %v640_v55 = vpop.permute.xlu1 %639  ;;  %v638_v56 = vpop.permute.xlu0 %637 }
 0x1f4   : > { %v813_v57 = vsel %vm795_vm0, %v5869_v18, %v640_v55  ;;  %v812_v16 = vsel %vm795_vm0, %v5872_v19, %v638_v56  ;;  %v1222_v56 = vld [vmem:[#allocation8] sm:$0xff] }
 0x1f7   : > { %v737_v58 = vpop.permute.xlu1 %736  ;;  %v735_v17 = vpop.permute.xlu0 %734 }
 0x1f8   : > { %v846_v59 = vsel %vm828_vm1, %v813_v57, %v737_v58  ;;  %v845_v60 = vsel %vm828_vm1, %v812_v16, %v735_v17  ;;  %v1223_v57 = vld [vmem:[#allocation8 + $0x8] sm:$0xff]  ;;  %v6117_v16 = vld [vmem:[#allocation7] ss:$0 sm:$0xff] }
 0x1f9   : > { %4536 = vmatprep.mubr.msk.f32.mxu0 %vm868_vm2, %v845_v60 }
 0x1fa   : > { %4537 = vmatmul.mubr.msk.f32.gmra.mrb[16].mxu0 %vm868_vm2, %v846_v59 }
 0x1fb   : > { %v644_v61 = vpop.permute.xlu1 %643  ;;  %v642_v62 = vpop.permute.xlu0 %641 }
 0x1fc   : > { %v815_v63 = vsel %vm795_vm0, %v5883_v20, %v644_v61  ;;  %v814_v18 = vsel %vm795_vm0, %v5886_v21, %v642_v62  ;;  %v1224_v61 = vld [vmem:[#allocation8 + $0x10] sm:$0xff] }
 0x1ff   : > { %v741_v1 = vpop.permute.xlu1 %740  ;;  %v739_v19 = vpop.permute.xlu0 %738 }
 0x200   : > { %v848_v2 = vsel %vm828_vm1, %v815_v63, %v741_v1  ;;  %v847_v0 = vsel %vm828_vm1, %v814_v18, %v739_v19 }
 0x201   : > { %4539 = vmatprep.mubr.msk.f32.mxu0 %vm868_vm2, %v847_v0 }
 0x202   : > { %4540 = vmatmul.mubr.msk.f32.gmra.mrb[18].mxu0 %vm868_vm2, %v848_v2 }
 0x203   : > { %v648_v3 = vpop.permute.xlu1 %647  ;;  %v646_v4 = vpop.permute.xlu0 %645 }
 0x204   : > { %v817_v5 = vsel %vm795_vm0, %v5897_v22, %v648_v3  ;;  %v816_v20 = vsel %vm795_vm0, %v5900_v23, %v646_v4 }
 0x207   : > { %v745_v6 = vpop.permute.xlu1 %744  ;;  %v743_v21 = vpop.permute.xlu0 %742 }
 0x208   : > { %v850_v7 = vsel %vm828_vm1, %v817_v5, %v745_v6  ;;  %v849_v8 = vsel %vm828_vm1, %v816_v20, %v743_v21 }
 0x209   : > { %4542 = vmatprep.mubr.msk.f32.mxu0 %vm868_vm2, %v849_v8 }
 0x20a   : > { %4543 = vmatmul.mubr.msk.f32.gmra.mrb[20].mxu0 %vm868_vm2, %v850_v7 }
 0x20b   : > { %v652_v34 = vpop.permute.xlu1 %651  ;;  %v650_v9 = vpop.permute.xlu0 %649 }
 0x20c   : > { %v819_v35 = vsel %vm795_vm0, %v5911_v24, %v652_v34  ;;  %v818_v22 = vsel %vm795_vm0, %v5914_v25, %v650_v9 }
 0x20f   : > { %v749_v36 = vpop.permute.xlu1 %748  ;;  %v747_v23 = vpop.permute.xlu0 %746 }
 0x210   : > { %v852_v37 = vsel %vm828_vm1, %v819_v35, %v749_v36  ;;  %v851_v38 = vsel %vm828_vm1, %v818_v22, %v747_v23 }
 0x211   : > { %4545 = vmatprep.mubr.msk.f32.mxu0 %vm868_vm2, %v851_v38 }
 0x212   : > { %4546 = vmatmul.mubr.msk.f32.gmra.mrb[22].mxu0 %vm868_vm2, %v852_v37 }
 0x213   : > { %v656_v39 = vpop.permute.xlu1 %655  ;;  %v654_v10 = vpop.permute.xlu0 %653 }
 0x214   : > { %v821_v40 = vsel %vm795_vm0, %v5925_v26, %v656_v39  ;;  %v820_v24 = vsel %vm795_vm0, %v5928_v27, %v654_v10 }
 0x217   : > { %v753_v11 = vpop.permute.xlu1 %752  ;;  %v751_v25 = vpop.permute.xlu0 %750 }
 0x218   : > { %v854_v41 = vsel %vm828_vm1, %v821_v40, %v753_v11  ;;  %v853_v42 = vsel %vm828_vm1, %v820_v24, %v751_v25 }
 0x219   : > { %4548 = vmatprep.mubr.msk.f32.mxu0 %vm868_vm2, %v853_v42 }
 0x21a   : > { %4549 = vmatmul.mubr.msk.f32.gmra.mrb[24].mxu0 %vm868_vm2, %v854_v41 }
 0x21b   : > { %v660_v43 = vpop.permute.xlu1 %659  ;;  %v658_v44 = vpop.permute.xlu0 %657 }
 0x21c   : > { %v823_v45 = vsel %vm795_vm0, %v5939_v28, %v660_v43  ;;  %v822_v26 = vsel %vm795_vm0, %v5942_v29, %v658_v44 }
 0x21f   : > { %v757_v12 = vpop.permute.xlu1 %756  ;;  %v755_v27 = vpop.permute.xlu0 %754 }
 0x220   : > { %v856_v46 = vsel %vm828_vm1, %v823_v45, %v757_v12  ;;  %v855_v13 = vsel %vm828_vm1, %v822_v26, %v755_v27 }
 0x221   : > { %4551 = vmatprep.mubr.msk.f32.mxu0 %vm868_vm2, %v855_v13 }
 0x222   : > { %4552 = vmatmul.mubr.msk.f32.gmra.mrb[26].mxu0 %vm868_vm2, %v856_v46 }
 0x223   : > { %v664_v47 = vpop.permute.xlu1 %663  ;;  %v662_v48 = vpop.permute.xlu0 %661 }
 0x224   : > { %v825_v49 = vsel %vm795_vm0, %v5953_v30, %v664_v47  ;;  %v824_v28 = vsel %vm795_vm0, %v5956_v31, %v662_v48 }
 0x227   : > { %v761_v50 = vpop.permute.xlu1 %760  ;;  %v759_v29 = vpop.permute.xlu0 %758 }
 0x228   : > { %v858_v51 = vsel %vm828_vm1, %v825_v49, %v761_v50  ;;  %v857_v14 = vsel %vm828_vm1, %v824_v28, %v759_v29 }
 0x229   : > { %4554 = vmatprep.mubr.msk.f32.mxu0 %vm868_vm2, %v857_v14 }
 0x22a   : > { %4555 = vmatmul.mubr.msk.f32.gmra.mrb[28].mxu0 %vm868_vm2, %v858_v51 }
 0x22b   : > { %v666_v52 = vpop.permute.xlu0 %665  ;;  %v668_v15 = vpop.permute.xlu1 %667 }
 0x22c   : > { %v827_v53 = vsel %vm795_vm0, %v5967_v32, %v668_v15  ;;  %v826_v30 = vsel %vm795_vm0, %v5970_v33, %v666_v52  ;;  %v4726_v32 = vpack.c.bf16 %v1223_v57, %v1222_v56 }
 0x22e   : > { %4727 = vmatprep.subr.bf16.mxu1 %v4726_v32 }
 0x22f   : > { %v6109_v54 = vpop.permute.xlu0 %762  ;;  %4729 = vmatpush3.bf16.msra.mxu1 %v4726_v32 }
 0x230   : > { %v859_v31 = vsel %vm828_vm1, %v826_v30, %v6109_v54  ;;  %v860_v55 = vsel %vm828_vm1, %v827_v53, %v6109_v54  ;;  %4564 = vmatprep.subr.mxu1 %v1224_v61 }
 0x231   : > { %4557 = vmatprep.mubr.msk.f32.mxu0 %vm868_vm2, %v859_v31 }
 0x232   : > { %4558 = vmatmul.mubr.msk.f32.gmra.mrb[30].mxu0 %vm868_vm2, %v860_v55 }
 0x233   : > { %4565 = vmatpush3.msra.mxu1 %v1224_v61 }
 0x28d   : > { %v4514_v58 = vpop.f32.mrb[0].mxu0 }
 0x28e   : > { %v1037_v33 = vadd.f32 %v4514_v58, %v6117_v16  ;;  %v1031_v17 = vpop.f32.mrb[1].mxu0 }
 0x28f   : > { %v1032_v59 = vadd.f32 %v6117_v16, %v1031_v17 }
 0x290   : > { %v1191_v60 = vmax.f32 %v1037_v33, 0.0 }
 0x291   : > { %v1190_v62 = vmax.f32 %v1032_v59, 0.0 }
 0x292   : > { %v1259_v63 = vrot.slane %v1191_v60, 7 }
 0x293   : > { %v1258_v18 = vrot.slane %v1190_v62, 7 }
 0x294   : > { %v1370_v1 = vsel %vm1257_vm3, %v1259_v63, 0.0 }
 0x295   : > { %v1422_v19 = vrot.slane %v1370_v1, 1  ;;  %v6123_v2 = vsel %vm1257_vm3, %v1258_v18, %v1259_v63  ;;  %v6126_v0 = vsel %vm1257_vm3, 0.0, %v1258_v18  ;;  %v4517_v3 = vpop.f32.mrb[2].mxu0  ;;  %v1599_v21 = vrot.slane %v1370_v1, 2 }
 0x296   : > { %v1419_v4 = vrot.slane %v6126_v0, 1  ;;  %v1047_v5 = vadd.f32 %v4517_v3, %v6117_v16  ;;  %v1041_v20 = vpop.f32.mrb[3].mxu0  ;;  %v1420_v6 = vrot.slane %v6123_v2, 1  ;;  %v1596_v7 = vrot.slane %v6126_v0, 2 }
 0x297   : > { %v1042_v8 = vadd.f32 %v6117_v16, %v1041_v20  ;;  %v1597_v22 = vrot.slane %v6123_v2, 2 }
 0x298   : > { %v1193_v34 = vmax.f32 %v1047_v5, 0.0  ;;  %v1423_v9 = vsel %vm1418_vm4, %v1420_v6, %v1422_v19  ;;  %v1421_v35 = vsel %vm1418_vm4, %v1419_v4, %v1420_v6 }
 0x299   : > { %v1192_v36 = vmax.f32 %v1042_v8, 0.0  ;;  %1501 = vrot.lane.b32.xlu0 %v1423_v9, %s5335_s12  ;;  %1499 = vrot.lane.b32.xlu1 %v1421_v35, %s5335_s12  ;;  %v1600_v39 = vsel %vm1595_vm5, %v1597_v22, %v1599_v21  ;;  %v1598_v10 = vsel %vm1595_vm5, %v1596_v7, %v1597_v22 }
 0x29a   : > { %v1262_v23 = vrot.slane %v1193_v34, 7 }
 0x29b   : > { %v1261_v37 = vrot.slane %v1192_v36, 7 }
 0x29c   : > { %v1371_v38 = vsel %vm1257_vm3, %v1262_v23, 0.0 }
 0x29d   : > { %v1427_v40 = vrot.slane %v1371_v38, 1  ;;  %v6142_v24 = vsel %vm1257_vm3, %v1261_v37, %v1262_v23  ;;  %v6145_v11 = vsel %vm1257_vm3, 0.0, %v1261_v37  ;;  %1678 = vrot.lane.b32.xlu0 %v1600_v39, %s5334_s2  ;;  %1676 = vrot.lane.b32.xlu1 %v1598_v10, %s5334_s2  ;;  %v4520_v25 = vpop.f32.mrb[4].mxu0  ;;  %v1604_v45 = vrot.slane %v1371_v38, 2 }
 0x29e   : > { %v1424_v41 = vrot.slane %v6145_v11, 1  ;;  %v1057_v42 = vadd.f32 %v4520_v25, %v6117_v16  ;;  %v1051_v43 = vpop.f32.mrb[5].mxu0  ;;  %v1425_v44 = vrot.slane %v6142_v24, 1  ;;  %v1601_v26 = vrot.slane %v6145_v11, 2 }
 0x29f   : > { %v1052_v12 = vadd.f32 %v6117_v16, %v1051_v43  ;;  %v1602_v47 = vrot.slane %v6142_v24, 2 }
 0x2a0   : > { %v1195_v27 = vmax.f32 %v1057_v42, 0.0  ;;  %v1428_v46 = vsel %vm1418_vm4, %v1425_v44, %v1427_v40  ;;  %v1426_v13 = vsel %vm1418_vm4, %v1424_v41, %v1425_v44 }
 0x2a1   : > { %v1194_v48 = vmax.f32 %v1052_v12, 0.0  ;;  %1505 = vrot.lane.b32.xlu0 %v1428_v46, %s5335_s12  ;;  %1503 = vrot.lane.b32.xlu1 %v1426_v13, %s5335_s12  ;;  %v1605_v29 = vsel %vm1595_vm5, %v1602_v47, %v1604_v45  ;;  %v1603_v51 = vsel %vm1595_vm5, %v1601_v26, %v1602_v47 }
 0x2a2   : > { %v1265_v49 = vrot.slane %v1195_v27, 7 }
 0x2a3   : > { %v1264_v28 = vrot.slane %v1194_v48, 7 }
 0x2a4   : > { %v1372_v50 = vsel %vm1257_vm3, %v1265_v49, 0.0 }
 0x2a5   : > { %v1432_v14 = vrot.slane %v1372_v50, 1  ;;  %v6163_v52 = vsel %vm1257_vm3, %v1264_v28, %v1265_v49  ;;  %v6166_v15 = vsel %vm1257_vm3, 0.0, %v1264_v28  ;;  %1682 = vrot.lane.b32.xlu0 %v1605_v29, %s5334_s2  ;;  %1680 = vrot.lane.b32.xlu1 %v1603_v51, %s5334_s2  ;;  %v4523_v53 = vpop.f32.mrb[6].mxu0  ;;  %v1609_v57 = vrot.slane %v1372_v50, 2 }
 0x2a6   : > { %v1429_v30 = vrot.slane %v6166_v15, 1  ;;  %v1067_v31 = vadd.f32 %v4523_v53, %v6117_v16  ;;  %v1061_v55 = vpop.f32.mrb[7].mxu0  ;;  %v1430_v56 = vrot.slane %v6163_v52, 1  ;;  %v1606_v32 = vrot.slane %v6166_v15, 2 }
 0x2a7   : > { %v1062_v58 = vadd.f32 %v6117_v16, %v1061_v55  ;;  %v1607_v60 = vrot.slane %v6163_v52, 2 }
 0x2a8   : > { %v1197_v33 = vmax.f32 %v1067_v31, 0.0  ;;  %v1433_v17 = vsel %vm1418_vm4, %v1430_v56, %v1432_v14  ;;  %v1431_v59 = vsel %vm1418_vm4, %v1429_v30, %v1430_v56 }
 0x2a9   : > { %v1196_v61 = vmax.f32 %v1062_v58, 0.0  ;;  %1509 = vrot.lane.b32.xlu0 %v1433_v17, %s5335_s12  ;;  %1507 = vrot.lane.b32.xlu1 %v1431_v59, %s5335_s12  ;;  %v1610_v1 = vsel %vm1595_vm5, %v1607_v60, %v1609_v57  ;;  %v1608_v19 = vsel %vm1595_vm5, %v1606_v32, %v1607_v60 }
 0x2aa   : > { %v1268_v62 = vrot.slane %v1197_v33, 7 }
 0x2ab   : > { %v1267_v63 = vrot.slane %v1196_v61, 7 }
 0x2ac   : > { %v1373_v18 = vsel %vm1257_vm3, %v1268_v62, 0.0 }
 0x2ad   : > { %v1437_v3 = vrot.slane %v1373_v18, 1  ;;  %v6184_v4 = vsel %vm1257_vm3, %v1267_v63, %v1268_v62  ;;  %v6187_v5 = vsel %vm1257_vm3, 0.0, %v1267_v63  ;;  %1686 = vrot.lane.b32.xlu0 %v1610_v1, %s5334_s2  ;;  %1684 = vrot.lane.b32.xlu1 %v1608_v19, %s5334_s2  ;;  %v4526_v20 = vpop.f32.mrb[8].mxu0  ;;  %v1614_v34 = vrot.slane %v1373_v18, 2 }
 0x2ae   : > { %v1434_v6 = vrot.slane %v6187_v5, 1  ;;  %v1077_v21 = vadd.f32 %v4526_v20, %v6117_v16  ;;  %v1071_v7 = vpop.f32.mrb[9].mxu0  ;;  %v1435_v8 = vrot.slane %v6184_v4, 1  ;;  %v1611_v9 = vrot.slane %v6187_v5, 2 }
 0x2af   : > { %v1072_v35 = vadd.f32 %v6117_v16, %v1071_v7  ;;  %v1612_v37 = vrot.slane %v6184_v4, 2 }
 0x2b0   : > { %v1199_v22 = vmax.f32 %v1077_v21, 0.0  ;;  %v1438_v36 = vsel %vm1418_vm4, %v1435_v8, %v1437_v3  ;;  %v1436_v23 = vsel %vm1418_vm4, %v1434_v6, %v1435_v8 }
 0x2b1   : > { %v1198_v38 = vmax.f32 %v1072_v35, 0.0  ;;  %1513 = vrot.lane.b32.xlu0 %v1438_v36, %s5335_s12  ;;  %1511 = vrot.lane.b32.xlu1 %v1436_v23, %s5335_s12  ;;  %v1615_v25 = vsel %vm1595_vm5, %v1612_v37, %v1614_v34  ;;  %v1613_v41 = vsel %vm1595_vm5, %v1611_v9, %v1612_v37 }
 0x2b2   : > { %v1271_v39 = vrot.slane %v1199_v22, 7 }
 0x2b3   : > { %v1270_v10 = vrot.slane %v1198_v38, 7 }
 0x2b4   : > { %v1374_v40 = vsel %vm1257_vm3, %v1271_v39, 0.0 }
 0x2b5   : > { %v1442_v42 = vrot.slane %v1374_v40, 1  ;;  %v6205_v43 = vsel %vm1257_vm3, %v1270_v10, %v1271_v39  ;;  %v6208_v44 = vsel %vm1257_vm3, 0.0, %v1270_v10  ;;  %1690 = vrot.lane.b32.xlu0 %v1615_v25, %s5334_s2  ;;  %1688 = vrot.lane.b32.xlu1 %v1613_v41, %s5334_s2  ;;  %v4529_v45 = vpop.f32.mrb[10].mxu0  ;;  %v1619_v13 = vrot.slane %v1374_v40, 2 }
 0x2b6   : > { %v1439_v26 = vrot.slane %v6208_v44, 1  ;;  %v1087_v12 = vadd.f32 %v4529_v45, %v6117_v16  ;;  %v1081_v27 = vpop.f32.mrb[11].mxu0  ;;  %v1440_v46 = vrot.slane %v6205_v43, 1  ;;  %v1616_v47 = vrot.slane %v6208_v44, 2 }
 0x2b7   : > { %v1082_v48 = vadd.f32 %v6117_v16, %v1081_v27  ;;  %v1617_v29 = vrot.slane %v6205_v43, 2 }
 0x2b8   : > { %v1201_v49 = vmax.f32 %v1087_v12, 0.0  ;;  %v1443_v28 = vsel %vm1418_vm4, %v1440_v46, %v1442_v42  ;;  %v1441_v50 = vsel %vm1418_vm4, %v1439_v26, %v1440_v46 }
 0x2b9   : > { %v1200_v51 = vmax.f32 %v1082_v48, 0.0  ;;  %1517 = vrot.lane.b32.xlu0 %v1443_v28, %s5335_s12  ;;  %1515 = vrot.lane.b32.xlu1 %v1441_v50, %s5335_s12  ;;  %v1620_v31 = vsel %vm1595_vm5, %v1617_v29, %v1619_v13  ;;  %v1618_v55 = vsel %vm1595_vm5, %v1616_v47, %v1617_v29 }
 0x2ba   : > { %v1274_v14 = vrot.slane %v1201_v49, 7 }
 0x2bb   : > { %v1273_v53 = vrot.slane %v1200_v51, 7 }
 0x2bc   : > { %v1375_v30 = vsel %vm1257_vm3, %v1274_v14, 0.0 }
 0x2bd   : > { %v1447_v56 = vrot.slane %v1375_v30, 1  ;;  %v6226_v57 = vsel %vm1257_vm3, %v1273_v53, %v1274_v14  ;;  %v6229_v32 = vsel %vm1257_vm3, 0.0, %v1273_v53  ;;  %1694 = vrot.lane.b32.xlu0 %v1620_v31, %s5334_s2  ;;  %1692 = vrot.lane.b32.xlu1 %v1618_v55, %s5334_s2  ;;  %v4532_v58 = vpop.f32.mrb[12].mxu0  ;;  %v1624_v61 = vrot.slane %v1375_v30, 2 }
 0x2be   : > { %v1444_v33 = vrot.slane %v6229_v32, 1  ;;  %v1097_v17 = vadd.f32 %v4532_v58, %v6117_v16  ;;  %v1091_v59 = vpop.f32.mrb[13].mxu0  ;;  %v1445_v60 = vrot.slane %v6226_v57, 1  ;;  %v1621_v62 = vrot.slane %v6229_v32, 2 }
 0x2bf   : > { %v1092_v63 = vadd.f32 %v6117_v16, %v1091_v59  ;;  %v1622_v3 = vrot.slane %v6226_v57, 2 }
 0x2c0   : > { %v1203_v18 = vmax.f32 %v1097_v17, 0.0  ;;  %v1448_v1 = vsel %vm1418_vm4, %v1445_v60, %v1447_v56  ;;  %v1446_v19 = vsel %vm1418_vm4, %v1444_v33, %v1445_v60 }
 0x2c1   : > { %v1202_v20 = vmax.f32 %v1092_v63, 0.0  ;;  %1521 = vrot.lane.b32.xlu0 %v1448_v1, %s5335_s12  ;;  %1519 = vrot.lane.b32.xlu1 %v1446_v19, %s5335_s12  ;;  %v1625_v8 = vsel %vm1595_vm5, %v1622_v3, %v1624_v61  ;;  %v1623_v34 = vsel %vm1595_vm5, %v1621_v62, %v1622_v3 }
 0x2c2   : > { %v1277_v6 = vrot.slane %v1203_v18, 7 }
 0x2c3   : > { %v1276_v21 = vrot.slane %v1202_v20, 7 }
 0x2c4   : > { %v1376_v7 = vsel %vm1257_vm3, %v1277_v6, 0.0 }
 0x2c5   : > { %v1452_v9 = vrot.slane %v1376_v7, 1  ;;  %v6247_v35 = vsel %vm1257_vm3, %v1276_v21, %v1277_v6  ;;  %v6250_v22 = vsel %vm1257_vm3, 0.0, %v1276_v21  ;;  %1698 = vrot.lane.b32.xlu0 %v1625_v8, %s5334_s2  ;;  %1696 = vrot.lane.b32.xlu1 %v1623_v34, %s5334_s2  ;;  %v4535_v36 = vpop.f32.mrb[14].mxu0  ;;  %v1629_v10 = vrot.slane %v1376_v7, 2 }
 0x2c6   : > { %v1449_v23 = vrot.slane %v6250_v22, 1  ;;  %v1107_v37 = vadd.f32 %v4535_v36, %v6117_v16  ;;  %v1101_v38 = vpop.f32.mrb[15].mxu0  ;;  %v1450_v39 = vrot.slane %v6247_v35, 1  ;;  %v1626_v40 = vrot.slane %v6250_v22, 2 }
 0x2c7   : > { %v1102_v25 = vadd.f32 %v6117_v16, %v1101_v38  ;;  %v1627_v26 = vrot.slane %v6247_v35, 2 }
 0x2c8   : > { %v1205_v41 = vmax.f32 %v1107_v37, 0.0  ;;  %v1453_v42 = vsel %vm1418_vm4, %v1450_v39, %v1452_v9  ;;  %v1451_v45 = vsel %vm1418_vm4, %v1449_v23, %v1450_v39 }
 0x2c9   : > { %v1204_v12 = vmax.f32 %v1102_v25, 0.0  ;;  %1525 = vrot.lane.b32.xlu0 %v1453_v42, %s5335_s12  ;;  %1523 = vrot.lane.b32.xlu1 %v1451_v45, %s5335_s12  ;;  %v1630_v47 = vsel %vm1595_vm5, %v1627_v26, %v1629_v10  ;;  %v1628_v48 = vsel %vm1595_vm5, %v1626_v40, %v1627_v26 }
 0x2ca   : > { %v1280_v27 = vrot.slane %v1205_v41, 7 }
 0x2cb   : > { %v1279_v46 = vrot.slane %v1204_v12, 7 }
 0x2cc   : > { %v1377_v13 = vsel %vm1257_vm3, %v1280_v27, 0.0 }
 0x2cd   : > { %v1457_v49 = vrot.slane %v1377_v13, 1  ;;  %v6268_v28 = vsel %vm1257_vm3, %v1279_v46, %v1280_v27  ;;  %v6271_v50 = vsel %vm1257_vm3, 0.0, %v1279_v46  ;;  %1702 = vrot.lane.b32.xlu0 %v1630_v47, %s5334_s2  ;;  %1700 = vrot.lane.b32.xlu1 %v1628_v48, %s5334_s2  ;;  %v4538_v29 = vpop.f32.mrb[16].mxu0  ;;  %v1634_v31 = vrot.slane %v1377_v13, 2 }
 0x2ce   : > { %v1454_v51 = vrot.slane %v6271_v50, 1  ;;  %v1117_v14 = vadd.f32 %v4538_v29, %v6117_v16  ;;  %v1111_v53 = vpop.f32.mrb[17].mxu0  ;;  %v1455_v30 = vrot.slane %v6268_v28, 1  ;;  %v1631_v55 = vrot.slane %v6271_v50, 2 }
 0x2cf   : > { %v1112_v56 = vadd.f32 %v6117_v16, %v1111_v53  ;;  %v1632_v59 = vrot.slane %v6268_v28, 2 }
 0x2d0   : > { %v1207_v58 = vmax.f32 %v1117_v14, 0.0  ;;  %v1458_v33 = vsel %vm1418_vm4, %v1455_v30, %v1457_v49  ;;  %v1456_v17 = vsel %vm1418_vm4, %v1454_v51, %v1455_v30 }
 0x2d1   : > { %v1206_v60 = vmax.f32 %v1112_v56, 0.0  ;;  %1529 = vrot.lane.b32.xlu0 %v1458_v33, %s5335_s12  ;;  %1527 = vrot.lane.b32.xlu1 %v1456_v17, %s5335_s12  ;;  %v1635_v18 = vsel %vm1595_vm5, %v1632_v59, %v1634_v31  ;;  %v1633_v1 = vsel %vm1595_vm5, %v1631_v55, %v1632_v59 }
 0x2d2   : > { %v1283_v61 = vrot.slane %v1207_v58, 7 }
 0x2d3   : > { %v1282_v62 = vrot.slane %v1206_v60, 7 }
 0x2d4   : > { %v1378_v63 = vsel %vm1257_vm3, %v1283_v61, 0.0 }
 0x2d5   : > { %v1462_v19 = vrot.slane %v1378_v63, 1  ;;  %v6289_v3 = vsel %vm1257_vm3, %v1282_v62, %v1283_v61  ;;  %v6292_v20 = vsel %vm1257_vm3, 0.0, %v1282_v62  ;;  %1706 = vrot.lane.b32.xlu0 %v1635_v18, %s5334_s2  ;;  %1704 = vrot.lane.b32.xlu1 %v1633_v1, %s5334_s2  ;;  %v4541_v6 = vpop.f32.mrb[18].mxu0  ;;  %v1639_v9 = vrot.slane %v1378_v63, 2 }
 0x2d6   : > { %v1459_v21 = vrot.slane %v6292_v20, 1  ;;  %v1127_v7 = vadd.f32 %v4541_v6, %v6117_v16  ;;  %v1121_v8 = vpop.f32.mrb[19].mxu0  ;;  %v1460_v34 = vrot.slane %v6289_v3, 1  ;;  %v1636_v36 = vrot.slane %v6292_v20, 2 }
 0x2d7   : > { %v1122_v23 = vadd.f32 %v6117_v16, %v1121_v8  ;;  %v1637_v10 = vrot.slane %v6289_v3, 2 }
 0x2d8   : > { %v1209_v37 = vmax.f32 %v1127_v7, 0.0  ;;  %v1463_v38 = vsel %vm1418_vm4, %v1460_v34, %v1462_v19  ;;  %v1461_v39 = vsel %vm1418_vm4, %v1459_v21, %v1460_v34 }
 0x2d9   : > { %v1208_v40 = vmax.f32 %v1122_v23, 0.0  ;;  %1533 = vrot.lane.b32.xlu0 %v1463_v38, %s5335_s12  ;;  %1531 = vrot.lane.b32.xlu1 %v1461_v39, %s5335_s12  ;;  %v1640_v45 = vsel %vm1595_vm5, %v1637_v10, %v1639_v9  ;;  %v1638_v26 = vsel %vm1595_vm5, %v1636_v36, %v1637_v10 }
 0x2da   : > { %v1286_v25 = vrot.slane %v1209_v37, 7 }
 0x2db   : > { %v1285_v41 = vrot.slane %v1208_v40, 7 }
 0x2dc   : > { %v1379_v42 = vsel %vm1257_vm3, %v1286_v25, 0.0 }
 0x2dd   : > { %v1467_v12 = vrot.slane %v1379_v42, 1  ;;  %v6310_v27 = vsel %vm1257_vm3, %v1285_v41, %v1286_v25  ;;  %v6313_v46 = vsel %vm1257_vm3, 0.0, %v1285_v41  ;;  %1710 = vrot.lane.b32.xlu0 %v1640_v45, %s5334_s2  ;;  %1708 = vrot.lane.b32.xlu1 %v1638_v26, %s5334_s2  ;;  %v4544_v13 = vpop.f32.mrb[20].mxu0  ;;  %v1644_v51 = vrot.slane %v1379_v42, 2 }
 0x2de   : > { %v1464_v47 = vrot.slane %v6313_v46, 1  ;;  %v1137_v48 = vadd.f32 %v4544_v13, %v6117_v16  ;;  %v1131_v49 = vpop.f32.mrb[21].mxu0  ;;  %v1465_v29 = vrot.slane %v6310_v27, 1  ;;  %v1641_v14 = vrot.slane %v6313_v46, 2 }
 0x2df   : > { %v1132_v53 = vadd.f32 %v6117_v16, %v1131_v49  ;;  %v1642_v56 = vrot.slane %v6310_v27, 2 }
 0x2e0   : > { %v1211_v30 = vmax.f32 %v1137_v48, 0.0  ;;  %v1468_v31 = vsel %vm1418_vm4, %v1465_v29, %v1467_v12  ;;  %v1466_v55 = vsel %vm1418_vm4, %v1464_v47, %v1465_v29 }
 0x2e1   : > { %v1210_v58 = vmax.f32 %v1132_v53, 0.0  ;;  %1537 = vrot.lane.b32.xlu0 %v1468_v31, %s5335_s12  ;;  %1535 = vrot.lane.b32.xlu1 %v1466_v55, %s5335_s12  ;;  %v1645_v60 = vsel %vm1595_vm5, %v1642_v56, %v1644_v51  ;;  %v1643_v61 = vsel %vm1595_vm5, %v1641_v14, %v1642_v56 }
 0x2e2   : > { %v1289_v33 = vrot.slane %v1211_v30, 7 }
 0x2e3   : > { %v1288_v17 = vrot.slane %v1210_v58, 7 }
 0x2e4   : > { %v1380_v59 = vsel %vm1257_vm3, %v1289_v33, 0.0 }
 0x2e5   : > { %v1472_v62 = vrot.slane %v1380_v59, 1  ;;  %v6331_v63 = vsel %vm1257_vm3, %v1288_v17, %v1289_v33  ;;  %v6334_v18 = vsel %vm1257_vm3, 0.0, %v1288_v17  ;;  %1714 = vrot.lane.b32.xlu0 %v1645_v60, %s5334_s2  ;;  %1712 = vrot.lane.b32.xlu1 %v1643_v61, %s5334_s2  ;;  %v4547_v1 = vpop.f32.mrb[22].mxu0  ;;  %v1649_v8 = vrot.slane %v1380_v59, 2 }
 0x2e6   : > { %v1469_v19 = vrot.slane %v6334_v18, 1  ;;  %v1147_v6 = vadd.f32 %v4547_v1, %v6117_v16  ;;  %v1141_v21 = vpop.f32.mrb[23].mxu0  ;;  %v1470_v7 = vrot.slane %v6331_v63, 1  ;;  %v1646_v34 = vrot.slane %v6334_v18, 2 }
 0x2e7   : > { %v1142_v9 = vadd.f32 %v6117_v16, %v1141_v21  ;;  %v1647_v38 = vrot.slane %v6331_v63, 2 }
 0x2e8   : > { %v1213_v36 = vmax.f32 %v1147_v6, 0.0  ;;  %v1473_v23 = vsel %vm1418_vm4, %v1470_v7, %v1472_v62  ;;  %v1471_v37 = vsel %vm1418_vm4, %v1469_v19, %v1470_v7 }
 0x2e9   : > { %v1212_v39 = vmax.f32 %v1142_v9, 0.0  ;;  %1541 = vrot.lane.b32.xlu0 %v1473_v23, %s5335_s12  ;;  %1539 = vrot.lane.b32.xlu1 %v1471_v37, %s5335_s12  ;;  %v1650_v41 = vsel %vm1595_vm5, %v1647_v38, %v1649_v8  ;;  %v1648_v42 = vsel %vm1595_vm5, %v1646_v34, %v1647_v38 }
 0x2ea   : > { %v1292_v10 = vrot.slane %v1213_v36, 7 }
 0x2eb   : > { %v1291_v40 = vrot.slane %v1212_v39, 7 }
 0x2ec   : > { %v1381_v25 = vsel %vm1257_vm3, %v1292_v10, 0.0 }
 0x2ed   : > { %v1477_v45 = vrot.slane %v1381_v25, 1  ;;  %v6352_v26 = vsel %vm1257_vm3, %v1291_v40, %v1292_v10  ;;  %v6355_v12 = vsel %vm1257_vm3, 0.0, %v1291_v40  ;;  %1718 = vrot.lane.b32.xlu0 %v1650_v41, %s5334_s2  ;;  %1716 = vrot.lane.b32.xlu1 %v1648_v42, %s5334_s2  ;;  %v4550_v13 = vpop.f32.mrb[24].mxu0  ;;  %v1654_v51 = vrot.slane %v1381_v25, 2 }
 0x2ee   : > { %v1474_v47 = vrot.slane %v6355_v12, 1  ;;  %v1157_v48 = vadd.f32 %v4550_v13, %v6117_v16  ;;  %v1151_v49 = vpop.f32.mrb[25].mxu0  ;;  %v1475_v29 = vrot.slane %v6352_v26, 1  ;;  %v1651_v14 = vrot.slane %v6355_v12, 2 }
 0x2ef   : > { %v1152_v53 = vadd.f32 %v6117_v16, %v1151_v49  ;;  %v1652_v56 = vrot.slane %v6352_v26, 2 }
 0x2f0   : > { %v1215_v30 = vmax.f32 %v1157_v48, 0.0  ;;  %v1478_v31 = vsel %vm1418_vm4, %v1475_v29, %v1477_v45  ;;  %v1476_v55 = vsel %vm1418_vm4, %v1474_v47, %v1475_v29 }
 0x2f1   : > { %v1214_v58 = vmax.f32 %v1152_v53, 0.0  ;;  %1545 = vrot.lane.b32.xlu0 %v1478_v31, %s5335_s12  ;;  %1543 = vrot.lane.b32.xlu1 %v1476_v55, %s5335_s12  ;;  %v1655_v60 = vsel %vm1595_vm5, %v1652_v56, %v1654_v51  ;;  %v1653_v61 = vsel %vm1595_vm5, %v1651_v14, %v1652_v56 }
 0x2f2   : > { %v1295_v33 = vrot.slane %v1215_v30, 7 }
 0x2f3   : > { %v1294_v17 = vrot.slane %v1214_v58, 7 }
 0x2f4   : > { %v1382_v59 = vsel %vm1257_vm3, %v1295_v33, 0.0 }
 0x2f5   : > { %v1482_v62 = vrot.slane %v1382_v59, 1  ;;  %v6373_v1 = vsel %vm1257_vm3, %v1294_v17, %v1295_v33  ;;  %v6376_v19 = vsel %vm1257_vm3, 0.0, %v1294_v17  ;;  %1722 = vrot.lane.b32.xlu0 %v1655_v60, %s5334_s2  ;;  %1720 = vrot.lane.b32.xlu1 %v1653_v61, %s5334_s2  ;;  %v4553_v6 = vpop.f32.mrb[26].mxu0  ;;  %v1659_v9 = vrot.slane %v1382_v59, 2 }
 0x2f6   : > { %v1479_v21 = vrot.slane %v6376_v19, 1  ;;  %v1167_v7 = vadd.f32 %v4553_v6, %v6117_v16  ;;  %v1161_v8 = vpop.f32.mrb[27].mxu0  ;;  %v1480_v34 = vrot.slane %v6373_v1, 1  ;;  %v1656_v36 = vrot.slane %v6376_v19, 2 }
 0x2f7   : > { %v1162_v23 = vadd.f32 %v6117_v16, %v1161_v8  ;;  %v1657_v10 = vrot.slane %v6373_v1, 2 }
 0x2f8   : > { %v1217_v37 = vmax.f32 %v1167_v7, 0.0  ;;  %v1483_v38 = vsel %vm1418_vm4, %v1480_v34, %v1482_v62  ;;  %v1481_v39 = vsel %vm1418_vm4, %v1479_v21, %v1480_v34 }
 0x2f9   : > { %v1216_v40 = vmax.f32 %v1162_v23, 0.0  ;;  %1549 = vrot.lane.b32.xlu0 %v1483_v38, %s5335_s12  ;;  %1547 = vrot.lane.b32.xlu1 %v1481_v39, %s5335_s12  ;;  %v1660_v45 = vsel %vm1595_vm5, %v1657_v10, %v1659_v9  ;;  %v1658_v13 = vsel %vm1595_vm5, %v1656_v36, %v1657_v10 }
 0x2fa   : > { %v1298_v25 = vrot.slane %v1217_v37, 7 }
 0x2fb   : > { %v1297_v41 = vrot.slane %v1216_v40, 7 }
 0x2fc   : > { %v1383_v42 = vsel %vm1257_vm3, %v1298_v25, 0.0 }
 0x2fd   : > { %v1487_v47 = vrot.slane %v1383_v42, 1  ;;  %v6394_v48 = vsel %vm1257_vm3, %v1297_v41, %v1298_v25  ;;  %v6397_v49 = vsel %vm1257_vm3, 0.0, %v1297_v41  ;;  %1726 = vrot.lane.b32.xlu0 %v1660_v45, %s5334_s2  ;;  %1724 = vrot.lane.b32.xlu1 %v1658_v13, %s5334_s2  ;;  %v4556_v29 = vpop.f32.mrb[28].mxu0  ;;  %v1664_v31 = vrot.slane %v1383_v42, 2 }
 0x2fe   : > { %v1484_v51 = vrot.slane %v6397_v49, 1  ;;  %v1177_v14 = vadd.f32 %v4556_v29, %v6117_v16  ;;  %v1171_v53 = vpop.f32.mrb[29].mxu0  ;;  %v1485_v30 = vrot.slane %v6394_v48, 1  ;;  %v1661_v55 = vrot.slane %v6397_v49, 2 }
 0x2ff   : > { %v1172_v56 = vadd.f32 %v6117_v16, %v1171_v53  ;;  %v1662_v59 = vrot.slane %v6394_v48, 2 }
 0x300   : > { %v1219_v58 = vmax.f32 %v1177_v14, 0.0  ;;  %v1488_v33 = vsel %vm1418_vm4, %v1485_v30, %v1487_v47  ;;  %v1486_v17 = vsel %vm1418_vm4, %v1484_v51, %v1485_v30 }
 0x301   : > { %v1218_v60 = vmax.f32 %v1172_v56, 0.0  ;;  %1553 = vrot.lane.b32.xlu0 %v1488_v33, %s5335_s12  ;;  %1551 = vrot.lane.b32.xlu1 %v1486_v17, %s5335_s12  ;;  %v1665_v21 = vsel %vm1595_vm5, %v1662_v59, %v1664_v31  ;;  %v1663_v7 = vsel %vm1595_vm5, %v1661_v55, %v1662_v59 }
 0x302   : > { %v1301_v61 = vrot.slane %v1219_v58, 7 }
 0x303   : > { %v1300_v62 = vrot.slane %v1218_v60, 7 }
 0x304   : > { %v1384_v6 = vsel %vm1257_vm3, %v1301_v61, 0.0 }
 0x305   : > { %v1492_v8 = vrot.slane %v1384_v6, 1  ;;  %v6415_v34 = vsel %vm1257_vm3, %v1300_v62, %v1301_v61  ;;  %v6418_v9 = vsel %vm1257_vm3, 0.0, %v1300_v62  ;;  %1730 = vrot.lane.b32.xlu0 %v1665_v21, %s5334_s2  ;;  %1728 = vrot.lane.b32.xlu1 %v1663_v7, %s5334_s2  ;;  %v4559_v36 = vpop.f32.mrb[30].mxu0  ;;  %v1669_v10 = vrot.slane %v1384_v6, 2 }
 0x306   : > { %v1489_v23 = vrot.slane %v6418_v9, 1  ;;  %v1187_v37 = vadd.f32 %v4559_v36, %v6117_v16  ;;  %v1181_v38 = vpop.f32.mrb[31].mxu0  ;;  %v1490_v39 = vrot.slane %v6415_v34, 1  ;;  %v1666_v40 = vrot.slane %v6418_v9, 2 }
 0x307   : > { %v1182_v25 = vadd.f32 %v6117_v16, %v1181_v38  ;;  %v1667_v13 = vrot.slane %v6415_v34, 2 }
 0x308   : > { %v1221_v41 = vmax.f32 %v1187_v37, 0.0  ;;  %v1493_v42 = vsel %vm1418_vm4, %v1490_v39, %v1492_v8  ;;  %v1491_v45 = vsel %vm1418_vm4, %v1489_v23, %v1490_v39 }
 0x309   : > { %v1220_v47 = vmax.f32 %v1182_v25, 0.0  ;;  %1557 = vrot.lane.b32.xlu0 %v1493_v42, %s5335_s12  ;;  %1555 = vrot.lane.b32.xlu1 %v1491_v45, %s5335_s12  ;;  %v1670_v16 = vsel %vm1595_vm5, %v1667_v13, %v1669_v10  ;;  %v1668_v31 = vsel %vm1595_vm5, %v1666_v40, %v1667_v13 }
 0x30a   : > { %v1304_v29 = vrot.slane %v1221_v41, 7 }
 0x30b   : > { %v1303_v51 = vrot.slane %v1220_v47, 7  ;;  %v1500_v14 = vpop.permute.xlu1 %1499  ;;  %v1502_v53 = vpop.permute.xlu0 %1501 }
 0x30c   : > { %v1385_v30 = vsel %vm1257_vm3, %v1304_v29, 0.0  ;;  %v1772_v60 = vsel %vm795_vm0, %v6126_v0, %v1500_v14  ;;  %v1773_v61 = vsel %vm795_vm0, %v6123_v2, %v1502_v53 }
 0x30d   : > { %v1497_v55 = vrot.slane %v1385_v30, 1  ;;  %v6436_v56 = vsel %vm1257_vm3, %v1303_v51, %v1304_v29  ;;  %v6439_v58 = vsel %vm1257_vm3, 0.0, %v1303_v51  ;;  %1734 = vrot.lane.b32.xlu0 %v1670_v16, %s5334_s2  ;;  %1732 = vrot.lane.b32.xlu1 %v1668_v31, %s5334_s2  ;;  %v1674_v59 = vrot.slane %v1385_v30, 2 }
 0x30e   : > { %v1494_v33 = vrot.slane %v6439_v58, 1  ;;  %v1495_v17 = vrot.slane %v6436_v56, 1  ;;  %v1672_v21 = vrot.slane %v6436_v56, 2  ;;  %v1671_v37 = vrot.slane %v6439_v58, 2 }
 0x30f   : > { %v1677_v62 = vpop.permute.xlu1 %1676  ;;  %v1679_v6 = vpop.permute.xlu0 %1678 }
 0x310   : > { %v1805_v7 = vsel %vm828_vm1, %v1773_v61, %v1679_v6  ;;  %v1804_v8 = vsel %vm828_vm1, %v1772_v60, %v1677_v62  ;;  %v1498_v36 = vsel %vm1418_vm4, %v1495_v17, %v1497_v55  ;;  %v1496_v23 = vsel %vm1418_vm4, %v1494_v33, %v1495_v17 }
 0x311   : > { %4566 = vmatprep.mubr.msk.f32.mxu1 %vm868_vm2, %v1804_v8  ;;  %1561 = vrot.lane.b32.xlu0 %v1498_v36, %s5335_s12  ;;  %v1675_v38 = vsel %vm1595_vm5, %v1672_v21, %v1674_v59  ;;  %v1673_v39 = vsel %vm1595_vm5, %v1671_v37, %v1672_v21 }
 0x312   : > { %1559 = vrot.lane.b32.xlu1 %v1496_v23, %s5335_s12  ;;  %4567 = vmatmul.mubr.msk.f32.vlgmr.msra.gmra.mrb[0].mxu1 %vm868_vm2, %v1805_v7 }
 0x313   : > { %v1504_v2 = vpop.permute.xlu1 %1503  ;;  %v1506_v0 = vpop.permute.xlu0 %1505 }
 0x314   : > { %v1774_v10 = vsel %vm795_vm0, %v6145_v11, %v1504_v2  ;;  %v1775_v40 = vsel %vm795_vm0, %v6142_v24, %v1506_v0 }
 0x315   : > { %1738 = vrot.lane.b32.xlu0 %v1675_v38, %s5334_s2 }
 0x316   : > { %1736 = vrot.lane.b32.xlu1 %v1673_v39, %s5334_s2 }
 0x317   : > { %v1681_v25 = vpop.permute.xlu1 %1680  ;;  %v1683_v41 = vpop.permute.xlu0 %1682 }
 0x318   : > { %v1806_v42 = vsel %vm828_vm1, %v1774_v10, %v1681_v25  ;;  %v1807_v45 = vsel %vm828_vm1, %v1775_v40, %v1683_v41 }
 0x319   : > { %4569 = vmatprep.mubr.msk.f32.mxu1 %vm868_vm2, %v1806_v42 }
 0x31a   : > { %4570 = vmatmul.mubr.msk.f32.gmra.mrb[2].mxu1 %vm868_vm2, %v1807_v45 }
 0x31b   : > { %v1508_v13 = vpop.permute.xlu1 %1507  ;;  %v1510_v47 = vpop.permute.xlu0 %1509 }
 0x31c   : > { %v1776_v29 = vsel %vm795_vm0, %v6166_v15, %v1508_v13  ;;  %v1777_v11 = vsel %vm795_vm0, %v6163_v52, %v1510_v47 }
 0x31f   : > { %v1685_v51 = vpop.permute.xlu1 %1684  ;;  %v1687_v24 = vpop.permute.xlu0 %1686 }
 0x320   : > { %v1808_v14 = vsel %vm828_vm1, %v1776_v29, %v1685_v51  ;;  %v1809_v53 = vsel %vm828_vm1, %v1777_v11, %v1687_v24 }
 0x321   : > { %4572 = vmatprep.mubr.msk.f32.mxu1 %vm868_vm2, %v1808_v14 }
 0x322   : > { %4573 = vmatmul.mubr.msk.f32.gmra.mrb[4].mxu1 %vm868_vm2, %v1809_v53 }
 0x323   : > { %v1512_v30 = vpop.permute.xlu1 %1511  ;;  %v1514_v16 = vpop.permute.xlu0 %1513 }
 0x324   : > { %v1778_v31 = vsel %vm795_vm0, %v6187_v5, %v1512_v30  ;;  %v1779_v15 = vsel %vm795_vm0, %v6184_v4, %v1514_v16 }
 0x327   : > { %v1689_v55 = vpop.permute.xlu1 %1688  ;;  %v1691_v52 = vpop.permute.xlu0 %1690 }
 0x328   : > { %v1810_v33 = vsel %vm828_vm1, %v1778_v31, %v1689_v55  ;;  %v1811_v17 = vsel %vm828_vm1, %v1779_v15, %v1691_v52 }
 0x329   : > { %4575 = vmatprep.mubr.msk.f32.mxu1 %vm868_vm2, %v1810_v33 }
 0x32a   : > { %4576 = vmatmul.mubr.msk.f32.gmra.mrb[6].mxu1 %vm868_vm2, %v1811_v17 }
 0x32b   : > { %v1516_v59 = vpop.permute.xlu1 %1515  ;;  %v1518_v60 = vpop.permute.xlu0 %1517 }
 0x32c   : > { %v1780_v61 = vsel %vm795_vm0, %v6208_v44, %v1516_v59  ;;  %v1781_v5 = vsel %vm795_vm0, %v6205_v43, %v1518_v60 }
 0x32f   : > { %v1693_v62 = vpop.permute.xlu1 %1692  ;;  %v1695_v4 = vpop.permute.xlu0 %1694 }
 0x330   : > { %v1812_v6 = vsel %vm828_vm1, %v1780_v61, %v1693_v62  ;;  %v1813_v21 = vsel %vm828_vm1, %v1781_v5, %v1695_v4 }
 0x331   : > { %4578 = vmatprep.mubr.msk.f32.mxu1 %vm868_vm2, %v1812_v6 }
 0x332   : > { %4579 = vmatmul.mubr.msk.f32.gmra.mrb[8].mxu1 %vm868_vm2, %v1813_v21 }
 0x333   : > { %v1520_v7 = vpop.permute.xlu1 %1519  ;;  %v1522_v8 = vpop.permute.xlu0 %1521 }
 0x334   : > { %v1782_v36 = vsel %vm795_vm0, %v6229_v32, %v1520_v7  ;;  %v1783_v44 = vsel %vm795_vm0, %v6226_v57, %v1522_v8 }
 0x337   : > { %v1697_v23 = vpop.permute.xlu1 %1696  ;;  %v1699_v43 = vpop.permute.xlu0 %1698 }
 0x338   : > { %v1814_v37 = vsel %vm828_vm1, %v1782_v36, %v1697_v23  ;;  %v1815_v2 = vsel %vm828_vm1, %v1783_v44, %v1699_v43 }
 0x339   : > { %4581 = vmatprep.mubr.msk.f32.mxu1 %vm868_vm2, %v1814_v37 }
 0x33a   : > { %4582 = vmatmul.mubr.msk.f32.gmra.mrb[10].mxu1 %vm868_vm2, %v1815_v2 }
 0x33b   : > { %v1524_v0 = vpop.permute.xlu1 %1523  ;;  %v1526_v38 = vpop.permute.xlu0 %1525 }
 0x33c   : > { %v1784_v39 = vsel %vm795_vm0, %v6250_v22, %v1524_v0  ;;  %v1785_v32 = vsel %vm795_vm0, %v6247_v35, %v1526_v38 }
 0x33f   : > { %v1701_v10 = vpop.permute.xlu1 %1700  ;;  %v1703_v57 = vpop.permute.xlu0 %1702 }
 0x340   : > { %v1816_v40 = vsel %vm828_vm1, %v1784_v39, %v1701_v10  ;;  %v1817_v25 = vsel %vm828_vm1, %v1785_v32, %v1703_v57 }
 0x341   : > { %4584 = vmatprep.mubr.msk.f32.mxu1 %vm868_vm2, %v1816_v40 }
 0x342   : > { %4585 = vmatmul.mubr.msk.f32.gmra.mrb[12].mxu1 %vm868_vm2, %v1817_v25 }
 0x343   : > { %v1528_v41 = vpop.permute.xlu1 %1527  ;;  %v1530_v42 = vpop.permute.xlu0 %1529 }
 0x344   : > { %v1786_v45 = vsel %vm795_vm0, %v6271_v50, %v1528_v41  ;;  %v1787_v22 = vsel %vm795_vm0, %v6268_v28, %v1530_v42 }
 0x347   : > { %v1705_v13 = vpop.permute.xlu1 %1704  ;;  %v1707_v35 = vpop.permute.xlu0 %1706 }
 0x348   : > { %v1818_v47 = vsel %vm828_vm1, %v1786_v45, %v1705_v13  ;;  %v1819_v29 = vsel %vm828_vm1, %v1787_v22, %v1707_v35 }
 0x349   : > { %4587 = vmatprep.mubr.msk.f32.mxu1 %vm868_vm2, %v1818_v47 }
 0x34a   : > { %4588 = vmatmul.mubr.msk.f32.gmra.mrb[14].mxu1 %vm868_vm2, %v1819_v29 }
 0x34b   : > { %v1532_v11 = vpop.permute.xlu1 %1531  ;;  %v1534_v51 = vpop.permute.xlu0 %1533 }
 0x34c   : > { %v1788_v24 = vsel %vm795_vm0, %v6292_v20, %v1532_v11  ;;  %v1789_v50 = vsel %vm795_vm0, %v6289_v3, %v1534_v51 }
 0x34f   : > { %v1709_v14 = vpop.permute.xlu1 %1708  ;;  %v1711_v28 = vpop.permute.xlu0 %1710 }
 0x350   : > { %v1820_v53 = vsel %vm828_vm1, %v1788_v24, %v1709_v14  ;;  %v1821_v30 = vsel %vm828_vm1, %v1789_v50, %v1711_v28  ;;  %v2267_v50 = vld [vmem:[#allocation13] sm:$0xff]  ;;  %v2268_v14 = vld [vmem:[#allocation13 + $0x8] sm:$0xff] }
 0x351   : > { %4590 = vmatprep.mubr.msk.f32.mxu1 %vm868_vm2, %v1820_v53  ;;  %v4730_v28 = vpack.c.bf16 %v2268_v14, %v2267_v50  ;;  %v2269_v53 = vld [vmem:[#allocation13 + $0x10] sm:$0xff] }
 0x352   : > { %4591 = vmatmul.mubr.msk.f32.gmra.mrb[16].mxu1 %vm868_vm2, %v1821_v30  ;;  %v6585_v30 = vld [vmem:[#allocation11] ss:$0 sm:$0xff] }
 0x353   : > { %v1536_v16 = vpop.permute.xlu1 %1535  ;;  %v1538_v31 = vpop.permute.xlu0 %1537  ;;  %4731 = vmatprep.subr.bf16.mxu0 %v4730_v28 }
 0x354   : > { %v1790_v15 = vsel %vm795_vm0, %v6313_v46, %v1536_v16  ;;  %v1791_v20 = vsel %vm795_vm0, %v6310_v27, %v1538_v31  ;;  %4733 = vmatpush3.bf16.msra.mxu0 %v4730_v28 }
 0x355   : > { %4618 = vmatprep.subr.mxu0 %v2269_v53 }
 0x357   : > { %v1713_v55 = vpop.permute.xlu1 %1712  ;;  %v1715_v3 = vpop.permute.xlu0 %1714 }
 0x358   : > { %v1822_v52 = vsel %vm828_vm1, %v1790_v15, %v1713_v55  ;;  %v1823_v33 = vsel %vm828_vm1, %v1791_v20, %v1715_v3  ;;  %4619 = vmatpush3.msra.mxu0 %v2269_v53 }
 0x359   : > { %4593 = vmatprep.mubr.msk.f32.mxu1 %vm868_vm2, %v1822_v52 }
 0x35a   : > { %4594 = vmatmul.mubr.msk.f32.gmra.mrb[18].mxu1 %vm868_vm2, %v1823_v33 }
 0x35b   : > { %v1540_v17 = vpop.permute.xlu1 %1539  ;;  %v1542_v59 = vpop.permute.xlu0 %1541 }
 0x35c   : > { %v1792_v60 = vsel %vm795_vm0, %v6334_v18, %v1540_v17  ;;  %v1793_v46 = vsel %vm795_vm0, %v6331_v63, %v1542_v59 }
 0x35f   : > { %v1717_v61 = vpop.permute.xlu1 %1716  ;;  %v1719_v27 = vpop.permute.xlu0 %1718 }
 0x360   : > { %v1824_v5 = vsel %vm828_vm1, %v1792_v60, %v1717_v61  ;;  %v1825_v62 = vsel %vm828_vm1, %v1793_v46, %v1719_v27 }
 0x361   : > { %4596 = vmatprep.mubr.msk.f32.mxu1 %vm868_vm2, %v1824_v5 }
 0x362   : > { %4597 = vmatmul.mubr.msk.f32.gmra.mrb[20].mxu1 %vm868_vm2, %v1825_v62 }
 0x363   : > { %v1544_v4 = vpop.permute.xlu1 %1543  ;;  %v1546_v6 = vpop.permute.xlu0 %1545 }
 0x364   : > { %v1794_v21 = vsel %vm795_vm0, %v6355_v12, %v1544_v4  ;;  %v1795_v18 = vsel %vm795_vm0, %v6352_v26, %v1546_v6 }
 0x367   : > { %v1721_v7 = vpop.permute.xlu1 %1720  ;;  %v1723_v63 = vpop.permute.xlu0 %1722 }
 0x368   : > { %v1826_v8 = vsel %vm828_vm1, %v1794_v21, %v1721_v7  ;;  %v1827_v36 = vsel %vm828_vm1, %v1795_v18, %v1723_v63 }
 0x369   : > { %4599 = vmatprep.mubr.msk.f32.mxu1 %vm868_vm2, %v1826_v8 }
 0x36a   : > { %4600 = vmatmul.mubr.msk.f32.gmra.mrb[22].mxu1 %vm868_vm2, %v1827_v36 }
 0x36b   : > { %v1548_v44 = vpop.permute.xlu1 %1547  ;;  %v1550_v23 = vpop.permute.xlu0 %1549 }
 0x36c   : > { %v1796_v43 = vsel %vm795_vm0, %v6376_v19, %v1548_v44  ;;  %v1797_v12 = vsel %vm795_vm0, %v6373_v1, %v1550_v23 }
 0x36f   : > { %v1725_v37 = vpop.permute.xlu1 %1724  ;;  %v1727_v26 = vpop.permute.xlu0 %1726 }
 0x370   : > { %v1828_v2 = vsel %vm828_vm1, %v1796_v43, %v1725_v37  ;;  %v1829_v0 = vsel %vm828_vm1, %v1797_v12, %v1727_v26 }
 0x371   : > { %4602 = vmatprep.mubr.msk.f32.mxu1 %vm868_vm2, %v1828_v2 }
 0x372   : > { %4603 = vmatmul.mubr.msk.f32.gmra.mrb[24].mxu1 %vm868_vm2, %v1829_v0 }
 0x373   : > { %v1552_v38 = vpop.permute.xlu1 %1551  ;;  %v1554_v39 = vpop.permute.xlu0 %1553 }
 0x374   : > { %v1798_v32 = vsel %vm795_vm0, %v6397_v49, %v1552_v38  ;;  %v1799_v19 = vsel %vm795_vm0, %v6394_v48, %v1554_v39 }
 0x377   : > { %v1729_v10 = vpop.permute.xlu1 %1728  ;;  %v1731_v1 = vpop.permute.xlu0 %1730 }
 0x378   : > { %v1830_v57 = vsel %vm828_vm1, %v1798_v32, %v1729_v10  ;;  %v1831_v40 = vsel %vm828_vm1, %v1799_v19, %v1731_v1 }
 0x379   : > { %4605 = vmatprep.mubr.msk.f32.mxu1 %vm868_vm2, %v1830_v57 }
 0x37a   : > { %4606 = vmatmul.mubr.msk.f32.gmra.mrb[26].mxu1 %vm868_vm2, %v1831_v40 }
 0x37b   : > { %v1556_v25 = vpop.permute.xlu1 %1555  ;;  %v1558_v41 = vpop.permute.xlu0 %1557 }
 0x37c   : > { %v1800_v42 = vsel %vm795_vm0, %v6418_v9, %v1556_v25  ;;  %v1801_v49 = vsel %vm795_vm0, %v6415_v34, %v1558_v41 }
 0x37f   : > { %v1733_v45 = vpop.permute.xlu1 %1732  ;;  %v1735_v48 = vpop.permute.xlu0 %1734 }
 0x380   : > { %v1832_v22 = vsel %vm828_vm1, %v1800_v42, %v1733_v45  ;;  %v1833_v13 = vsel %vm828_vm1, %v1801_v49, %v1735_v48 }
 0x381   : > { %4608 = vmatprep.mubr.msk.f32.mxu1 %vm868_vm2, %v1832_v22 }
 0x382   : > { %4609 = vmatmul.mubr.msk.f32.gmra.mrb[28].mxu1 %vm868_vm2, %v1833_v13 }
 0x383   : > { %v1562_v35 = vpop.permute.xlu0 %1561 }
 0x384   : > { %v1560_v47 = vpop.permute.xlu1 %1559  ;;  %v1803_v29 = vsel %vm795_vm0, %v6436_v56, %v1562_v35  ;;  %v6583_v56 = vld [vmem:[#allocation10] ss:$0 sm:$0xff] }
 0x385   : > { %v1802_v9 = vsel %vm795_vm0, %v6439_v58, %v1560_v47 }
 0x387   : > { %v1739_v11 = vpop.permute.xlu0 %1738 }
 0x388   : > { %v1737_v34 = vpop.permute.xlu1 %1736  ;;  %v1835_v51 = vsel %vm828_vm1, %v1803_v29, %v1739_v11 }
 0x389   : > { %v1834_v24 = vsel %vm828_vm1, %v1802_v9, %v1737_v34 }
 0x38a   : > { %4611 = vmatprep.mubr.msk.f32.mxu1 %vm868_vm2, %v1834_v24 }
 0x38b   : > { %4612 = vmatmul.mubr.msk.f32.gmra.mrb[30].mxu1 %vm868_vm2, %v1835_v51 }
 0x3e5   : > { %v4568_v58 = vpop.f32.mrb[0].mxu1 }
 0x3e6   : > { %v2165_v16 = vmul.f32 %v4568_v58, %v6583_v56  ;;  %v1998_v31 = vpop.f32.mrb[1].mxu1 }
 0x3e7   : > { %v2164_v15 = vmul.f32 %v6583_v56, %v1998_v31 }
 0x3e8   : > { %v6590_v20 = vadd.f32 %v6585_v30, %v2165_v16 }
 0x3e9   : > { %v6593_v55 = vadd.f32 %v6585_v30, %v2164_v15 }
 0x3ea   : > { %v2236_v3 = vmax.f32 %v6590_v20, 0.0 }
 0x3eb   : > { %v2235_v52 = vmax.f32 %v6593_v55, 0.0 }
 0x3ec   : > { %2304 = vrot.lane.b32.xlu0 %v2236_v3, %s5335_s12 }
 0x3ed   : > { %2302 = vrot.lane.b32.xlu1 %v2235_v52, %s5335_s12  ;;  %v4571_v33 = vpop.f32.mrb[2].mxu1 }
 0x3ee   : > { %v2167_v17 = vmul.f32 %v4571_v33, %v6583_v56  ;;  %v2008_v59 = vpop.f32.mrb[3].mxu1 }
 0x3ef   : > { %v2166_v60 = vmul.f32 %v6583_v56, %v2008_v59 }
 0x3f0   : > { %v6606_v46 = vadd.f32 %v6585_v30, %v2167_v17 }
 0x3f1   : > { %v6609_v61 = vadd.f32 %v6585_v30, %v2166_v60 }
 0x3f2   : > { %v2238_v27 = vmax.f32 %v6606_v46, 0.0 }
 0x3f3   : > { %v2237_v5 = vmax.f32 %v6609_v61, 0.0 }
 0x3f4   : > { %2308 = vrot.lane.b32.xlu0 %v2238_v27, %s5335_s12 }
 0x3f5   : > { %2306 = vrot.lane.b32.xlu1 %v2237_v5, %s5335_s12  ;;  %v4574_v62 = vpop.f32.mrb[4].mxu1 }
 0x3f6   : > { %v2169_v4 = vmul.f32 %v4574_v62, %v6583_v56  ;;  %v2018_v6 = vpop.f32.mrb[5].mxu1 }
 0x3f7   : > { %v2168_v21 = vmul.f32 %v6583_v56, %v2018_v6 }
 0x3f8   : > { %v2208_v18 = vadd.f32 %v6585_v30, %v2169_v4 }
 0x3f9   : > { %v2207_v7 = vadd.f32 %v6585_v30, %v2168_v21 }
 0x3fa   : > { %v6623_v63 = vmax.f32 %v2208_v18, 0.0 }
 0x3fb   : > { %v6625_v8 = vmax.f32 %v2207_v7, 0.0 }
 0x3fc   : > { %2400 = vrot.lane.b32.xlu0 %v6623_v63, %s5334_s2 }
 0x3fd   : > { %2398 = vrot.lane.b32.xlu1 %v6625_v8, %s5334_s2  ;;  %v4577_v36 = vpop.f32.mrb[6].mxu1 }
 0x3fe   : > { %v2171_v44 = vmul.f32 %v4577_v36, %v6583_v56  ;;  %v2028_v23 = vpop.f32.mrb[7].mxu1 }
 0x3ff   : > { %v2170_v43 = vmul.f32 %v6583_v56, %v2028_v23 }
 0x400   : > { %v2210_v12 = vadd.f32 %v6585_v30, %v2171_v44  ;;  %2312 = vrot.lane.b32.xlu0 %v6623_v63, %s5335_s12 }
 0x401   : > { %v2209_v37 = vadd.f32 %v6585_v30, %v2170_v43  ;;  %2310 = vrot.lane.b32.xlu1 %v6625_v8, %s5335_s12 }
 0x402   : > { %v6639_v26 = vmax.f32 %v2210_v12, 0.0 }
 0x403   : > { %v6641_v2 = vmax.f32 %v2209_v37, 0.0 }
 0x404   : > { %2404 = vrot.lane.b32.xlu0 %v6639_v26, %s5334_s2 }
 0x405   : > { %2402 = vrot.lane.b32.xlu1 %v6641_v2, %s5334_s2  ;;  %v4580_v0 = vpop.f32.mrb[8].mxu1 }
 0x406   : > { %v2173_v38 = vmul.f32 %v4580_v0, %v6583_v56  ;;  %v2038_v39 = vpop.f32.mrb[9].mxu1 }
 0x407   : > { %v2172_v32 = vmul.f32 %v6583_v56, %v2038_v39 }
 0x408   : > { %v2212_v19 = vadd.f32 %v6585_v30, %v2173_v38  ;;  %2316 = vrot.lane.b32.xlu0 %v6639_v26, %s5335_s12 }
 0x409   : > { %v2211_v10 = vadd.f32 %v6585_v30, %v2172_v32  ;;  %2314 = vrot.lane.b32.xlu1 %v6641_v2, %s5335_s12 }
 0x40a   : > { %v6655_v1 = vmax.f32 %v2212_v19, 0.0 }
 0x40b   : > { %v6657_v57 = vmax.f32 %v2211_v10, 0.0 }
 0x40c   : > { %2408 = vrot.lane.b32.xlu0 %v6655_v1, %s5334_s2 }
 0x40d   : > { %2406 = vrot.lane.b32.xlu1 %v6657_v57, %s5334_s2  ;;  %v4583_v40 = vpop.f32.mrb[10].mxu1 }
 0x40e   : > { %v2175_v25 = vmul.f32 %v4583_v40, %v6583_v56  ;;  %v2048_v41 = vpop.f32.mrb[11].mxu1 }
 0x40f   : > { %v2174_v42 = vmul.f32 %v6583_v56, %v2048_v41 }
 0x410   : > { %v2214_v49 = vadd.f32 %v6585_v30, %v2175_v25  ;;  %2320 = vrot.lane.b32.xlu0 %v6655_v1, %s5335_s12 }
 0x411   : > { %v2213_v45 = vadd.f32 %v6585_v30, %v2174_v42  ;;  %2318 = vrot.lane.b32.xlu1 %v6657_v57, %s5335_s12 }
 0x412   : > { %v6671_v48 = vmax.f32 %v2214_v49, 0.0 }
 0x413   : > { %v6673_v22 = vmax.f32 %v2213_v45, 0.0 }
 0x414   : > { %2412 = vrot.lane.b32.xlu0 %v6671_v48, %s5334_s2 }
 0x415   : > { %2410 = vrot.lane.b32.xlu1 %v6673_v22, %s5334_s2  ;;  %v4586_v13 = vpop.f32.mrb[12].mxu1 }
 0x416   : > { %v2177_v35 = vmul.f32 %v4586_v13, %v6583_v56  ;;  %v2058_v47 = vpop.f32.mrb[13].mxu1 }
 0x417   : > { %v2176_v29 = vmul.f32 %v6583_v56, %v2058_v47 }
 0x418   : > { %v2216_v11 = vadd.f32 %v6585_v30, %v2177_v35  ;;  %2324 = vrot.lane.b32.xlu0 %v6671_v48, %s5335_s12 }
 0x419   : > { %v2215_v9 = vadd.f32 %v6585_v30, %v2176_v29  ;;  %2322 = vrot.lane.b32.xlu1 %v6673_v22, %s5335_s12 }
 0x41a   : > { %v6687_v34 = vmax.f32 %v2216_v11, 0.0 }
 0x41b   : > { %v6689_v51 = vmax.f32 %v2215_v9, 0.0 }
 0x41c   : > { %2416 = vrot.lane.b32.xlu0 %v6687_v34, %s5334_s2 }
 0x41d   : > { %2414 = vrot.lane.b32.xlu1 %v6689_v51, %s5334_s2  ;;  %v4589_v24 = vpop.f32.mrb[14].mxu1 }
 0x41e   : > { %v2179_v50 = vmul.f32 %v4589_v24, %v6583_v56  ;;  %v2068_v14 = vpop.f32.mrb[15].mxu1 }
 0x41f   : > { %v2178_v28 = vmul.f32 %v6583_v56, %v2068_v14 }
 0x420   : > { %v2218_v53 = vadd.f32 %v6585_v30, %v2179_v50  ;;  %2328 = vrot.lane.b32.xlu0 %v6687_v34, %s5335_s12 }
 0x421   : > { %v2217_v58 = vadd.f32 %v6585_v30, %v2178_v28  ;;  %2326 = vrot.lane.b32.xlu1 %v6689_v51, %s5335_s12 }
 0x422   : > { %v6703_v16 = vmax.f32 %v2218_v53, 0.0 }
 0x423   : > { %v6705_v31 = vmax.f32 %v2217_v58, 0.0 }
 0x424   : > { %2420 = vrot.lane.b32.xlu0 %v6703_v16, %s5334_s2 }
 0x425   : > { %2418 = vrot.lane.b32.xlu1 %v6705_v31, %s5334_s2  ;;  %v4592_v15 = vpop.f32.mrb[16].mxu1 }
 0x426   : > { %v2181_v33 = vmul.f32 %v4592_v15, %v6583_v56  ;;  %v2078_v17 = vpop.f32.mrb[17].mxu1 }
 0x427   : > { %v2180_v59 = vmul.f32 %v6583_v56, %v2078_v17 }
 0x428   : > { %v2220_v60 = vadd.f32 %v6585_v30, %v2181_v33  ;;  %2332 = vrot.lane.b32.xlu0 %v6703_v16, %s5335_s12 }
 0x429   : > { %v2219_v62 = vadd.f32 %v6585_v30, %v2180_v59  ;;  %2330 = vrot.lane.b32.xlu1 %v6705_v31, %s5335_s12 }
 0x42a   : > { %v6719_v4 = vmax.f32 %v2220_v60, 0.0 }
 0x42b   : > { %v6721_v6 = vmax.f32 %v2219_v62, 0.0 }
 0x42c   : > { %2424 = vrot.lane.b32.xlu0 %v6719_v4, %s5334_s2 }
 0x42d   : > { %2422 = vrot.lane.b32.xlu1 %v6721_v6, %s5334_s2  ;;  %v4595_v21 = vpop.f32.mrb[18].mxu1 }
 0x42e   : > { %v2183_v18 = vmul.f32 %v4595_v21, %v6583_v56  ;;  %v2088_v7 = vpop.f32.mrb[19].mxu1 }
 0x42f   : > { %v2182_v36 = vmul.f32 %v6583_v56, %v2088_v7 }
 0x430   : > { %v2222_v44 = vadd.f32 %v6585_v30, %v2183_v18  ;;  %2336 = vrot.lane.b32.xlu0 %v6719_v4, %s5335_s12 }
 0x431   : > { %v2221_v23 = vadd.f32 %v6585_v30, %v2182_v36  ;;  %2334 = vrot.lane.b32.xlu1 %v6721_v6, %s5335_s12 }
 0x432   : > { %v6735_v43 = vmax.f32 %v2222_v44, 0.0 }
 0x433   : > { %v6737_v12 = vmax.f32 %v2221_v23, 0.0 }
 0x434   : > { %2428 = vrot.lane.b32.xlu0 %v6735_v43, %s5334_s2 }
 0x435   : > { %2426 = vrot.lane.b32.xlu1 %v6737_v12, %s5334_s2  ;;  %v4598_v37 = vpop.f32.mrb[20].mxu1 }
 0x436   : > { %v2185_v0 = vmul.f32 %v4598_v37, %v6583_v56  ;;  %v2098_v38 = vpop.f32.mrb[21].mxu1 }
 0x437   : > { %v2184_v39 = vmul.f32 %v6583_v56, %v2098_v38 }
 0x438   : > { %v2224_v32 = vadd.f32 %v6585_v30, %v2185_v0  ;;  %2340 = vrot.lane.b32.xlu0 %v6735_v43, %s5335_s12 }
 0x439   : > { %v2223_v19 = vadd.f32 %v6585_v30, %v2184_v39  ;;  %2338 = vrot.lane.b32.xlu1 %v6737_v12, %s5335_s12 }
 0x43a   : > { %v6751_v10 = vmax.f32 %v2224_v32, 0.0 }
 0x43b   : > { %v6753_v40 = vmax.f32 %v2223_v19, 0.0 }
 0x43c   : > { %2432 = vrot.lane.b32.xlu0 %v6751_v10, %s5334_s2 }
 0x43d   : > { %2430 = vrot.lane.b32.xlu1 %v6753_v40, %s5334_s2  ;;  %v4601_v25 = vpop.f32.mrb[22].mxu1 }
 0x43e   : > { %v2187_v41 = vmul.f32 %v4601_v25, %v6583_v56  ;;  %v2108_v42 = vpop.f32.mrb[23].mxu1 }
 0x43f   : > { %v2186_v49 = vmul.f32 %v6583_v56, %v2108_v42 }
 0x440   : > { %v2226_v45 = vadd.f32 %v6585_v30, %v2187_v41  ;;  %2344 = vrot.lane.b32.xlu0 %v6751_v10, %s5335_s12 }
 0x441   : > { %v2225_v13 = vadd.f32 %v6585_v30, %v2186_v49  ;;  %2342 = vrot.lane.b32.xlu1 %v6753_v40, %s5335_s12 }
 0x442   : > { %v6767_v35 = vmax.f32 %v2226_v45, 0.0 }
 0x443   : > { %v6769_v47 = vmax.f32 %v2225_v13, 0.0 }
 0x444   : > { %2436 = vrot.lane.b32.xlu0 %v6767_v35, %s5334_s2 }
 0x445   : > { %2434 = vrot.lane.b32.xlu1 %v6769_v47, %s5334_s2  ;;  %v4604_v29 = vpop.f32.mrb[24].mxu1 }
 0x446   : > { %v2189_v11 = vmul.f32 %v4604_v29, %v6583_v56  ;;  %v2118_v9 = vpop.f32.mrb[25].mxu1 }
 0x447   : > { %v2188_v24 = vmul.f32 %v6583_v56, %v2118_v9 }
 0x448   : > { %v2228_v50 = vadd.f32 %v6585_v30, %v2189_v11  ;;  %2348 = vrot.lane.b32.xlu0 %v6767_v35, %s5335_s12 }
 0x449   : > { %v2227_v14 = vadd.f32 %v6585_v30, %v2188_v24  ;;  %2346 = vrot.lane.b32.xlu1 %v6769_v47, %s5335_s12 }
 0x44a   : > { %v6783_v28 = vmax.f32 %v2228_v50, 0.0 }
 0x44b   : > { %v6785_v53 = vmax.f32 %v2227_v14, 0.0 }
 0x44c   : > { %2440 = vrot.lane.b32.xlu0 %v6783_v28, %s5334_s2 }
 0x44d   : > { %2438 = vrot.lane.b32.xlu1 %v6785_v53, %s5334_s2  ;;  %v4607_v58 = vpop.f32.mrb[26].mxu1 }
 0x44e   : > { %v2191_v15 = vmul.f32 %v4607_v58, %v6583_v56  ;;  %v2128_v33 = vpop.f32.mrb[27].mxu1 }
 0x44f   : > { %v2190_v17 = vmul.f32 %v6583_v56, %v2128_v33 }
 0x450   : > { %v2230_v59 = vadd.f32 %v6585_v30, %v2191_v15  ;;  %2352 = vrot.lane.b32.xlu0 %v6783_v28, %s5335_s12 }
 0x451   : > { %v2229_v60 = vadd.f32 %v6585_v30, %v2190_v17  ;;  %2350 = vrot.lane.b32.xlu1 %v6785_v53, %s5335_s12 }
 0x452   : > { %v6799_v62 = vmax.f32 %v2230_v59, 0.0 }
 0x453   : > { %v6801_v21 = vmax.f32 %v2229_v60, 0.0 }
 0x454   : > { %2444 = vrot.lane.b32.xlu0 %v6799_v62, %s5334_s2 }
 0x455   : > { %2442 = vrot.lane.b32.xlu1 %v6801_v21, %s5334_s2  ;;  %v4610_v18 = vpop.f32.mrb[28].mxu1 }
 0x456   : > { %v2193_v7 = vmul.f32 %v4610_v18, %v6583_v56  ;;  %v2138_v36 = vpop.f32.mrb[29].mxu1 }
 0x457   : > { %v2192_v44 = vmul.f32 %v6583_v56, %v2138_v36 }
 0x458   : > { %v2232_v23 = vadd.f32 %v6585_v30, %v2193_v7  ;;  %2356 = vrot.lane.b32.xlu0 %v6799_v62, %s5335_s12 }
 0x459   : > { %v2231_v37 = vadd.f32 %v6585_v30, %v2192_v44  ;;  %2354 = vrot.lane.b32.xlu1 %v6801_v21, %s5335_s12 }
 0x45a   : > { %v2264_v0 = vmax.f32 %v2232_v23, 0.0 }
 0x45b   : > { %v2263_v38 = vmax.f32 %v2231_v37, 0.0 }
 0x45c   : > { %2448 = vrot.lane.b32.xlu0 %v2264_v0, %s5334_s2 }
 0x45d   : > { %2446 = vrot.lane.b32.xlu1 %v2263_v38, %s5334_s2 }
 0x45e   : > { %v4613_v39 = vpop.f32.mrb[30].mxu1  ;;  %v2305_v13 = vpop.permute.xlu0 %2304 }
 0x45f   : > { %v2195_v32 = vmul.f32 %v4613_v39, %v6583_v56  ;;  %v2148_v19 = vpop.f32.mrb[31].mxu1  ;;  %v2303_v29 = vpop.permute.xlu1 %2302  ;;  %v2483_v50 = vsel %vm795_vm0, 0.0, %v2305_v13 }
 0x460   : > { %v2194_v25 = vmul.f32 %v6583_v56, %v2148_v19 }
 0x461   : > { %v2234_v41 = vadd.f32 %v6585_v30, %v2195_v32 }
 0x462   : > { %v2233_v42 = vadd.f32 %v6585_v30, %v2194_v25  ;;  %v2482_v30 = vsel %vm795_vm0, 0.0, %v2303_v29 }
 0x463   : > { %v2266_v49 = vmax.f32 %v2234_v41, 0.0 }
 0x464   : > { %v2265_v45 = vmax.f32 %v2233_v42, 0.0 }
 0x465   : > { %2452 = vrot.lane.b32.xlu0 %v2266_v49, %s5334_s2 }
 0x466   : > { %2450 = vrot.lane.b32.xlu1 %v2265_v45, %s5334_s2  ;;  %v2309_v11 = vpop.permute.xlu0 %2308 }
 0x467   : > { %v2307_v9 = vpop.permute.xlu1 %2306  ;;  %v2485_v18 = vsel %vm795_vm0, 0.0, %v2309_v11 }
 0x468   : > { %v2484_v59 = vsel %vm795_vm0, 0.0, %v2307_v9 }
 0x469   : > { %2360 = vrot.lane.b32.xlu0 %v2264_v0, %s5335_s12 }
 0x46a   : > { %2358 = vrot.lane.b32.xlu1 %v2263_v38, %s5335_s12 }
 0x46d   : > { %2364 = vrot.lane.b32.xlu0 %v2266_v49, %s5335_s12 }
 0x46e   : > { %2362 = vrot.lane.b32.xlu1 %v2265_v45, %s5335_s12  ;;  %v2401_v56 = vpop.permute.xlu0 %2400 }
 0x46f   : > { %v2399_v24 = vpop.permute.xlu1 %2398  ;;  %v2515_v58 = vsel %vm828_vm1, %v2483_v50, %v2401_v56 }
 0x470   : > { %v2514_v14 = vsel %vm828_vm1, %v2482_v30, %v2399_v24 }
 0x471   : > { %4620 = vmatprep.mubr.msk.f32.mxu0 %vm868_vm2, %v2514_v14 }
 0x472   : > { %4621 = vmatmul.mubr.msk.f32.vlgmr.msra.gmra.mrb[32].mxu0 %vm868_vm2, %v2515_v58  ;;  %v2313_v15 = vpop.permute.xlu0 %2312 }
 0x473   : > { %v2311_v33 = vpop.permute.xlu1 %2310  ;;  %v2487_v39 = vsel %vm795_vm0, %v2236_v3, %v2313_v15 }
 0x474   : > { %v2486_v0 = vsel %vm795_vm0, %v2235_v52, %v2311_v33 }
 0x476   : > { %v2405_v17 = vpop.permute.xlu0 %2404 }
 0x477   : > { %v2403_v60 = vpop.permute.xlu1 %2402  ;;  %v2517_v36 = vsel %vm828_vm1, %v2485_v18, %v2405_v17 }
 0x478   : > { %v2516_v7 = vsel %vm828_vm1, %v2484_v59, %v2403_v60 }
 0x479   : > { %4623 = vmatprep.mubr.msk.f32.mxu0 %vm868_vm2, %v2516_v7 }
 0x47a   : > { %4624 = vmatmul.mubr.msk.f32.gmra.mrb[34].mxu0 %vm868_vm2, %v2517_v36  ;;  %v2317_v44 = vpop.permute.xlu0 %2316 }
 0x47b   : > { %v2315_v23 = vpop.permute.xlu1 %2314  ;;  %v2489_v20 = vsel %vm795_vm0, %v2238_v27, %v2317_v44 }
 0x47c   : > { %v2488_v55 = vsel %vm795_vm0, %v2237_v5, %v2315_v23 }
 0x47e   : > { %v2409_v37 = vpop.permute.xlu0 %2408 }
 0x47f   : > { %v2407_v38 = vpop.permute.xlu1 %2406  ;;  %v2519_v19 = vsel %vm828_vm1, %v2487_v39, %v2409_v37 }
 0x480   : > { %v2518_v32 = vsel %vm828_vm1, %v2486_v0, %v2407_v38 }
 0x481   : > { %4626 = vmatprep.mubr.msk.f32.mxu0 %vm868_vm2, %v2518_v32 }
 0x482   : > { %4627 = vmatmul.mubr.msk.f32.gmra.mrb[36].mxu0 %vm868_vm2, %v2519_v19  ;;  %v2321_v25 = vpop.permute.xlu0 %2320 }
 0x483   : > { %v2319_v41 = vpop.permute.xlu1 %2318  ;;  %v2491_v46 = vsel %vm795_vm0, %v6623_v63, %v2321_v25 }
 0x484   : > { %v2490_v61 = vsel %vm795_vm0, %v6625_v8, %v2319_v41 }
 0x486   : > { %v2413_v42 = vpop.permute.xlu0 %2412 }
 0x487   : > { %v2411_v52 = vpop.permute.xlu1 %2410  ;;  %v2521_v49 = vsel %vm828_vm1, %v2489_v20, %v2413_v42 }
 0x488   : > { %v2520_v3 = vsel %vm828_vm1, %v2488_v55, %v2411_v52 }
 0x489   : > { %4629 = vmatprep.mubr.msk.f32.mxu0 %vm868_vm2, %v2520_v3 }
 0x48a   : > { %4630 = vmatmul.mubr.msk.f32.gmra.mrb[38].mxu0 %vm868_vm2, %v2521_v49  ;;  %v2325_v45 = vpop.permute.xlu0 %2324 }
 0x48b   : > { %v2323_v13 = vpop.permute.xlu1 %2322  ;;  %v2493_v8 = vsel %vm795_vm0, %v6639_v26, %v2325_v45 }
 0x48c   : > { %v2492_v24 = vsel %vm795_vm0, %v6641_v2, %v2323_v13 }
 0x48e   : > { %v2417_v29 = vpop.permute.xlu0 %2416 }
 0x48f   : > { %v2415_v5 = vpop.permute.xlu1 %2414  ;;  %v2523_v11 = vsel %vm828_vm1, %v2491_v46, %v2417_v29 }
 0x490   : > { %v2522_v27 = vsel %vm828_vm1, %v2490_v61, %v2415_v5 }
 0x491   : > { %4632 = vmatprep.mubr.msk.f32.mxu0 %vm868_vm2, %v2522_v27 }
 0x492   : > { %4633 = vmatmul.mubr.msk.f32.gmra.mrb[40].mxu0 %vm868_vm2, %v2523_v11  ;;  %v2329_v9 = vpop.permute.xlu0 %2328 }
 0x493   : > { %v2327_v56 = vpop.permute.xlu1 %2326  ;;  %v2495_v2 = vsel %vm795_vm0, %v6655_v1, %v2329_v9 }
 0x494   : > { %v2494_v17 = vsel %vm795_vm0, %v6657_v57, %v2327_v56 }
 0x496   : > { %v2421_v30 = vpop.permute.xlu0 %2420 }
 0x497   : > { %v2419_v50 = vpop.permute.xlu1 %2418  ;;  %v2525_v14 = vsel %vm828_vm1, %v2493_v8, %v2421_v30 }
 0x498   : > { %v2524_v63 = vsel %vm828_vm1, %v2492_v24, %v2419_v50 }
 0x499   : > { %4635 = vmatprep.mubr.msk.f32.mxu0 %vm868_vm2, %v2524_v63 }
 0x49a   : > { %4636 = vmatmul.mubr.msk.f32.gmra.mrb[42].mxu0 %vm868_vm2, %v2525_v14  ;;  %v2333_v58 = vpop.permute.xlu0 %2332 }
 0x49b   : > { %v2331_v15 = vpop.permute.xlu1 %2330  ;;  %v2497_v57 = vsel %vm795_vm0, %v6671_v48, %v2333_v58 }
 0x49c   : > { %v2496_v44 = vsel %vm795_vm0, %v6673_v22, %v2331_v15 }
 0x49e   : > { %v2425_v33 = vpop.permute.xlu0 %2424 }
 0x49f   : > { %v2423_v59 = vpop.permute.xlu1 %2422  ;;  %v2527_v60 = vsel %vm828_vm1, %v2495_v2, %v2425_v33 }
 0x4a0   : > { %v2526_v26 = vsel %vm828_vm1, %v2494_v17, %v2423_v59 }
 0x4a1   : > { %4638 = vmatprep.mubr.msk.f32.mxu0 %vm868_vm2, %v2526_v26 }
 0x4a2   : > { %4639 = vmatmul.mubr.msk.f32.gmra.mrb[44].mxu0 %vm868_vm2, %v2527_v60  ;;  %v2337_v18 = vpop.permute.xlu0 %2336 }
 0x4a3   : > { %v2335_v7 = vpop.permute.xlu1 %2334  ;;  %v2499_v22 = vsel %vm795_vm0, %v6687_v34, %v2337_v18 }
 0x4a4   : > { %v2498_v32 = vsel %vm795_vm0, %v6689_v51, %v2335_v7 }
 0x4a6   : > { %v2429_v36 = vpop.permute.xlu0 %2428 }
 0x4a7   : > { %v2427_v23 = vpop.permute.xlu1 %2426  ;;  %v2529_v37 = vsel %vm828_vm1, %v2497_v57, %v2429_v36  ;;  %v6959_v57 = vld [vmem:[#allocation14] ss:$0 sm:$0xff] }
 0x4a8   : > { %v2528_v1 = vsel %vm828_vm1, %v2496_v44, %v2427_v23 }
 0x4a9   : > { %4641 = vmatprep.mubr.msk.f32.mxu0 %vm868_vm2, %v2528_v1  ;;  %v2906_v1 = vld [vmem:[#allocation16] sm:$0xff] }
 0x4aa   : > { %4642 = vmatmul.mubr.msk.f32.gmra.mrb[46].mxu0 %vm868_vm2, %v2529_v37  ;;  %v2341_v0 = vpop.permute.xlu0 %2340 }
 0x4ab   : > { %v2339_v38 = vpop.permute.xlu1 %2338  ;;  %v2501_v51 = vsel %vm795_vm0, %v6703_v16, %v2341_v0 }
 0x4ac   : > { %v2500_v52 = vsel %vm795_vm0, %v6705_v31, %v2339_v38 }
 0x4ae   : > { %v2433_v39 = vpop.permute.xlu0 %2432 }
 0x4af   : > { %v2431_v19 = vpop.permute.xlu1 %2430  ;;  %v2531_v25 = vsel %vm828_vm1, %v2499_v22, %v2433_v39 }
 0x4b0   : > { %v2530_v48 = vsel %vm828_vm1, %v2498_v32, %v2431_v19  ;;  %v2908_v19 = vld [vmem:[#allocation16 + $0x10] sm:$0xff] }
 0x4b1   : > { %4644 = vmatprep.mubr.msk.f32.mxu0 %vm868_vm2, %v2530_v48 }
 0x4b2   : > { %4645 = vmatmul.mubr.msk.f32.gmra.mrb[48].mxu0 %vm868_vm2, %v2531_v25  ;;  %v2345_v41 = vpop.permute.xlu0 %2344 }
 0x4b3   : > { %v2343_v42 = vpop.permute.xlu1 %2342  ;;  %v2503_v31 = vsel %vm795_vm0, %v6719_v4, %v2345_v41 }
 0x4b4   : > { %v2502_v29 = vsel %vm795_vm0, %v6721_v6, %v2343_v42 }
 0x4b6   : > { %v2437_v55 = vpop.permute.xlu0 %2436 }
 0x4b7   : > { %v2435_v20 = vpop.permute.xlu1 %2434  ;;  %v2533_v3 = vsel %vm828_vm1, %v2501_v51, %v2437_v55 }
 0x4b8   : > { %v2532_v34 = vsel %vm828_vm1, %v2500_v52, %v2435_v20 }
 0x4b9   : > { %4647 = vmatprep.mubr.msk.f32.mxu0 %vm868_vm2, %v2532_v34 }
 0x4ba   : > { %4648 = vmatmul.mubr.msk.f32.gmra.mrb[50].mxu0 %vm868_vm2, %v2533_v3  ;;  %v2349_v49 = vpop.permute.xlu0 %2348 }
 0x4bb   : > { %v2347_v45 = vpop.permute.xlu1 %2346  ;;  %v2505_v6 = vsel %vm795_vm0, %v6735_v43, %v2349_v49 }
 0x4bc   : > { %v2504_v9 = vsel %vm795_vm0, %v6737_v12, %v2347_v45 }
 0x4be   : > { %v2441_v13 = vpop.permute.xlu0 %2440 }
 0x4bf   : > { %v2439_v61 = vpop.permute.xlu1 %2438  ;;  %v2535_v5 = vsel %vm828_vm1, %v2503_v31, %v2441_v13 }
 0x4c0   : > { %v2534_v16 = vsel %vm828_vm1, %v2502_v29, %v2439_v61 }
 0x4c1   : > { %4650 = vmatprep.mubr.msk.f32.mxu0 %vm868_vm2, %v2534_v16 }
 0x4c2   : > { %4651 = vmatmul.mubr.msk.f32.gmra.mrb[52].mxu0 %vm868_vm2, %v2535_v5  ;;  %v2353_v46 = vpop.permute.xlu0 %2352 }
 0x4c3   : > { %v2351_v27 = vpop.permute.xlu1 %2350  ;;  %v2507_v12 = vsel %vm795_vm0, %v6751_v10, %v2353_v46 }
 0x4c4   : > { %v2506_v63 = vsel %vm795_vm0, %v6753_v40, %v2351_v27 }
 0x4c6   : > { %v2445_v11 = vpop.permute.xlu0 %2444 }
 0x4c7   : > { %v2443_v56 = vpop.permute.xlu1 %2442  ;;  %v2537_v30 = vsel %vm828_vm1, %v2505_v6, %v2445_v11 }
 0x4c8   : > { %v2536_v4 = vsel %vm828_vm1, %v2504_v9, %v2443_v56 }
 0x4c9   : > { %4653 = vmatprep.mubr.msk.f32.mxu0 %vm868_vm2, %v2536_v4 }
 0x4ca   : > { %4654 = vmatmul.mubr.msk.f32.gmra.mrb[54].mxu0 %vm868_vm2, %v2537_v30  ;;  %v2357_v24 = vpop.permute.xlu0 %2356 }
 0x4cb   : > { %v2355_v50 = vpop.permute.xlu1 %2354  ;;  %v2509_v40 = vsel %vm795_vm0, %v6767_v35, %v2357_v24 }
 0x4cc   : > { %v2508_v33 = vsel %vm795_vm0, %v6769_v47, %v2355_v50 }
 0x4ce   : > { %v2449_v8 = vpop.permute.xlu0 %2448 }
 0x4cf   : > { %v2447_v14 = vpop.permute.xlu1 %2446  ;;  %v2539_v58 = vsel %vm828_vm1, %v2507_v12, %v2449_v8 }
 0x4d0   : > { %v2538_v43 = vsel %vm828_vm1, %v2506_v63, %v2447_v14 }
 0x4d1   : > { %4656 = vmatprep.mubr.msk.f32.mxu0 %vm868_vm2, %v2538_v43 }
 0x4d2   : > { %4657 = vmatmul.mubr.msk.f32.gmra.mrb[56].mxu0 %vm868_vm2, %v2539_v58 }
 0x4d7   : > { %v2453_v15 = vpop.permute.xlu0 %2452 }
 0x4d8   : > { %v2451_v17 = vpop.permute.xlu1 %2450  ;;  %v2541_v10 = vsel %vm828_vm1, %v2509_v40, %v2453_v15 }
 0x4d9   : > { %v2540_v59 = vsel %vm828_vm1, %v2508_v33, %v2451_v17 }
 0x4da   : > { %4659 = vmatprep.mubr.msk.f32.mxu0 %vm868_vm2, %v2540_v59 }
 0x4db   : > { %4660 = vmatmul.mubr.msk.f32.gmra.mrb[58].mxu0 %vm868_vm2, %v2541_v10  ;;  %v2361_v2 = vpop.permute.xlu0 %2360 }
 0x4dc   : > { %v2511_v26 = vsel %vm795_vm0, %v6783_v28, %v2361_v2  ;;  %v2359_v60 = vpop.permute.xlu1 %2358 }
 0x4dd   : > { %v2510_v47 = vsel %vm795_vm0, %v6785_v53, %v2359_v60  ;;  %v2543_v7 = vsel %vm828_vm1, %v2511_v26, %v6109_v54 }
 0x4de   : > { %v2542_v18 = vsel %vm828_vm1, %v2510_v47, %v6109_v54 }
 0x4df   : > { %4662 = vmatprep.mubr.msk.f32.mxu0 %vm868_vm2, %v2542_v18  ;;  %v2365_v35 = vpop.permute.xlu0 %2364 }
 0x4e0   : > { %v2513_v36 = vsel %vm795_vm0, %v6799_v62, %v2365_v35  ;;  %v2363_v44 = vpop.permute.xlu1 %2362  ;;  %4663 = vmatmul.mubr.msk.f32.gmra.mrb[60].mxu0 %vm868_vm2, %v2543_v7  ;;  %v2907_v62 = vld [vmem:[#allocation16 + $0x8] sm:$0xff] }
 0x4e1   : > { %v2512_v28 = vsel %vm795_vm0, %v6801_v21, %v2363_v44  ;;  %v2545_v23 = vsel %vm828_vm1, %v2513_v36, %v6109_v54  ;;  %v4734_v0 = vpack.c.bf16 %v2907_v62, %v2906_v1 }
 0x4e2   : > { %v2544_v53 = vsel %vm828_vm1, %v2512_v28, %v6109_v54 }
 0x4e3   : > { %4665 = vmatprep.mubr.msk.f32.mxu0 %vm868_vm2, %v2544_v53  ;;  %4735 = vmatprep.subr.bf16.mxu1 %v4734_v0 }
 0x4e4   : > { %4666 = vmatmul.mubr.msk.f32.gmra.mrb[62].mxu0 %vm868_vm2, %v2545_v23  ;;  %4737 = vmatpush3.bf16.msra.mxu1 %v4734_v0 }
 0x4e5   : > { %4672 = vmatprep.subr.mxu1 %v2908_v19 }
 0x4e8   : > { %4673 = vmatpush3.msra.mxu1 %v2908_v19 }
 0x545   : > { %v4622_v37 = vpop.f32.mrb[32].mxu0 }
 0x546   : > { %v2721_v38 = vadd.f32 %v4622_v37, %v6959_v57  ;;  %v2715_v39 = vpop.f32.mrb[33].mxu0 }
 0x547   : > { %v2716_v21 = vadd.f32 %v6959_v57, %v2715_v39 }
 0x548   : > { %v2875_v32 = vmax.f32 %v2721_v38, 0.0 }
 0x549   : > { %v2874_v22 = vmax.f32 %v2716_v21, 0.0 }
 0x54a   : > { %v2943_v54 = vrot.slane %v2875_v32, 6 }
 0x54b   : > { %v2942_v48 = vrot.slane %v2874_v22, 6 }
 0x54c   : > { %v3054_v25 = vsel %vm2941_vm6, %v2943_v54, 0.0 }
 0x54d   : > { %v3105_v41 = vrot.slane %v3054_v25, 2  ;;  %v6965_v42 = vsel %vm2941_vm6, %v2942_v48, %v2943_v54  ;;  %v6968_v55 = vsel %vm2941_vm6, 0.0, %v2942_v48  ;;  %v4625_v52 = vpop.f32.mrb[34].mxu0  ;;  %v3282_v49 = vrot.slane %v3054_v25, 4 }
 0x54e   : > { %v3102_v20 = vrot.slane %v6968_v55, 2  ;;  %v2731_v51 = vadd.f32 %v4625_v52, %v6959_v57  ;;  %v2725_v34 = vpop.f32.mrb[35].mxu0  ;;  %v3103_v3 = vrot.slane %v6965_v42, 2  ;;  %v3279_v45 = vrot.slane %v6968_v55, 4 }
 0x54f   : > { %v2726_v13 = vadd.f32 %v6959_v57, %v2725_v34  ;;  %v3280_v16 = vrot.slane %v6965_v42, 4 }
 0x550   : > { %v2877_v29 = vmax.f32 %v2731_v51, 0.0  ;;  %v3106_v61 = vsel %vm1595_vm5, %v3103_v3, %v3105_v41  ;;  %v3104_v31 = vsel %vm1595_vm5, %v3102_v20, %v3103_v3 }
 0x551   : > { %v2876_v5 = vmax.f32 %v2726_v13, 0.0  ;;  %3184 = vrot.lane.b32.xlu0 %v3106_v61, %s5335_s12  ;;  %3182 = vrot.lane.b32.xlu1 %v3104_v31, %s5335_s12  ;;  %v3283_v9 = vsel %vm3278_vm7, %v3280_v16, %v3282_v49  ;;  %v3281_v56 = vsel %vm3278_vm7, %v3279_v45, %v3280_v16 }
 0x552   : > { %v2946_v46 = vrot.slane %v2877_v29, 6 }
 0x553   : > { %v2945_v27 = vrot.slane %v2876_v5, 6 }
 0x554   : > { %v3055_v11 = vsel %vm2941_vm6, %v2946_v46, 0.0 }
 0x555   : > { %v3110_v6 = vrot.slane %v3055_v11, 2  ;;  %v6984_v4 = vsel %vm2941_vm6, %v2945_v27, %v2946_v46  ;;  %v6987_v30 = vsel %vm2941_vm6, 0.0, %v2945_v27  ;;  %3361 = vrot.lane.b32.xlu0 %v3283_v9, %s5334_s2  ;;  %3359 = vrot.lane.b32.xlu1 %v3281_v56, %s5334_s2  ;;  %v4628_v24 = vpop.f32.mrb[36].mxu0  ;;  %v3287_v12 = vrot.slane %v3055_v11, 4 }
 0x556   : > { %v3107_v50 = vrot.slane %v6987_v30, 2  ;;  %v2741_v8 = vadd.f32 %v4628_v24, %v6959_v57  ;;  %v2735_v63 = vpop.f32.mrb[37].mxu0  ;;  %v3108_v14 = vrot.slane %v6984_v4, 2  ;;  %v3284_v43 = vrot.slane %v6987_v30, 4 }
 0x557   : > { %v2736_v58 = vadd.f32 %v6959_v57, %v2735_v63  ;;  %v3285_v40 = vrot.slane %v6984_v4, 4 }
 0x558   : > { %v2879_v15 = vmax.f32 %v2741_v8, 0.0  ;;  %v3111_v33 = vsel %vm1595_vm5, %v3108_v14, %v3110_v6  ;;  %v3109_v17 = vsel %vm1595_vm5, %v3107_v50, %v3108_v14 }
 0x559   : > { %v2878_v59 = vmax.f32 %v2736_v58, 0.0  ;;  %3188 = vrot.lane.b32.xlu0 %v3111_v33, %s5335_s12  ;;  %3186 = vrot.lane.b32.xlu1 %v3109_v17, %s5335_s12  ;;  %v3288_v60 = vsel %vm3278_vm7, %v3285_v40, %v3287_v12  ;;  %v3286_v47 = vsel %vm3278_vm7, %v3284_v43, %v3285_v40 }
 0x55a   : > { %v2949_v10 = vrot.slane %v2879_v15, 6 }
 0x55b   : > { %v2948_v2 = vrot.slane %v2878_v59, 6 }
 0x55c   : > { %v3056_v26 = vsel %vm2941_vm6, %v2949_v10, 0.0 }
 0x55d   : > { %v3115_v18 = vrot.slane %v3056_v26, 2  ;;  %v7005_v35 = vsel %vm2941_vm6, %v2948_v2, %v2949_v10  ;;  %v7008_v7 = vsel %vm2941_vm6, 0.0, %v2948_v2  ;;  %3365 = vrot.lane.b32.xlu0 %v3288_v60, %s5334_s2  ;;  %3363 = vrot.lane.b32.xlu1 %v3286_v47, %s5334_s2  ;;  %v4631_v36 = vpop.f32.mrb[38].mxu0  ;;  %v3292_v1 = vrot.slane %v3056_v26, 4 }
 0x55e   : > { %v3112_v44 = vrot.slane %v7008_v7, 2  ;;  %v2751_v28 = vadd.f32 %v4631_v36, %v6959_v57  ;;  %v2745_v53 = vpop.f32.mrb[39].mxu0  ;;  %v3113_v23 = vrot.slane %v7005_v35, 2  ;;  %v3289_v62 = vrot.slane %v7008_v7, 4 }
 0x55f   : > { %v2746_v37 = vadd.f32 %v6959_v57, %v2745_v53  ;;  %v3290_v21 = vrot.slane %v7005_v35, 4 }
 0x560   : > { %v2881_v0 = vmax.f32 %v2751_v28, 0.0  ;;  %v3116_v38 = vsel %vm1595_vm5, %v3113_v23, %v3115_v18  ;;  %v3114_v39 = vsel %vm1595_vm5, %v3112_v44, %v3113_v23 }
 0x561   : > { %v2880_v32 = vmax.f32 %v2746_v37, 0.0  ;;  %3192 = vrot.lane.b32.xlu0 %v3116_v38, %s5335_s12  ;;  %3190 = vrot.lane.b32.xlu1 %v3114_v39, %s5335_s12  ;;  %v3293_v48 = vsel %vm3278_vm7, %v3290_v21, %v3292_v1  ;;  %v3291_v25 = vsel %vm3278_vm7, %v3289_v62, %v3290_v21 }
 0x562   : > { %v2952_v19 = vrot.slane %v2881_v0, 6 }
 0x563   : > { %v2951_v22 = vrot.slane %v2880_v32, 6 }
 0x564   : > { %v3057_v54 = vsel %vm2941_vm6, %v2952_v19, 0.0 }
 0x565   : > { %v3120_v41 = vrot.slane %v3057_v54, 2  ;;  %v7026_v52 = vsel %vm2941_vm6, %v2951_v22, %v2952_v19  ;;  %v7029_v20 = vsel %vm2941_vm6, 0.0, %v2951_v22  ;;  %3369 = vrot.lane.b32.xlu0 %v3293_v48, %s5334_s2  ;;  %3367 = vrot.lane.b32.xlu1 %v3291_v25, %s5334_s2  ;;  %v4634_v51 = vpop.f32.mrb[40].mxu0  ;;  %v3297_v13 = vrot.slane %v3057_v54, 4 }
 0x566   : > { %v3117_v34 = vrot.slane %v7029_v20, 2  ;;  %v2761_v3 = vadd.f32 %v4634_v51, %v6959_v57  ;;  %v2755_v49 = vpop.f32.mrb[41].mxu0  ;;  %v3118_v45 = vrot.slane %v7026_v52, 2  ;;  %v3294_v29 = vrot.slane %v7029_v20, 4 }
 0x567   : > { %v2756_v61 = vadd.f32 %v6959_v57, %v2755_v49  ;;  %v3295_v46 = vrot.slane %v7026_v52, 4 }
 0x568   : > { %v2883_v31 = vmax.f32 %v2761_v3, 0.0  ;;  %v3121_v16 = vsel %vm1595_vm5, %v3118_v45, %v3120_v41  ;;  %v3119_v5 = vsel %vm1595_vm5, %v3117_v34, %v3118_v45 }
 0x569   : > { %v2882_v27 = vmax.f32 %v2756_v61, 0.0  ;;  %3196 = vrot.lane.b32.xlu0 %v3121_v16, %s5335_s12  ;;  %3194 = vrot.lane.b32.xlu1 %v3119_v5, %s5335_s12  ;;  %v3298_v6 = vsel %vm3278_vm7, %v3295_v46, %v3297_v13  ;;  %v3296_v24 = vsel %vm3278_vm7, %v3294_v29, %v3295_v46 }
 0x56a   : > { %v2955_v11 = vrot.slane %v2883_v31, 6 }
 0x56b   : > { %v2954_v9 = vrot.slane %v2882_v27, 6 }
 0x56c   : > { %v3058_v56 = vsel %vm2941_vm6, %v2955_v11, 0.0 }
 0x56d   : > { %v3125_v50 = vrot.slane %v3058_v56, 2  ;;  %v7047_v8 = vsel %vm2941_vm6, %v2954_v9, %v2955_v11  ;;  %v7050_v63 = vsel %vm2941_vm6, 0.0, %v2954_v9  ;;  %3373 = vrot.lane.b32.xlu0 %v3298_v6, %s5334_s2  ;;  %3371 = vrot.lane.b32.xlu1 %v3296_v24, %s5334_s2  ;;  %v4637_v14 = vpop.f32.mrb[42].mxu0  ;;  %v3302_v33 = vrot.slane %v3058_v56, 4 }
 0x56e   : > { %v3122_v12 = vrot.slane %v7050_v63, 2  ;;  %v2771_v43 = vadd.f32 %v4637_v14, %v6959_v57  ;;  %v2765_v58 = vpop.f32.mrb[43].mxu0  ;;  %v3123_v15 = vrot.slane %v7047_v8, 2  ;;  %v3299_v17 = vrot.slane %v7050_v63, 4 }
 0x56f   : > { %v2766_v40 = vadd.f32 %v6959_v57, %v2765_v58  ;;  %v3300_v26 = vrot.slane %v7047_v8, 4 }
 0x570   : > { %v2885_v59 = vmax.f32 %v2771_v43, 0.0  ;;  %v3126_v10 = vsel %vm1595_vm5, %v3123_v15, %v3125_v50  ;;  %v3124_v2 = vsel %vm1595_vm5, %v3122_v12, %v3123_v15 }
 0x571   : > { %v2884_v60 = vmax.f32 %v2766_v40, 0.0  ;;  %3200 = vrot.lane.b32.xlu0 %v3126_v10, %s5335_s12  ;;  %3198 = vrot.lane.b32.xlu1 %v3124_v2, %s5335_s12  ;;  %v3303_v44 = vsel %vm3278_vm7, %v3300_v26, %v3302_v33  ;;  %v3301_v28 = vsel %vm3278_vm7, %v3299_v17, %v3300_v26 }
 0x572   : > { %v2958_v47 = vrot.slane %v2885_v59, 6 }
 0x573   : > { %v2957_v18 = vrot.slane %v2884_v60, 6 }
 0x574   : > { %v3059_v36 = vsel %vm2941_vm6, %v2958_v47, 0.0 }
 0x575   : > { %v3130_v53 = vrot.slane %v3059_v36, 2  ;;  %v7068_v23 = vsel %vm2941_vm6, %v2957_v18, %v2958_v47  ;;  %v7071_v1 = vsel %vm2941_vm6, 0.0, %v2957_v18  ;;  %3377 = vrot.lane.b32.xlu0 %v3303_v44, %s5334_s2  ;;  %3375 = vrot.lane.b32.xlu1 %v3301_v28, %s5334_s2  ;;  %v4640_v62 = vpop.f32.mrb[44].mxu0  ;;  %v3307_v21 = vrot.slane %v3059_v36, 4 }
 0x576   : > { %v3127_v37 = vrot.slane %v7071_v1, 2  ;;  %v2781_v0 = vadd.f32 %v4640_v62, %v6959_v57  ;;  %v2775_v38 = vpop.f32.mrb[45].mxu0  ;;  %v3128_v39 = vrot.slane %v7068_v23, 2  ;;  %v3304_v32 = vrot.slane %v7071_v1, 4 }
 0x577   : > { %v2776_v19 = vadd.f32 %v6959_v57, %v2775_v38  ;;  %v3305_v25 = vrot.slane %v7068_v23, 4 }
 0x578   : > { %v2887_v22 = vmax.f32 %v2781_v0, 0.0  ;;  %v3131_v54 = vsel %vm1595_vm5, %v3128_v39, %v3130_v53  ;;  %v3129_v48 = vsel %vm1595_vm5, %v3127_v37, %v3128_v39 }
 0x579   : > { %v2886_v41 = vmax.f32 %v2776_v19, 0.0  ;;  %3204 = vrot.lane.b32.xlu0 %v3131_v54, %s5335_s12  ;;  %3202 = vrot.lane.b32.xlu1 %v3129_v48, %s5335_s12  ;;  %v3308_v49 = vsel %vm3278_vm7, %v3305_v25, %v3307_v21  ;;  %v3306_v45 = vsel %vm3278_vm7, %v3304_v32, %v3305_v25 }
 0x57a   : > { %v2961_v51 = vrot.slane %v2887_v22, 6 }
 0x57b   : > { %v2960_v34 = vrot.slane %v2886_v41, 6 }
 0x57c   : > { %v3060_v3 = vsel %vm2941_vm6, %v2961_v51, 0.0 }
 0x57d   : > { %v3135_v13 = vrot.slane %v3060_v3, 2  ;;  %v7089_v29 = vsel %vm2941_vm6, %v2960_v34, %v2961_v51  ;;  %v7092_v61 = vsel %vm2941_vm6, 0.0, %v2960_v34  ;;  %3381 = vrot.lane.b32.xlu0 %v3308_v49, %s5334_s2  ;;  %3379 = vrot.lane.b32.xlu1 %v3306_v45, %s5334_s2  ;;  %v4643_v31 = vpop.f32.mrb[46].mxu0  ;;  %v3312_v11 = vrot.slane %v3060_v3, 4 }
 0x57e   : > { %v3132_v16 = vrot.slane %v7092_v61, 2  ;;  %v2791_v5 = vadd.f32 %v4643_v31, %v6959_v57  ;;  %v2785_v46 = vpop.f32.mrb[47].mxu0  ;;  %v3133_v27 = vrot.slane %v7089_v29, 2  ;;  %v3309_v9 = vrot.slane %v7092_v61, 4 }
 0x57f   : > { %v2786_v56 = vadd.f32 %v6959_v57, %v2785_v46  ;;  %v3310_v14 = vrot.slane %v7089_v29, 4 }
 0x580   : > { %v2889_v6 = vmax.f32 %v2791_v5, 0.0  ;;  %v3136_v24 = vsel %vm1595_vm5, %v3133_v27, %v3135_v13  ;;  %v3134_v50 = vsel %vm1595_vm5, %v3132_v16, %v3133_v27 }
 0x581   : > { %v2888_v12 = vmax.f32 %v2786_v56, 0.0  ;;  %3208 = vrot.lane.b32.xlu0 %v3136_v24, %s5335_s12  ;;  %3206 = vrot.lane.b32.xlu1 %v3134_v50, %s5335_s12  ;;  %v3313_v33 = vsel %vm3278_vm7, %v3310_v14, %v3312_v11  ;;  %v3311_v17 = vsel %vm3278_vm7, %v3309_v9, %v3310_v14 }
 0x582   : > { %v2964_v43 = vrot.slane %v2889_v6, 6 }
 0x583   : > { %v2963_v58 = vrot.slane %v2888_v12, 6 }
 0x584   : > { %v3061_v15 = vsel %vm2941_vm6, %v2964_v43, 0.0 }
 0x585   : > { %v3140_v40 = vrot.slane %v3061_v15, 2  ;;  %v7110_v59 = vsel %vm2941_vm6, %v2963_v58, %v2964_v43  ;;  %v7113_v10 = vsel %vm2941_vm6, 0.0, %v2963_v58  ;;  %3385 = vrot.lane.b32.xlu0 %v3313_v33, %s5334_s2  ;;  %3383 = vrot.lane.b32.xlu1 %v3311_v17, %s5334_s2  ;;  %v4646_v2 = vpop.f32.mrb[48].mxu0  ;;  %v3317_v36 = vrot.slane %v3061_v15, 4 }
 0x586   : > { %v3137_v26 = vrot.slane %v7113_v10, 2  ;;  %v2801_v60 = vadd.f32 %v4646_v2, %v6959_v57  ;;  %v2795_v47 = vpop.f32.mrb[49].mxu0  ;;  %v3138_v18 = vrot.slane %v7110_v59, 2  ;;  %v3314_v44 = vrot.slane %v7113_v10, 4 }
 0x587   : > { %v2796_v28 = vadd.f32 %v6959_v57, %v2795_v47  ;;  %v3315_v0 = vrot.slane %v7110_v59, 4 }
 0x588   : > { %v2891_v53 = vmax.f32 %v2801_v60, 0.0  ;;  %v3141_v62 = vsel %vm1595_vm5, %v3138_v18, %v3140_v40  ;;  %v3139_v37 = vsel %vm1595_vm5, %v3137_v26, %v3138_v18 }
 0x589   : > { %v2890_v38 = vmax.f32 %v2796_v28, 0.0  ;;  %3212 = vrot.lane.b32.xlu0 %v3141_v62, %s5335_s12  ;;  %3210 = vrot.lane.b32.xlu1 %v3139_v37, %s5335_s12  ;;  %v3318_v19 = vsel %vm3278_vm7, %v3315_v0, %v3317_v36  ;;  %v3316_v22 = vsel %vm3278_vm7, %v3314_v44, %v3315_v0 }
 0x58a   : > { %v2967_v39 = vrot.slane %v2891_v53, 6 }
 0x58b   : > { %v2966_v21 = vrot.slane %v2890_v38, 6 }
 0x58c   : > { %v3062_v32 = vsel %vm2941_vm6, %v2967_v39, 0.0 }
 0x58d   : > { %v3145_v54 = vrot.slane %v3062_v32, 2  ;;  %v7131_v48 = vsel %vm2941_vm6, %v2966_v21, %v2967_v39  ;;  %v7134_v25 = vsel %vm2941_vm6, 0.0, %v2966_v21  ;;  %3389 = vrot.lane.b32.xlu0 %v3318_v19, %s5334_s2  ;;  %3387 = vrot.lane.b32.xlu1 %v3316_v22, %s5334_s2  ;;  %v4649_v41 = vpop.f32.mrb[50].mxu0  ;;  %v3322_v45 = vrot.slane %v3062_v32, 4 }
 0x58e   : > { %v3142_v51 = vrot.slane %v7134_v25, 2  ;;  %v2811_v34 = vadd.f32 %v4649_v41, %v6959_v57  ;;  %v2805_v3 = vpop.f32.mrb[51].mxu0  ;;  %v3143_v49 = vrot.slane %v7131_v48, 2  ;;  %v3319_v13 = vrot.slane %v7134_v25, 4 }
 0x58f   : > { %v2806_v31 = vadd.f32 %v6959_v57, %v2805_v3  ;;  %v3320_v27 = vrot.slane %v7131_v48, 4 }
 0x590   : > { %v2893_v16 = vmax.f32 %v2811_v34, 0.0  ;;  %v3146_v5 = vsel %vm1595_vm5, %v3143_v49, %v3145_v54  ;;  %v3144_v46 = vsel %vm1595_vm5, %v3142_v51, %v3143_v49 }
 0x591   : > { %v2892_v11 = vmax.f32 %v2806_v31, 0.0  ;;  %3216 = vrot.lane.b32.xlu0 %v3146_v5, %s5335_s12  ;;  %3214 = vrot.lane.b32.xlu1 %v3144_v46, %s5335_s12  ;;  %v3323_v24 = vsel %vm3278_vm7, %v3320_v27, %v3322_v45  ;;  %v3321_v50 = vsel %vm3278_vm7, %v3319_v13, %v3320_v27 }
 0x592   : > { %v2970_v9 = vrot.slane %v2893_v16, 6 }
 0x593   : > { %v2969_v56 = vrot.slane %v2892_v11, 6 }
 0x594   : > { %v3063_v6 = vsel %vm2941_vm6, %v2970_v9, 0.0 }
 0x595   : > { %v3150_v14 = vrot.slane %v3063_v6, 2  ;;  %v7152_v12 = vsel %vm2941_vm6, %v2969_v56, %v2970_v9  ;;  %v7155_v43 = vsel %vm2941_vm6, 0.0, %v2969_v56  ;;  %3393 = vrot.lane.b32.xlu0 %v3323_v24, %s5334_s2  ;;  %3391 = vrot.lane.b32.xlu1 %v3321_v50, %s5334_s2  ;;  %v4652_v58 = vpop.f32.mrb[52].mxu0  ;;  %v3327_v2 = vrot.slane %v3063_v6, 4 }
 0x596   : > { %v3147_v15 = vrot.slane %v7155_v43, 2  ;;  %v2821_v33 = vadd.f32 %v4652_v58, %v6959_v57  ;;  %v2815_v17 = vpop.f32.mrb[53].mxu0  ;;  %v3148_v40 = vrot.slane %v7152_v12, 2  ;;  %v3324_v26 = vrot.slane %v7155_v43, 4 }
 0x597   : > { %v2816_v60 = vadd.f32 %v6959_v57, %v2815_v17  ;;  %v3325_v44 = vrot.slane %v7152_v12, 4 }
 0x598   : > { %v2895_v47 = vmax.f32 %v2821_v33, 0.0  ;;  %v3151_v18 = vsel %vm1595_vm5, %v3148_v40, %v3150_v14  ;;  %v3149_v36 = vsel %vm1595_vm5, %v3147_v15, %v3148_v40 }
 0x599   : > { %v2894_v28 = vmax.f32 %v2816_v60, 0.0  ;;  %3220 = vrot.lane.b32.xlu0 %v3151_v18, %s5335_s12  ;;  %3218 = vrot.lane.b32.xlu1 %v3149_v36, %s5335_s12  ;;  %v3328_v0 = vsel %vm3278_vm7, %v3325_v44, %v3327_v2  ;;  %v3326_v38 = vsel %vm3278_vm7, %v3324_v26, %v3325_v44 }
 0x59a   : > { %v2973_v53 = vrot.slane %v2895_v47, 6 }
 0x59b   : > { %v2972_v62 = vrot.slane %v2894_v28, 6 }
 0x59c   : > { %v3064_v37 = vsel %vm2941_vm6, %v2973_v53, 0.0 }
 0x59d   : > { %v3155_v39 = vrot.slane %v3064_v37, 2  ;;  %v7173_v21 = vsel %vm2941_vm6, %v2972_v62, %v2973_v53  ;;  %v7176_v32 = vsel %vm2941_vm6, 0.0, %v2972_v62  ;;  %3397 = vrot.lane.b32.xlu0 %v3328_v0, %s5334_s2  ;;  %3395 = vrot.lane.b32.xlu1 %v3326_v38, %s5334_s2  ;;  %v4655_v19 = vpop.f32.mrb[54].mxu0  ;;  %v3332_v34 = vrot.slane %v3064_v37, 4 }
 0x59e   : > { %v3152_v22 = vrot.slane %v7176_v32, 2  ;;  %v2831_v54 = vadd.f32 %v4655_v19, %v6959_v57  ;;  %v2825_v41 = vpop.f32.mrb[55].mxu0  ;;  %v3153_v51 = vrot.slane %v7173_v21, 2  ;;  %v3329_v3 = vrot.slane %v7176_v32, 4 }
 0x59f   : > { %v2826_v49 = vadd.f32 %v6959_v57, %v2825_v41  ;;  %v3330_v16 = vrot.slane %v7173_v21, 4 }
 0x5a0   : > { %v2897_v45 = vmax.f32 %v2831_v54, 0.0  ;;  %v3156_v13 = vsel %vm1595_vm5, %v3153_v51, %v3155_v39  ;;  %v3154_v31 = vsel %vm1595_vm5, %v3152_v22, %v3153_v51 }
 0x5a1   : > { %v2896_v5 = vmax.f32 %v2826_v49, 0.0  ;;  %3224 = vrot.lane.b32.xlu0 %v3156_v13, %s5335_s12  ;;  %3222 = vrot.lane.b32.xlu1 %v3154_v31, %s5335_s12  ;;  %v3333_v9 = vsel %vm3278_vm7, %v3330_v16, %v3332_v34  ;;  %v3331_v56 = vsel %vm3278_vm7, %v3329_v3, %v3330_v16 }
 0x5a2   : > { %v2976_v46 = vrot.slane %v2897_v45, 6 }
 0x5a3   : > { %v2975_v27 = vrot.slane %v2896_v5, 6 }
 0x5a4   : > { %v3065_v11 = vsel %vm2941_vm6, %v2976_v46, 0.0 }
 0x5a5   : > { %v3160_v6 = vrot.slane %v3065_v11, 2  ;;  %v7194_v24 = vsel %vm2941_vm6, %v2975_v27, %v2976_v46  ;;  %v7197_v50 = vsel %vm2941_vm6, 0.0, %v2975_v27  ;;  %3401 = vrot.lane.b32.xlu0 %v3333_v9, %s5334_s2  ;;  %3399 = vrot.lane.b32.xlu1 %v3331_v56, %s5334_s2  ;;  %v4658_v14 = vpop.f32.mrb[56].mxu0  ;;  %v3337_v40 = vrot.slane %v3065_v11, 4 }
 0x5a6   : > { %v3157_v58 = vrot.slane %v7197_v50, 2  ;;  %v2841_v15 = vadd.f32 %v4658_v14, %v6959_v57  ;;  %v2835_v33 = vpop.f32.mrb[57].mxu0  ;;  %v3158_v17 = vrot.slane %v7194_v24, 2  ;;  %v3334_v2 = vrot.slane %v7197_v50, 4 }
 0x5a7   : > { %v2836_v26 = vadd.f32 %v6959_v57, %v2835_v33  ;;  %v3335_v36 = vrot.slane %v7194_v24, 4 }
 0x5a8   : > { %v2899_v60 = vmax.f32 %v2841_v15, 0.0  ;;  %v3161_v47 = vsel %vm1595_vm5, %v3158_v17, %v3160_v6  ;;  %v3159_v18 = vsel %vm1595_vm5, %v3157_v58, %v3158_v17 }
 0x5a9   : > { %v2898_v44 = vmax.f32 %v2836_v26, 0.0  ;;  %3228 = vrot.lane.b32.xlu0 %v3161_v47, %s5335_s12  ;;  %3226 = vrot.lane.b32.xlu1 %v3159_v18, %s5335_s12  ;;  %v3338_v37 = vsel %vm3278_vm7, %v3335_v36, %v3337_v40  ;;  %v3336_v0 = vsel %vm3278_vm7, %v3334_v2, %v3335_v36 }
 0x5aa   : > { %v2979_v28 = vrot.slane %v2899_v60, 6 }
 0x5ab   : > { %v2978_v53 = vrot.slane %v2898_v44, 6 }
 0x5ac   : > { %v3066_v62 = vsel %vm2941_vm6, %v2979_v28, 0.0 }
 0x5ad   : > { %v3165_v38 = vrot.slane %v3066_v62, 2  ;;  %v7215_v39 = vsel %vm2941_vm6, %v2978_v53, %v2979_v28  ;;  %v7218_v19 = vsel %vm2941_vm6, 0.0, %v2978_v53  ;;  %3405 = vrot.lane.b32.xlu0 %v3338_v37, %s5334_s2  ;;  %3403 = vrot.lane.b32.xlu1 %v3336_v0, %s5334_s2  ;;  %v3342_v51 = vrot.slane %v3066_v62, 4 }
 0x5ae   : > { %v3162_v22 = vrot.slane %v7218_v19, 2  ;;  %v4661_v54 = vpop.f32.mrb[58].mxu0  ;;  %v3163_v41 = vrot.slane %v7215_v39, 2  ;;  %v3339_v34 = vrot.slane %v7218_v19, 4  ;;  %v3340_v16 = vrot.slane %v7215_v39, 4 }
 0x5af   : > { %v2851_v3 = vadd.f32 %v4661_v54, %v6959_v57  ;;  %v2845_v49 = vpop.f32.mrb[59].mxu0 }
 0x5b0   : > { %v2846_v45 = vadd.f32 %v6959_v57, %v2845_v49  ;;  %v3166_v13 = vsel %vm1595_vm5, %v3163_v41, %v3165_v38  ;;  %v3164_v31 = vsel %vm1595_vm5, %v3162_v22, %v3163_v41  ;;  %v3343_v14 = vsel %vm3278_vm7, %v3340_v16, %v3342_v51 }
 0x5b1   : > { %v2901_v5 = vmax.f32 %v2851_v3, 0.0  ;;  %3232 = vrot.lane.b32.xlu0 %v3166_v13, %s5335_s12  ;;  %3230 = vrot.lane.b32.xlu1 %v3164_v31, %s5335_s12  ;;  %v3341_v58 = vsel %vm3278_vm7, %v3339_v34, %v3340_v16 }
 0x5b2   : > { %v2900_v46 = vmax.f32 %v2846_v45, 0.0 }
 0x5b3   : > { %v2982_v27 = vrot.slane %v2901_v5, 6  ;;  %v4664_v11 = vpop.f32.mrb[60].mxu0 }
 0x5b4   : > { %v2981_v9 = vrot.slane %v2900_v46, 6  ;;  %v2861_v56 = vadd.f32 %v4664_v11, %v6959_v57  ;;  %v2855_v6 = vpop.f32.mrb[61].mxu0 }
 0x5b5   : > { %v3067_v15 = vsel %vm2941_vm6, %v2982_v27, 0.0  ;;  %v2856_v33 = vadd.f32 %v6959_v57, %v2855_v6  ;;  %3409 = vrot.lane.b32.xlu0 %v3343_v14, %s5334_s2  ;;  %3407 = vrot.lane.b32.xlu1 %v3341_v58, %s5334_s2 }
 0x5b6   : > { %v3170_v17 = vrot.slane %v3067_v15, 2  ;;  %v7240_v40 = vsel %vm2941_vm6, %v2981_v9, %v2982_v27  ;;  %v7243_v2 = vsel %vm2941_vm6, 0.0, %v2981_v9  ;;  %v2903_v60 = vmax.f32 %v2861_v56, 0.0 }
 0x5b7   : > { %v3167_v26 = vrot.slane %v7243_v2, 2  ;;  %v2902_v47 = vmax.f32 %v2856_v33, 0.0  ;;  %v4667_v18 = vpop.f32.mrb[62].mxu0  ;;  %v3347_v36 = vrot.slane %v3067_v15, 4  ;;  %v3168_v53 = vrot.slane %v7240_v40, 2 }
 0x5b8   : > { %v2871_v44 = vadd.f32 %v4667_v18, %v6959_v57  ;;  %v2865_v28 = vpop.f32.mrb[63].mxu0  ;;  %v2985_v62 = vrot.slane %v2903_v60, 6  ;;  %v3345_v38 = vrot.slane %v7240_v40, 4  ;;  %v3344_v22 = vrot.slane %v7243_v2, 4 }
 0x5b9   : > { %v2984_v37 = vrot.slane %v2902_v47, 6  ;;  %v2866_v0 = vadd.f32 %v6959_v57, %v2865_v28  ;;  %v3171_v41 = vsel %vm1595_vm5, %v3168_v53, %v3170_v17  ;;  %v3169_v51 = vsel %vm1595_vm5, %v3167_v26, %v3168_v53 }
 0x5ba   : > { %v2905_v54 = vmax.f32 %v2871_v44, 0.0  ;;  %v3068_v34 = vsel %vm2941_vm6, %v2985_v62, 0.0  ;;  %3236 = vrot.lane.b32.xlu0 %v3171_v41, %s5335_s12  ;;  %3234 = vrot.lane.b32.xlu1 %v3169_v51, %s5335_s12  ;;  %v3348_v31 = vsel %vm3278_vm7, %v3345_v38, %v3347_v36  ;;  %v3346_v46 = vsel %vm3278_vm7, %v3344_v22, %v3345_v38 }
 0x5bb   : > { %v7255_v3 = vsel %vm2941_vm6, %v2984_v37, %v2985_v62  ;;  %v7258_v49 = vsel %vm2941_vm6, 0.0, %v2984_v37  ;;  %v2904_v45 = vmax.f32 %v2866_v0, 0.0  ;;  %v3175_v16 = vrot.slane %v3068_v34, 2 }
 0x5bc   : > { %v2988_v57 = vrot.slane %v2905_v54, 6  ;;  %v3172_v5 = vrot.slane %v7258_v49, 2  ;;  %v3173_v27 = vrot.slane %v7255_v3, 2  ;;  %v3352_v9 = vrot.slane %v3068_v34, 4 }
 0x5bd   : > { %v2987_v13 = vrot.slane %v2904_v45, 6  ;;  %v3349_v56 = vrot.slane %v7258_v49, 4  ;;  %v3350_v15 = vrot.slane %v7255_v3, 4 }
 0x5be   : > { %3413 = vrot.lane.b32.xlu0 %v3348_v31, %s5334_s2  ;;  %3411 = vrot.lane.b32.xlu1 %v3346_v46, %s5334_s2  ;;  %v3069_v6 = vsel %vm2941_vm6, %v2988_v57, 0.0  ;;  %v3176_v14 = vsel %vm1595_vm5, %v3173_v27, %v3175_v16  ;;  %v3174_v58 = vsel %vm1595_vm5, %v3172_v5, %v3173_v27 }
 0x5bf   : > { %v7267_v11 = vsel %vm2941_vm6, %v2987_v13, %v2988_v57  ;;  %v7277_v33 = vsel %vm2941_vm6, 0.0, %v2987_v13  ;;  %v3180_v60 = vrot.slane %v3069_v6, 2  ;;  %v3353_v18 = vsel %vm3278_vm7, %v3350_v15, %v3352_v9 }
 0x5c0   : > { %v3177_v47 = vrot.slane %v7277_v33, 2  ;;  %v3351_v36 = vsel %vm3278_vm7, %v3349_v56, %v3350_v15  ;;  %v3178_v44 = vrot.slane %v7267_v11, 2  ;;  %v3357_v22 = vrot.slane %v3069_v6, 4 }
 0x5c1   : > { %v3354_v54 = vrot.slane %v7277_v33, 4 }
 0x5c2   : > { %3240 = vrot.lane.b32.xlu0 %v3176_v14, %s5335_s12  ;;  %3238 = vrot.lane.b32.xlu1 %v3174_v58, %s5335_s12  ;;  %v3179_v41 = vsel %vm1595_vm5, %v3177_v47, %v3178_v44 }
 0x5c3   : > { %v3183_v17 = vpop.permute.xlu1 %3182  ;;  %v3185_v26 = vpop.permute.xlu0 %3184 }
 0x5c4   : > { %v3455_v28 = vsel %vm795_vm0, %v6968_v55, %v3183_v17  ;;  %v3456_v53 = vsel %vm795_vm0, %v6965_v42, %v3185_v26  ;;  %v3181_v55 = vsel %vm1595_vm5, %v3178_v44, %v3180_v60  ;;  %v3355_v42 = vrot.slane %v7267_v11, 4 }
 0x5c6   : > { %3417 = vrot.lane.b32.xlu0 %v3353_v18, %s5334_s2  ;;  %3415 = vrot.lane.b32.xlu1 %v3351_v36, %s5334_s2  ;;  %v3358_v45 = vsel %vm3278_vm7, %v3355_v42, %v3357_v22  ;;  %v3356_v57 = vsel %vm3278_vm7, %v3354_v54, %v3355_v42 }
 0x5c7   : > { %v3360_v62 = vpop.permute.xlu1 %3359  ;;  %v3362_v37 = vpop.permute.xlu0 %3361 }
 0x5c8   : > { %v3487_v0 = vsel %vm828_vm1, %v3455_v28, %v3360_v62  ;;  %v3488_v38 = vsel %vm828_vm1, %v3456_v53, %v3362_v37 }
 0x5c9   : > { %4674 = vmatprep.mubr.msk.f32.mxu1 %vm868_vm2, %v3487_v0 }
 0x5ca   : > { %4675 = vmatmul.mubr.msk.f32.vlgmr.msra.gmra.mrb[32].mxu1 %vm868_vm2, %v3488_v38  ;;  %3244 = vrot.lane.b32.xlu0 %v3181_v55, %s5335_s12 }
 0x5cb   : > { %3242 = vrot.lane.b32.xlu1 %v3179_v41, %s5335_s12  ;;  %v3187_v51 = vpop.permute.xlu1 %3186  ;;  %v3189_v34 = vpop.permute.xlu0 %3188 }
 0x5cc   : > { %v3457_v13 = vsel %vm795_vm0, %v6987_v30, %v3187_v51  ;;  %v3458_v31 = vsel %vm795_vm0, %v6984_v4, %v3189_v34 }
 0x5ce   : > { %3421 = vrot.lane.b32.xlu0 %v3358_v45, %s5334_s2 }
 0x5cf   : > { %3419 = vrot.lane.b32.xlu1 %v3356_v57, %s5334_s2  ;;  %v3364_v16 = vpop.permute.xlu1 %3363  ;;  %v3366_v5 = vpop.permute.xlu0 %3365 }
 0x5d0   : > { %v3489_v46 = vsel %vm828_vm1, %v3457_v13, %v3364_v16  ;;  %v3490_v27 = vsel %vm828_vm1, %v3458_v31, %v3366_v5 }
 0x5d1   : > { %4677 = vmatprep.mubr.msk.f32.mxu1 %vm868_vm2, %v3489_v46 }
 0x5d2   : > { %4678 = vmatmul.mubr.msk.f32.gmra.mrb[34].mxu1 %vm868_vm2, %v3490_v27 }
 0x5d3   : > { %v3191_v9 = vpop.permute.xlu1 %3190  ;;  %v3193_v56 = vpop.permute.xlu0 %3192 }
 0x5d4   : > { %v3459_v30 = vsel %vm795_vm0, %v7008_v7, %v3191_v9  ;;  %v3460_v4 = vsel %vm795_vm0, %v7005_v35, %v3193_v56 }
 0x5d7   : > { %v3368_v6 = vpop.permute.xlu1 %3367  ;;  %v3370_v14 = vpop.permute.xlu0 %3369 }
 0x5d8   : > { %v3491_v58 = vsel %vm828_vm1, %v3459_v30, %v3368_v6  ;;  %v3492_v15 = vsel %vm828_vm1, %v3460_v4, %v3370_v14 }
 0x5d9   : > { %4680 = vmatprep.mubr.msk.f32.mxu1 %vm868_vm2, %v3491_v58 }
 0x5da   : > { %4681 = vmatmul.mubr.msk.f32.gmra.mrb[36].mxu1 %vm868_vm2, %v3492_v15 }
 0x5db   : > { %v3195_v17 = vpop.permute.xlu1 %3194  ;;  %v3197_v26 = vpop.permute.xlu0 %3196 }
 0x5dc   : > { %v3461_v60 = vsel %vm795_vm0, %v7029_v20, %v3195_v17  ;;  %v3462_v7 = vsel %vm795_vm0, %v7026_v52, %v3197_v26 }
 0x5df   : > { %v3372_v47 = vpop.permute.xlu1 %3371  ;;  %v3374_v35 = vpop.permute.xlu0 %3373 }
 0x5e0   : > { %v3493_v18 = vsel %vm828_vm1, %v3461_v60, %v3372_v47  ;;  %v3494_v36 = vsel %vm828_vm1, %v3462_v7, %v3374_v35 }
 0x5e1   : > { %4683 = vmatprep.mubr.msk.f32.mxu1 %vm868_vm2, %v3493_v18 }
 0x5e2   : > { %4684 = vmatmul.mubr.msk.f32.gmra.mrb[38].mxu1 %vm868_vm2, %v3494_v36 }
 0x5e3   : > { %v3199_v44 = vpop.permute.xlu1 %3198  ;;  %v3201_v28 = vpop.permute.xlu0 %3200 }
 0x5e4   : > { %v3463_v53 = vsel %vm795_vm0, %v7050_v63, %v3199_v44  ;;  %v3464_v20 = vsel %vm795_vm0, %v7047_v8, %v3201_v28 }
 0x5e7   : > { %v3376_v62 = vpop.permute.xlu1 %3375  ;;  %v3378_v52 = vpop.permute.xlu0 %3377 }
 0x5e8   : > { %v3495_v37 = vsel %vm828_vm1, %v3463_v53, %v3376_v62  ;;  %v3496_v0 = vsel %vm828_vm1, %v3464_v20, %v3378_v52 }
 0x5e9   : > { %4686 = vmatprep.mubr.msk.f32.mxu1 %vm868_vm2, %v3495_v37 }
 0x5ea   : > { %4687 = vmatmul.mubr.msk.f32.gmra.mrb[40].mxu1 %vm868_vm2, %v3496_v0 }
 0x5eb   : > { %v3203_v38 = vpop.permute.xlu1 %3202  ;;  %v3205_v22 = vpop.permute.xlu0 %3204 }
 0x5ec   : > { %v3465_v54 = vsel %vm795_vm0, %v7071_v1, %v3203_v38  ;;  %v3466_v63 = vsel %vm795_vm0, %v7068_v23, %v3205_v22 }
 0x5ef   : > { %v3380_v55 = vpop.permute.xlu1 %3379  ;;  %v3382_v8 = vpop.permute.xlu0 %3381 }
 0x5f0   : > { %v3497_v41 = vsel %vm828_vm1, %v3465_v54, %v3380_v55  ;;  %v3498_v42 = vsel %vm828_vm1, %v3466_v63, %v3382_v8 }
 0x5f1   : > { %4689 = vmatprep.mubr.msk.f32.mxu1 %vm868_vm2, %v3497_v41 }
 0x5f2   : > { %4690 = vmatmul.mubr.msk.f32.gmra.mrb[42].mxu1 %vm868_vm2, %v3498_v42 }
 0x5f3   : > { %v3207_v51 = vpop.permute.xlu1 %3206  ;;  %v3209_v34 = vpop.permute.xlu0 %3208 }
 0x5f4   : > { %v3467_v45 = vsel %vm795_vm0, %v7092_v61, %v3207_v51  ;;  %v3468_v1 = vsel %vm795_vm0, %v7089_v29, %v3209_v34 }
 0x5f7   : > { %v3384_v57 = vpop.permute.xlu1 %3383  ;;  %v3386_v23 = vpop.permute.xlu0 %3385 }
 0x5f8   : > { %v3499_v13 = vsel %vm828_vm1, %v3467_v45, %v3384_v57  ;;  %v3500_v31 = vsel %vm828_vm1, %v3468_v1, %v3386_v23 }
 0x5f9   : > { %4692 = vmatprep.mubr.msk.f32.mxu1 %vm868_vm2, %v3499_v13 }
 0x5fa   : > { %4693 = vmatmul.mubr.msk.f32.gmra.mrb[44].mxu1 %vm868_vm2, %v3500_v31 }
 0x5fb   : > { %v3211_v16 = vpop.permute.xlu1 %3210  ;;  %v3213_v5 = vpop.permute.xlu0 %3212 }
 0x5fc   : > { %v3469_v46 = vsel %vm795_vm0, %v7113_v10, %v3211_v16  ;;  %v3470_v61 = vsel %vm795_vm0, %v7110_v59, %v3213_v5 }
 0x5ff   : > { %v3388_v27 = vpop.permute.xlu1 %3387  ;;  %v3390_v29 = vpop.permute.xlu0 %3389 }
 0x600   : > { %v3501_v9 = vsel %vm828_vm1, %v3469_v46, %v3388_v27  ;;  %v3502_v56 = vsel %vm828_vm1, %v3470_v61, %v3390_v29 }
 0x601   : > { %4695 = vmatprep.mubr.msk.f32.mxu1 %vm868_vm2, %v3501_v9 }
 0x602   : > { %4696 = vmatmul.mubr.msk.f32.gmra.mrb[46].mxu1 %vm868_vm2, %v3502_v56 }
 0x603   : > { %v3215_v30 = vpop.permute.xlu1 %3214  ;;  %v3217_v4 = vpop.permute.xlu0 %3216 }
 0x604   : > { %v3471_v6 = vsel %vm795_vm0, %v7134_v25, %v3215_v30  ;;  %v3472_v10 = vsel %vm795_vm0, %v7131_v48, %v3217_v4 }
 0x607   : > { %v3392_v14 = vpop.permute.xlu1 %3391  ;;  %v3394_v59 = vpop.permute.xlu0 %3393 }
 0x608   : > { %v3503_v58 = vsel %vm828_vm1, %v3471_v6, %v3392_v14  ;;  %v3504_v15 = vsel %vm828_vm1, %v3472_v10, %v3394_v59  ;;  %v7425_v6 = vld [vmem:[#allocation17] ss:$0 sm:$0xff] }
 0x609   : > { %4698 = vmatprep.mubr.msk.f32.mxu1 %vm868_vm2, %v3503_v58 }
 0x60a   : > { %4699 = vmatmul.mubr.msk.f32.gmra.mrb[48].mxu1 %vm868_vm2, %v3504_v15 }
 0x60b   : > { %v3219_v17 = vpop.permute.xlu1 %3218  ;;  %v3221_v26 = vpop.permute.xlu0 %3220 }
 0x60c   : > { %v3473_v60 = vsel %vm795_vm0, %v7155_v43, %v3219_v17  ;;  %v3474_v25 = vsel %vm795_vm0, %v7152_v12, %v3221_v26  ;;  %v4891_v17 = vld [vmem:[%s5748_s1 + $0x8] sm:$0xff] }
 0x60f   : > { %v3396_v7 = vpop.permute.xlu1 %3395  ;;  %v3398_v48 = vpop.permute.xlu0 %3397 }
 0x610   : > { %v3505_v47 = vsel %vm828_vm1, %v3473_v60, %v3396_v7  ;;  %v3506_v35 = vsel %vm828_vm1, %v3474_v25, %v3398_v48  ;;  %v4892_v60 = vld [vmem:[%s5748_s1] sm:$0xff] }
 0x611   : > { %4701 = vmatprep.mubr.msk.f32.mxu1 %vm868_vm2, %v3505_v47 }
 0x612   : > { %4702 = vmatmul.mubr.msk.f32.gmra.mrb[50].mxu1 %vm868_vm2, %v3506_v35 }
 0x613   : > { %v3223_v18 = vpop.permute.xlu1 %3222  ;;  %v3225_v36 = vpop.permute.xlu0 %3224 }
 0x614   : > { %v3475_v44 = vsel %vm795_vm0, %v7176_v32, %v3223_v18  ;;  %v3476_v43 = vsel %vm795_vm0, %v7173_v21, %v3225_v36 }
 0x617   : > { %v3400_v28 = vpop.permute.xlu1 %3399  ;;  %v3402_v12 = vpop.permute.xlu0 %3401 }
 0x618   : > { %v3507_v53 = vsel %vm828_vm1, %v3475_v44, %v3400_v28  ;;  %v3508_v20 = vsel %vm828_vm1, %v3476_v43, %v3402_v12  ;;  %v4893_v28 = vld [vmem:[%s5748_s1 + $0x18] sm:$0xff] }
 0x619   : > { %4704 = vmatprep.mubr.msk.f32.mxu1 %vm868_vm2, %v3507_v53  ;;  %v4894_v53 = vld [vmem:[%s5748_s1 + $0x10] sm:$0xff] }
 0x61a   : > { %4705 = vmatmul.mubr.msk.f32.gmra.mrb[52].mxu1 %vm868_vm2, %v3508_v20 }
 0x61b   : > { %v3227_v62 = vpop.permute.xlu1 %3226  ;;  %v3229_v52 = vpop.permute.xlu0 %3228 }
 0x61c   : > { %v3477_v37 = vsel %vm795_vm0, %v7197_v50, %v3227_v62  ;;  %v3478_v32 = vsel %vm795_vm0, %v7194_v24, %v3229_v52 }
 0x61f   : > { %v3404_v0 = vpop.permute.xlu1 %3403  ;;  %v3406_v21 = vpop.permute.xlu0 %3405 }
 0x620   : > { %v3509_v38 = vsel %vm828_vm1, %v3477_v37, %v3404_v0  ;;  %v3510_v22 = vsel %vm828_vm1, %v3478_v32, %v3406_v21 }
 0x621   : > { %4707 = vmatprep.mubr.msk.f32.mxu1 %vm868_vm2, %v3509_v38 }
 0x622   : > { %4708 = vmatmul.mubr.msk.f32.gmra.mrb[54].mxu1 %vm868_vm2, %v3510_v22 }
 0x623   : > { %v3231_v54 = vpop.permute.xlu1 %3230  ;;  %v3233_v63 = vpop.permute.xlu0 %3232 }
 0x624   : > { %v3479_v55 = vsel %vm795_vm0, %v7218_v19, %v3231_v54  ;;  %v3480_v50 = vsel %vm795_vm0, %v7215_v39, %v3233_v63  ;;  %v4895_v54 = vld [vmem:[%s5748_s1 + $0x28] sm:$0xff] }
 0x627   : > { %v3408_v8 = vpop.permute.xlu1 %3407  ;;  %v3410_v24 = vpop.permute.xlu0 %3409 }
 0x628   : > { %v3511_v41 = vsel %vm828_vm1, %v3479_v55, %v3408_v8  ;;  %v3512_v42 = vsel %vm828_vm1, %v3480_v50, %v3410_v24  ;;  %v4896_v55 = vld [vmem:[%s5748_s1 + $0x20] sm:$0xff] }
 0x629   : > { %4710 = vmatprep.mubr.msk.f32.mxu1 %vm868_vm2, %v3511_v41 }
 0x62a   : > { %4711 = vmatmul.mubr.msk.f32.gmra.mrb[56].mxu1 %vm868_vm2, %v3512_v42 }
 0x62c   : > { %v3235_v51 = vpop.permute.xlu1 %3234  ;;  %v3237_v34 = vpop.permute.xlu0 %3236 }
 0x62d   : > { %v3481_v45 = vsel %vm795_vm0, %v7243_v2, %v3235_v51  ;;  %v3482_v19 = vsel %vm795_vm0, %v7240_v40, %v3237_v34 }
 0x630   : > { %v3412_v1 = vpop.permute.xlu1 %3411  ;;  %v3414_v39 = vpop.permute.xlu0 %3413 }
 0x631   : > { %v3513_v57 = vsel %vm828_vm1, %v3481_v45, %v3412_v1  ;;  %v3514_v23 = vsel %vm828_vm1, %v3482_v19, %v3414_v39  ;;  %v4897_v1 = vld [vmem:[%s5748_s1 + $0x38] sm:$0xff] }
 0x632   : > { %4713 = vmatprep.mubr.msk.f32.mxu1 %vm868_vm2, %v3513_v57  ;;  %v4898_v57 = vld [vmem:[%s5748_s1 + $0x30] sm:$0xff] }
 0x633   : > { %4714 = vmatmul.mubr.msk.f32.gmra.mrb[58].mxu1 %vm868_vm2, %v3514_v23 }
 0x634   : > { %v3239_v13 = vpop.permute.xlu1 %3238  ;;  %v3241_v31 = vpop.permute.xlu0 %3240 }
 0x635   : > { %v3483_v16 = vsel %vm795_vm0, %v7258_v49, %v3239_v13  ;;  %v3484_v2 = vsel %vm795_vm0, %v7255_v3, %v3241_v31 }
 0x638   : > { %v3416_v5 = vpop.permute.xlu1 %3415  ;;  %v3418_v40 = vpop.permute.xlu0 %3417 }
 0x639   : > { %v3515_v46 = vsel %vm828_vm1, %v3483_v16, %v3416_v5  ;;  %v3516_v61 = vsel %vm828_vm1, %v3484_v2, %v3418_v40 }
 0x63a   : > { %4716 = vmatprep.mubr.msk.f32.mxu1 %vm868_vm2, %v3515_v46 }
 0x63b   : > { %4717 = vmatmul.mubr.msk.f32.gmra.mrb[60].mxu1 %vm868_vm2, %v3516_v61 }
 0x63c   : > { %v3245_v29 = vpop.permute.xlu0 %3244 }
 0x63d   : > { %v3243_v27 = vpop.permute.xlu1 %3242  ;;  %v3486_v49 = vsel %vm795_vm0, %v7267_v11, %v3245_v29 }
 0x63e   : > { %v3485_v9 = vsel %vm795_vm0, %v7277_v33, %v3243_v27  ;;  %v7427_v33 = vld [vmem:[#allocation19] ss:$0 sm:$0xff] }
 0x63f   : > { %v4899_v27 = vld [vmem:[%s5748_s1 + $0x48] sm:$0xff] }
 0x640   : > { %v3422_v56 = vpop.permute.xlu0 %3421 }
 0x641   : > { %v3420_v3 = vpop.permute.xlu1 %3419  ;;  %v3518_v4 = vsel %vm828_vm1, %v3486_v49, %v3422_v56 }
 0x642   : > { %v3517_v30 = vsel %vm828_vm1, %v3485_v9, %v3420_v3  ;;  %v4900_v9 = vld [vmem:[%s5748_s1 + $0x40] sm:$0xff] }
 0x643   : > { %4719 = vmatprep.mubr.msk.f32.mxu1 %vm868_vm2, %v3517_v30 }
 0x644   : > { %4720 = vmatmul.mubr.msk.f32.gmra.mrb[62].mxu1 %vm868_vm2, %v3518_v4 }
 0x69d   : > { %v4676_v10 = vpop.f32.mrb[32].mxu1 }
 0x69e   : > { %v3848_v14 = vmul.f32 %v4676_v10, %v7425_v6  ;;  %v3681_v11 = vpop.f32.mrb[33].mxu1 }
 0x69f   : > { %v3847_v59 = vmul.f32 %v7425_v6, %v3681_v11 }
 0x6a0   : > { %v3887_v58 = vadd.f32 %v7427_v33, %v3848_v14 }
 0x6a1   : > { %v3886_v15 = vadd.f32 %v7427_v33, %v3847_v59 }
 0x6a2   : > { %v3919_v26 = vadd.f32 %v4891_v17, %v3887_v58  ;;  %v4901_v58 = vld [vmem:[%s5748_s1 + $0x58] sm:$0xff]  ;;  %v4902_v17 = vld [vmem:[%s5748_s1 + $0x50] sm:$0xff] }
 0x6a3   : > { %v3918_v25 = vadd.f32 %v4892_v60, %v3886_v15 }
 0x6a4   : > { %v3951_v7 = vmax.f32 %v3919_v26, 0.0 }
 0x6a5   : > { %v3950_v48 = vmax.f32 %v3918_v25, 0.0  ;;  %v4679_v47 = vpop.f32.mrb[34].mxu1 }
 0x6a6   : > { %3983 = vst.msk [vmem:[%s7437_s14 + $0x8] sm:$0xff] %vm795_vm0, %v3951_v7  ;;  %v3850_v35 = vmul.f32 %v4679_v47, %v7425_v6  ;;  %v3691_v18 = vpop.f32.mrb[35].mxu1 }
 0x6a7   : > { %3982 = vst.msk [vmem:[%s7437_s14] sm:$0xff] %vm795_vm0, %v3950_v48  ;;  %v3849_v36 = vmul.f32 %v7425_v6, %v3691_v18 }
 0x6a8   : > { %v3889_v44 = vadd.f32 %v7427_v33, %v3850_v35 }
 0x6a9   : > { %v3888_v43 = vadd.f32 %v7427_v33, %v3849_v36 }
 0x6aa   : > { %v3921_v12 = vadd.f32 %v4893_v28, %v3889_v44  ;;  %v4903_v44 = vld [vmem:[%s5748_s1 + $0x68] sm:$0xff]  ;;  %v4904_v28 = vld [vmem:[%s5748_s1 + $0x60] sm:$0xff] }
 0x6ab   : > { %v3920_v20 = vadd.f32 %v4894_v53, %v3888_v43 }
 0x6ac   : > { %v3953_v62 = vmax.f32 %v3921_v12, 0.0 }
 0x6ad   : > { %v3952_v52 = vmax.f32 %v3920_v20, 0.0  ;;  %v4682_v37 = vpop.f32.mrb[36].mxu1 }
 0x6ae   : > { %3985 = vst.msk [vmem:[%s7437_s14 + $0x18] sm:$0xff] %vm795_vm0, %v3953_v62  ;;  %v3852_v32 = vmul.f32 %v4682_v37, %v7425_v6  ;;  %v3701_v0 = vpop.f32.mrb[37].mxu1 }
 0x6af   : > { %3984 = vst.msk [vmem:[%s7437_s14 + $0x10] sm:$0xff] %vm795_vm0, %v3952_v52  ;;  %v3851_v21 = vmul.f32 %v7425_v6, %v3701_v0 }
 0x6b0   : > { %v3891_v38 = vadd.f32 %v7427_v33, %v3852_v32 }
 0x6b1   : > { %v3890_v22 = vadd.f32 %v7427_v33, %v3851_v21 }
 0x6b2   : > { %v3923_v63 = vadd.f32 %v4895_v54, %v3891_v38  ;;  %v4905_v38 = vld [vmem:[%s5748_s1 + $0x78] sm:$0xff]  ;;  %v4906_v54 = vld [vmem:[%s5748_s1 + $0x70] sm:$0xff] }
 0x6b3   : > { %v3922_v50 = vadd.f32 %v4896_v55, %v3890_v22 }
 0x6b4   : > { %v3955_v8 = vmax.f32 %v3923_v63, 0.0 }
 0x6b5   : > { %v3954_v24 = vmax.f32 %v3922_v50, 0.0  ;;  %v4685_v41 = vpop.f32.mrb[38].mxu1 }
 0x6b6   : > { %3987 = vst.msk [vmem:[%s7437_s14 + $0x28] sm:$0xff] %vm795_vm0, %v3955_v8  ;;  %v3854_v42 = vmul.f32 %v4685_v41, %v7425_v6  ;;  %v3711_v51 = vpop.f32.mrb[39].mxu1 }
 0x6b7   : > { %3986 = vst.msk [vmem:[%s7437_s14 + $0x20] sm:$0xff] %vm795_vm0, %v3954_v24  ;;  %v3853_v34 = vmul.f32 %v7425_v6, %v3711_v51 }
 0x6b8   : > { %v3893_v45 = vadd.f32 %v7427_v33, %v3854_v42 }
 0x6b9   : > { %v3892_v19 = vadd.f32 %v7427_v33, %v3853_v34 }
 0x6ba   : > { %v3925_v39 = vadd.f32 %v4897_v1, %v3893_v45  ;;  %v4907_v45 = vld [vmem:[%s5748_s1 + $0x88] sm:$0xff]  ;;  %v4908_v1 = vld [vmem:[%s5748_s1 + $0x80] sm:$0xff] }
 0x6bb   : > { %v3924_v23 = vadd.f32 %v4898_v57, %v3892_v19 }
 0x6bc   : > { %v3957_v13 = vmax.f32 %v3925_v39, 0.0 }
 0x6bd   : > { %v3956_v31 = vmax.f32 %v3924_v23, 0.0  ;;  %v4688_v16 = vpop.f32.mrb[40].mxu1 }
 0x6be   : > { %3989 = vst.msk [vmem:[%s7437_s14 + $0x38] sm:$0xff] %vm795_vm0, %v3957_v13  ;;  %v3856_v2 = vmul.f32 %v4688_v16, %v7425_v6  ;;  %v3721_v5 = vpop.f32.mrb[41].mxu1 }
 0x6bf   : > { %3988 = vst.msk [vmem:[%s7437_s14 + $0x30] sm:$0xff] %vm795_vm0, %v3956_v31  ;;  %v3855_v40 = vmul.f32 %v7425_v6, %v3721_v5 }
 0x6c0   : > { %v3895_v46 = vadd.f32 %v7427_v33, %v3856_v2 }
 0x6c1   : > { %v3894_v61 = vadd.f32 %v7427_v33, %v3855_v40 }
 0x6c2   : > { %v3927_v29 = vadd.f32 %v4899_v27, %v3895_v46  ;;  %v4909_v46 = vld [vmem:[%s5748_s1 + $0x98] sm:$0xff]  ;;  %v4910_v27 = vld [vmem:[%s5748_s1 + $0x90] sm:$0xff] }
 0x6c3   : > { %v3926_v49 = vadd.f32 %v4900_v9, %v3894_v61 }
 0x6c4   : > { %v3959_v3 = vmax.f32 %v3927_v29, 0.0 }
 0x6c5   : > { %v3958_v56 = vmax.f32 %v3926_v49, 0.0  ;;  %v4691_v30 = vpop.f32.mrb[42].mxu1 }
 0x6c6   : > { %3991 = vst.msk [vmem:[%s7437_s14 + $0x48] sm:$0xff] %vm795_vm0, %v3959_v3  ;;  %v3858_v4 = vmul.f32 %v4691_v30, %v7425_v6  ;;  %v3731_v10 = vpop.f32.mrb[43].mxu1 }
 0x6c7   : > { %3990 = vst.msk [vmem:[%s7437_s14 + $0x40] sm:$0xff] %vm795_vm0, %v3958_v56  ;;  %v3857_v14 = vmul.f32 %v7425_v6, %v3731_v10 }
 0x6c8   : > { %v3897_v11 = vadd.f32 %v7427_v33, %v3858_v4 }
 0x6c9   : > { %v3896_v59 = vadd.f32 %v7427_v33, %v3857_v14 }
 0x6ca   : > { %v3929_v15 = vadd.f32 %v4901_v58, %v3897_v11  ;;  %v4911_v11 = vld [vmem:[%s5748_s1 + $0xa8] sm:$0xff]  ;;  %v4912_v58 = vld [vmem:[%s5748_s1 + $0xa0] sm:$0xff] }
 0x6cb   : > { %v3928_v26 = vadd.f32 %v4902_v17, %v3896_v59 }
 0x6cc   : > { %v3961_v60 = vmax.f32 %v3929_v15, 0.0 }
 0x6cd   : > { %v3960_v25 = vmax.f32 %v3928_v26, 0.0  ;;  %v4694_v7 = vpop.f32.mrb[44].mxu1 }
 0x6ce   : > { %3993 = vst.msk [vmem:[%s7437_s14 + $0x58] sm:$0xff] %vm795_vm0, %v3961_v60  ;;  %v3860_v48 = vmul.f32 %v4694_v7, %v7425_v6  ;;  %v3741_v47 = vpop.f32.mrb[45].mxu1 }
 0x6cf   : > { %3992 = vst.msk [vmem:[%s7437_s14 + $0x50] sm:$0xff] %vm795_vm0, %v3960_v25  ;;  %v3859_v35 = vmul.f32 %v7425_v6, %v3741_v47 }
 0x6d0   : > { %v3899_v18 = vadd.f32 %v7427_v33, %v3860_v48 }
 0x6d1   : > { %v3898_v36 = vadd.f32 %v7427_v33, %v3859_v35 }
 0x6d2   : > { %v3931_v43 = vadd.f32 %v4903_v44, %v3899_v18  ;;  %v4913_v18 = vld [vmem:[%s5748_s1 + $0xb8] sm:$0xff]  ;;  %v4914_v44 = vld [vmem:[%s5748_s1 + $0xb0] sm:$0xff] }
 0x6d3   : > { %v3930_v12 = vadd.f32 %v4904_v28, %v3898_v36 }
 0x6d4   : > { %v3963_v53 = vmax.f32 %v3931_v43, 0.0 }
 0x6d5   : > { %v3962_v20 = vmax.f32 %v3930_v12, 0.0  ;;  %v4697_v62 = vpop.f32.mrb[46].mxu1 }
 0x6d6   : > { %3995 = vst.msk [vmem:[%s7437_s14 + $0x68] sm:$0xff] %vm795_vm0, %v3963_v53  ;;  %v3862_v52 = vmul.f32 %v4697_v62, %v7425_v6  ;;  %v3751_v37 = vpop.f32.mrb[47].mxu1 }
 0x6d7   : > { %3994 = vst.msk [vmem:[%s7437_s14 + $0x60] sm:$0xff] %vm795_vm0, %v3962_v20  ;;  %v3861_v32 = vmul.f32 %v7425_v6, %v3751_v37 }
 0x6d8   : > { %v3901_v0 = vadd.f32 %v7427_v33, %v3862_v52 }
 0x6d9   : > { %v3900_v21 = vadd.f32 %v7427_v33, %v3861_v32 }
 0x6da   : > { %v3933_v22 = vadd.f32 %v4905_v38, %v3901_v0  ;;  %v4915_v0 = vld [vmem:[%s5748_s1 + $0xc8] sm:$0xff]  ;;  %v4916_v38 = vld [vmem:[%s5748_s1 + $0xc0] sm:$0xff] }
 0x6db   : > { %v3932_v63 = vadd.f32 %v4906_v54, %v3900_v21 }
 0x6dc   : > { %v3965_v55 = vmax.f32 %v3933_v22, 0.0 }
 0x6dd   : > { %v3964_v50 = vmax.f32 %v3932_v63, 0.0  ;;  %v4700_v8 = vpop.f32.mrb[48].mxu1 }
 0x6de   : > { %3997 = vst.msk [vmem:[%s7437_s14 + $0x78] sm:$0xff] %vm795_vm0, %v3965_v55  ;;  %v3864_v24 = vmul.f32 %v4700_v8, %v7425_v6  ;;  %v3761_v41 = vpop.f32.mrb[49].mxu1 }
 0x6df   : > { %3996 = vst.msk [vmem:[%s7437_s14 + $0x70] sm:$0xff] %vm795_vm0, %v3964_v50  ;;  %v3863_v42 = vmul.f32 %v7425_v6, %v3761_v41 }
 0x6e0   : > { %v3903_v51 = vadd.f32 %v7427_v33, %v3864_v24 }
 0x6e1   : > { %v3902_v34 = vadd.f32 %v7427_v33, %v3863_v42 }
 0x6e2   : > { %v3935_v19 = vadd.f32 %v4907_v45, %v3903_v51  ;;  %v4917_v51 = vld [vmem:[%s5748_s1 + $0xd8] sm:$0xff]  ;;  %v4918_v45 = vld [vmem:[%s5748_s1 + $0xd0] sm:$0xff] }
 0x6e3   : > { %v3934_v39 = vadd.f32 %v4908_v1, %v3902_v34 }
 0x6e4   : > { %v3967_v57 = vmax.f32 %v3935_v19, 0.0 }
 0x6e5   : > { %v3966_v23 = vmax.f32 %v3934_v39, 0.0  ;;  %v4703_v13 = vpop.f32.mrb[50].mxu1 }
 0x6e6   : > { %3999 = vst.msk [vmem:[%s7437_s14 + $0x88] sm:$0xff] %vm795_vm0, %v3967_v57  ;;  %v3866_v31 = vmul.f32 %v4703_v13, %v7425_v6  ;;  %v3771_v16 = vpop.f32.mrb[51].mxu1 }
 0x6e7   : > { %3998 = vst.msk [vmem:[%s7437_s14 + $0x80] sm:$0xff] %vm795_vm0, %v3966_v23  ;;  %v3865_v2 = vmul.f32 %v7425_v6, %v3771_v16 }
 0x6e8   : > { %v3905_v5 = vadd.f32 %v7427_v33, %v3866_v31 }
 0x6e9   : > { %v3904_v40 = vadd.f32 %v7427_v33, %v3865_v2 }
 0x6ea   : > { %v3937_v61 = vadd.f32 %v4909_v46, %v3905_v5  ;;  %v4919_v5 = vld [vmem:[%s5748_s1 + $0xe8] sm:$0xff]  ;;  %v4920_v46 = vld [vmem:[%s5748_s1 + $0xe0] sm:$0xff] }
 0x6eb   : > { %v3936_v29 = vadd.f32 %v4910_v27, %v3904_v40 }
 0x6ec   : > { %v3969_v9 = vmax.f32 %v3937_v61, 0.0 }
 0x6ed   : > { %v3968_v49 = vmax.f32 %v3936_v29, 0.0  ;;  %v4706_v3 = vpop.f32.mrb[52].mxu1 }
 0x6ee   : > { %4001 = vst.msk [vmem:[%s7437_s14 + $0x98] sm:$0xff] %vm795_vm0, %v3969_v9  ;;  %v3868_v56 = vmul.f32 %v4706_v3, %v7425_v6  ;;  %v3781_v30 = vpop.f32.mrb[53].mxu1 }
 0x6ef   : > { %4000 = vst.msk [vmem:[%s7437_s14 + $0x90] sm:$0xff] %vm795_vm0, %v3968_v49  ;;  %v3867_v4 = vmul.f32 %v7425_v6, %v3781_v30 }
 0x6f0   : > { %v3907_v10 = vadd.f32 %v7427_v33, %v3868_v56 }
 0x6f1   : > { %v3906_v14 = vadd.f32 %v7427_v33, %v3867_v4 }
 0x6f2   : > { %v3939_v59 = vadd.f32 %v4911_v11, %v3907_v10  ;;  %v4921_v10 = vld [vmem:[%s5748_s1 + $0xf8] sm:$0xff]  ;;  %v4922_v11 = vld [vmem:[%s5748_s1 + $0xf0] sm:$0xff]  ;;  %s5237_s1 = sshll.u32 %s5337_s22, 4  ;;  %s5238_s1 = int_to_ptr.vmem [resolvable:$false] %s5237_s1 }
 0x6f3   : > { %v3938_v15 = vadd.f32 %v4912_v58, %v3906_v14  ;;  %s5239_s2 = scalar_lea.vmem %s5238_s1, 8192  ;;  %p5240_p4 = scmp.lt.s32.totalorder %s7596_s13, %s5238_s1 }
 0x6f4   : > { %v3971_v17 = vmax.f32 %v3939_v59, 0.0  ;;  %p5241_p10 = scmp.lt.s32.totalorder %s5239_s2, %s5233_s30 }
 0x6f5   : > { %v3970_v26 = vmax.f32 %v3938_v15, 0.0  ;;  %v4709_v60 = vpop.f32.mrb[54].mxu1 }
 0x6f6   : > { %4003 = vst.msk [vmem:[%s7437_s14 + $0xa8] sm:$0xff] %vm795_vm0, %v3971_v17  ;;  %v3870_v25 = vmul.f32 %v4709_v60, %v7425_v6  ;;  %v3791_v7 = vpop.f32.mrb[55].mxu1  ;;  %p5242_p11 = por %p5241_p10, %p5240_p4 }
 0x6f7   : > { %4002 = vst.msk [vmem:[%s7437_s14 + $0xa0] sm:$0xff] %vm795_vm0, %v3970_v26  ;;  %v3869_v48 = vmul.f32 %v7425_v6, %v3791_v7 }
 0x6f8   : > { %v3909_v47 = vadd.f32 %v7427_v33, %v3870_v25  ;;  %p5243_p0 = pnand %p5242_p11, %p5236_p8 }
 0x6f9   : > { %v3908_v35 = vadd.f32 %v7427_v33, %v3869_v48 }
 0x6fa   : > { %v3941_v36 = vadd.f32 %v4913_v18, %v3909_v47 }
 0x6fb   : > { %v3940_v43 = vadd.f32 %v4914_v44, %v3908_v35 }
 0x6fc   : > { %v3973_v28 = vmax.f32 %v3941_v36, 0.0 }
 0x6fd   : > { %v3972_v12 = vmax.f32 %v3940_v43, 0.0  ;;  %v4712_v53 = vpop.f32.mrb[56].mxu1 }
 0x6fe   : > { %4005 = vst.msk [vmem:[%s7437_s14 + $0xb8] sm:$0xff] %vm795_vm0, %v3973_v28  ;;  %v3872_v20 = vmul.f32 %v4712_v53, %v7425_v6  ;;  %v3801_v62 = vpop.f32.mrb[57].mxu1 }
 0x6ff   : > { %4004 = vst.msk [vmem:[%s7437_s14 + $0xb0] sm:$0xff] %vm795_vm0, %v3972_v12  ;;  %v3871_v52 = vmul.f32 %v7425_v6, %v3801_v62 }
 0x700   : > { %v3911_v37 = vadd.f32 %v7427_v33, %v3872_v20 }
 0x701   : > { %v3910_v32 = vadd.f32 %v7427_v33, %v3871_v52 }
 0x702   : > { %v3943_v21 = vadd.f32 %v4915_v0, %v3911_v37 }
 0x703   : > { %v3942_v22 = vadd.f32 %v4916_v38, %v3910_v32 }
 0x704   : > { %v3975_v54 = vmax.f32 %v3943_v21, 0.0 }
 0x705   : > { %v3974_v63 = vmax.f32 %v3942_v22, 0.0 }
 0x706   : > { %4007 = vst.msk [vmem:[%s7437_s14 + $0xc8] sm:$0xff] %vm795_vm0, %v3975_v54  ;;  %v4715_v55 = vpop.f32.mrb[58].mxu1 }
 0x707   : > { %4006 = vst.msk [vmem:[%s7437_s14 + $0xc0] sm:$0xff] %vm795_vm0, %v3974_v63  ;;  %v3874_v50 = vmul.f32 %v4715_v55, %v7425_v6  ;;  %v3811_v8 = vpop.f32.mrb[59].mxu1 }
 0x708   : > { %v3873_v24 = vmul.f32 %v7425_v6, %v3811_v8 }
 0x709   : > { %v3913_v41 = vadd.f32 %v7427_v33, %v3874_v50 }
 0x70a   : > { %v3912_v42 = vadd.f32 %v7427_v33, %v3873_v24 }
 0x70b   : > { %v3945_v34 = vadd.f32 %v4917_v51, %v3913_v41 }
 0x70c   : > { %v3944_v19 = vadd.f32 %v4918_v45, %v3912_v42 }
 0x70d   : > { %v3977_v1 = vmax.f32 %v3945_v34, 0.0 }
 0x70e   : > { %v3976_v39 = vmax.f32 %v3944_v19, 0.0  ;;  %v4718_v57 = vpop.f32.mrb[60].mxu1 }
 0x70f   : > { %4009 = vst.msk [vmem:[%s7437_s14 + $0xd8] sm:$0xff] %vm795_vm0, %v3977_v1  ;;  %v3876_v23 = vmul.f32 %v4718_v57, %v7425_v6  ;;  %v3821_v13 = vpop.f32.mrb[61].mxu1 }
 0x710   : > { %4008 = vst.msk [vmem:[%s7437_s14 + $0xd0] sm:$0xff] %vm795_vm0, %v3976_v39  ;;  %v3875_v31 = vmul.f32 %v7425_v6, %v3821_v13 }
 0x711   : > { %v3915_v16 = vadd.f32 %v7427_v33, %v3876_v23 }
 0x712   : > { %v3914_v2 = vadd.f32 %v7427_v33, %v3875_v31 }
 0x713   : > { %v3947_v40 = vadd.f32 %v4919_v5, %v3915_v16 }
 0x714   : > { %v3946_v61 = vadd.f32 %v4920_v46, %v3914_v2 }
 0x715   : > { %v3979_v27 = vmax.f32 %v3947_v40, 0.0 }
 0x716   : > { %v3978_v29 = vmax.f32 %v3946_v61, 0.0 }
 0x717   : > { %v4721_v9 = vpop.f32.mrb[62].mxu1  ;;  %4011 = vst.msk [vmem:[%s7437_s14 + $0xe8] sm:$0xff] %vm795_vm0, %v3979_v27 }
 0x718   : > { %v3878_v49 = vmul.f32 %v4721_v9, %v7425_v6  ;;  %v3831_v3 = vpop.f32.mrb[63].mxu1  ;;  %4010 = vst.msk [vmem:[%s7437_s14 + $0xe0] sm:$0xff] %vm795_vm0, %v3978_v29 }
 0x719   : > { %v3877_v56 = vmul.f32 %v7425_v6, %v3831_v3 }
 0x71a   : > { %v3917_v30 = vadd.f32 %v7427_v33, %v3878_v49 }
 0x71b   : > { %v3916_v4 = vadd.f32 %v7427_v33, %v3877_v56 }
 0x71c   : > { %v3949_v14 = vadd.f32 %v4921_v10, %v3917_v30 }
 0x71d   : > { %v3948_v59 = vadd.f32 %v4922_v11, %v3916_v4 }
 0x71e   : > { %v3981_v58 = vmax.f32 %v3949_v14, 0.0 }
 0x71f   : > { %v3980_v15 = vmax.f32 %v3948_v59, 0.0 }
 0x720   : > { %4013 = vst.msk [vmem:[%s7437_s14 + $0xf8] sm:$0xff] %vm795_vm0, %v3981_v58 }
 0x721   : > { %4012 = vst.msk [vmem:[%s7437_s14 + $0xf0] sm:$0xff] %vm795_vm0, %v3980_v15 }
 0x722   : > { %5246 = shalt.err (!%p5243_p0)
}
 0x723   : > { %s5247_s14 = scalar_lea.hbm %s7594_s15, 4096  ;;  %s5251_s26 = scalar_lea.hbm %s7697_s21, 8192 }
 0x724   : > { %p5248_p5 = scmp.ne.s32.totalorder %s7594_s15, %s5247_s14  ;;  %p5252_p9 = scmp.lt.u32.totalorder %s7594_s15, %s7697_s21 }
 0x725   : > { %p5253_p12 = scmp.lt.u32.totalorder %s5251_s26, %s5247_s14  ;;  %p5255_p1 = scmp.lt.u32.totalorder %s5247_s14, %s7594_s15 }
 0x726   : > { %p5249_p7 = pnand %p5248_p5, %p7698_p3 }
 0x727   : > { %p5254_p13 = por %p5253_p12, %p5252_p9 }
 0x728   : > { %p5250_p6 = pneg %p5249_p7 }
 0x729   : > { %p5256_p2 = por %p5255_p1, %p5254_p13 }
 0x72b   : > { %p5257_p8 = pnand %p5256_p2, %p5250_p6 }
 0x72d   : > { %5260 = shalt.err (!%p5257_p8)
}
 0x72e   : > { %s5338_s30 = smov 128  }
 0x72f   : > { %4780 = dma.vmem_to_hbm [thread:$0]  (%p7698_p3), %s7596_s13, 4096, %s7594_s15, %s4015_s23, %s5338_s30, %s5338_s30, %s5335_s12  }
 0x730 PF: > { %s4043_s2 = sand.u32 1, %s5307_s17   ;;  %p7699_p4 = scmp.ne.s32.totalorder %s7681_s25, 0 }
 0x731   : > { %p7700_p10 = scmp.ge.s32.totalorder %s5319_s20, 2  ;;  %s4044_s14 = scalar_lea.sflag [#allocation4], %s4043_s2 }
 0x733   : > { %p4818_p11 = pnand %p7700_p10, %p7699_p4 }
 0x735   : > { %5302 = dma.done.wait (!%p4818_p11), %s4044_s14, 4096  }
 0x736   : > { %5304 = vsyncadd (!%p4818_p11), %s4044_s14, 4294963200  ;;  %p29_p0 = scmp.ge.s32.totalorder %s5660_s27, 4   ;;  %s7701_s17 = smov %s5311_s18 }
 0x737   : > { %s7702_s18 = smov %s5315_s19  ;;  %s7703_s19 = smov %s5671_s11 }
 0x738   : > { %s7704_s20 = smov %s5660_s27  ;;  %31 = sbr.rel (!%p29_p0) target bundleno = 15 (0xf), region = 149 }
 0x73f   :  { %4049 = vsyncpa [#allocation3], 1 }
 0x740   :  { %4051 = vsyncpa [#allocation3 + $0x1], 1 }
 0x741   :  { %4052 = vsyncpa [#allocation6], 1 }
 0x742   :  { %4053 = vsyncpa [#allocation9], 1 }
 0x743   :  { %4054 = vsyncpa [#allocation12], 1 }
 0x744   :  { %4055 = vsyncpa [#allocation15], 1 }
 0x745   :  { %4056 = vsyncpa [#allocation18], 1 }
 0x746   :  { %4057 = vsyncpa [#allocation4], 1 }
 0x747   :  { %4059 = vsyncpa [#allocation4 + $0x1], 1 }

</bundles_post_ra>
